<compile_context>
chip_gen: v7x
topology: tpu7x:2x2x1
jax: 0.10.0
libtpu: 0.0.40
codegen_flags: <defaults>
</compile_context>

<pallas_src>
import functools
import math

import jax
import jax.numpy as jnp
from jax import lax
from jax.experimental import pallas as pl
from jax.experimental.pallas import tpu as pltpu  # noqa: F401  (TPU backend)


_STAGES = ("cell_to_track", "cell_to_topo", "track_to_cell",
           "track_to_topo", "topo_to_cell", "topo_to_track")

_NEG = -1e30


# ---------------------------------------------------------------------------
# Fused kernel: all 6 CrossModalAttention stages in one body (no grid).
# ---------------------------------------------------------------------------
def _fused_kernel(cells_ref, topos_ref, tracks_ref,
                  bias0_ref, bias1_ref, bias2_ref, bias3_ref, bias4_ref, bias5_ref,
                  vm_cell_ref, vm2_cell_ref,
                  vm_topo_ref, vm2_topo_ref,
                  vm_track_ref, vm2_track_ref,
                  wq_ref, wkv_ref, wo_ref,
                  bq_ref, bkv_ref, bo_ref, ln_ref,
                  cells_out_ref, topos_out_ref, tracks_out_ref,
                  *, num_heads):
    f32 = jnp.float32
    H = num_heads
    D = wq_ref.shape[-1]

    def cross_attn(x_q, x_kv, bias_ref, vm_ref, vm2_ref, idx):
        # x_q: (B*Sq, D)   x_kv: (B*Sk, D)
        # bias_ref: (B*Sq, H*B*Sk) additive 0/-1e30 bias (cross-batch + key padding)
        # vm_ref:  (H*B*Sk, D)  0/1 head-membership mask (row head == feature head)
        # vm2_ref: (H*B*Sk, 2D) = [vm | vm]
        wq = wq_ref[idx]          # (D, D), 1/sqrt(head_dim) pre-folded
        wkv = wkv_ref[idx]        # (D, 3D) = [wk | wv | 0]
        wo = wo_ref[idx]          # (D, D)
        bq = bq_ref[idx]          # (1, D), pre-scaled
        bkv = bkv_ref[idx]        # (1, 3D) = [bk | bv | 1]
        bo = bo_ref[idx]          # (1, D)
        ln = ln_ref[idx]          # (2, D)  [gamma, beta]

        # fused projections on batch-folded rows (2 matmuls)
        q = jnp.dot(x_q, wq, preferred_element_type=f32) + bq        # (B*Sq, D)
        kv = jnp.dot(x_kv, wkv, preferred_element_type=f32) + bkv    # (B*Sk, 3D)
        k = kv[:, :D]                                                # (B*Sk, D)
        v1 = kv[:, D:]                                               # (B*Sk, 2D) = [v | 1]

        # block-diagonal head expansion: sublane tiling + 0/1 mask, no transposes
        k_t = jnp.tile(k, (H, 1)) * vm_ref[...]                      # (H*B*Sk, D)
        v_aug = jnp.tile(v1, (H, 1)) * vm2_ref[...]                  # (H*B*Sk, 2D) = [V_exp | vm]

        # all heads + all batches in ONE score matmul (RHS consumed transposed)
        s = lax.dot_general(q, k_t, (((1,), (1,)), ((), ())),
                            preferred_element_type=f32)              # (B*Sq, H*B*Sk)
        s = s + bias_ref[...]
        m = jnp.max(s, axis=-1, keepdims=True)                       # shared row max
        e = jnp.exp(s - m)

        # attention numerator and per-head softmax denominator in ONE matmul
        pv = jnp.dot(e, v_aug, preferred_element_type=f32)           # (B*Sq, 2D)
        den = jnp.maximum(pv[:, D:], 1e-30)                          # guard head underflow -> NaN
        ctx = pv[:, :D] * pl.reciprocal(den, approx=True)            # per-head softmax applied

        attn = jnp.dot(ctx, wo, preferred_element_type=f32) + bo
        # residual (dropout = identity at inference) + LayerNorm(eps=1e-5)
        x = x_q + attn
        mu = jnp.mean(x, axis=-1, keepdims=True)
        var = jnp.mean(jnp.square(x - mu), axis=-1, keepdims=True)
        y = (x - mu) * lax.rsqrt(var + 1e-5)
        return y * ln[0:1] + ln[1:2]

    cells = cells_ref[...]
    topos = topos_ref[...]
    tracks = tracks_ref[...]

    cells = cross_attn(cells, tracks, bias0_ref, vm_track_ref, vm2_track_ref, 0)
    cells = cross_attn(cells, topos, bias1_ref, vm_topo_ref, vm2_topo_ref, 1)
    tracks = cross_attn(tracks, cells, bias2_ref, vm_cell_ref, vm2_cell_ref, 2)
    tracks = cross_attn(tracks, topos, bias3_ref, vm_topo_ref, vm2_topo_ref, 3)
    topos = cross_attn(topos, cells, bias4_ref, vm_cell_ref, vm2_cell_ref, 4)
    topos = cross_attn(topos, tracks, bias5_ref, vm_track_ref, vm2_track_ref, 5)

    cells_out_ref[...] = cells.astype(cells_out_ref.dtype)
    topos_out_ref[...] = topos.astype(topos_out_ref.dtype)
    tracks_out_ref[...] = tracks.astype(tracks_out_ref.dtype)


# ---------------------------------------------------------------------------
# Wrapper: MultiModalInteraction.forward as one pallas_call.
# ---------------------------------------------------------------------------
@functools.partial(jax.jit, static_argnames=("num_heads",))
def multimodal_interaction(cells, topos, tracks,
                           cell_mask, topo_mask, track_mask,
                           params, num_heads):
    B, Sc, D = cells.shape
    St = topos.shape[1]
    Sr = tracks.shape[1]
    H = num_heads
    assert D % H == 0, "hidden_dim must be divisible by num_heads"
    hd = D // H
    f32 = jnp.float32

    def stage_bias(Sq, Sk, key_mask):
        # (B*Sq, H*B*Sk) additive bias; column index = h*(B*Sk) + b*Sk + k
        row_b = jnp.repeat(jnp.arange(B), Sq)[:, None]
        col_b = jnp.tile(jnp.repeat(jnp.arange(B), Sk), H)[None, :]
        bad = row_b != col_b                                   # cross-batch columns
        if key_mask is not None:                               # True = valid token
            pad = jnp.tile(jnp.logical_not(key_mask).reshape(-1), H)[None, :]
            bad = jnp.logical_or(bad, pad)
        return jnp.where(bad, _NEG, 0.0).astype(f32)

    def head_masks(Sk):
        # vm: (H*B*Sk, D) 0/1 head-membership; vm2 = [vm | vm]
        row_head = (jnp.arange(H * B * Sk) // (B * Sk))[:, None]
        col_head = (jnp.arange(D) // hd)[None, :]
        vm = (row_head == col_head).astype(f32)
        return vm, jnp.tile(vm, (1, 2))

    vm_cell, vm2_cell = head_masks(Sc)
    vm_topo, vm2_topo = head_masks(St)
    vm_track, vm2_track = head_masks(Sr)

    biases = (stage_bias(Sc, Sr, track_mask),   # cell_to_track
              stage_bias(Sc, St, topo_mask),    # cell_to_topo
              stage_bias(Sr, Sc, cell_mask),    # track_to_cell
              stage_bias(Sr, St, topo_mask),    # track_to_topo
              stage_bias(St, Sc, cell_mask),    # topo_to_cell
              stage_bias(St, Sr, track_mask))   # topo_to_track

    scale = 1.0 / math.sqrt(hd)
    stack = lambda name: jnp.stack([params[s][name] for s in _STAGES])
    wq = stack("wq") * scale                                   # fold q scaling into weights
    wk, wv, wo = stack("wk"), stack("wv"), stack("wo")
    wkv = jnp.concatenate([wk, wv, jnp.zeros_like(wk)], axis=-1)        # (6, D, 3D)
    b_all = stack("b")                                         # (6, 4, D) [bq, bk, bv, bo]
    bq = b_all[:, 0:1] * scale                                 # (6, 1, D)
    bkv = jnp.concatenate([b_all[:, 1:2], b_all[:, 2:3],
                           jnp.ones_like(b_all[:, 0:1])], axis=-1)      # (6, 1, 3D)
    bo = b_all[:, 3:4]                                         # (6, 1, D)
    ln_all = stack("ln")                                       # (6, 2, D)

    kernel = functools.partial(_fused_kernel, num_heads=H)

    out_shape = (jax.ShapeDtypeStruct((B * Sc, D), cells.dtype),
                 jax.ShapeDtypeStruct((B * St, D), topos.dtype),
                 jax.ShapeDtypeStruct((B * Sr, D), tracks.dtype))

    # No grid / BlockSpecs: total footprint < 1 MiB, everything lives whole in
    # VMEM and the six stages run in a single kernel invocation (no per-step
    # grid overhead on this microsecond-scale kernel).
    # TODO(synk): on v7x (2 TensorCores) batch could become a parallel grid axis.
    cells_o, topos_o, tracks_o = pl.pallas_call(kernel, out_shape=out_shape)(
        cells.reshape(B * Sc, D),
        topos.reshape(B * St, D),
        tracks.reshape(B * Sr, D),
        *biases,
        vm_cell, vm2_cell, vm_topo, vm2_topo, vm_track, vm2_track,
        wq, wkv, wo, bq, bkv, bo, ln_all)

    return (cells_o.reshape(B, Sc, D),
            topos_o.reshape(B, St, D),
            tracks_o.reshape(B, Sr, D))


# ---------------------------------------------------------------------------
# Deterministic parameter initialization (synthetic, no checkpoint load).
# ---------------------------------------------------------------------------
def init_params(key, hidden_dim):
    D = hidden_dim
    scale = 1.0 / (D ** 0.5)
    params = {}
    for i, name in enumerate(_STAGES):
        k = jax.random.fold_in(key, i)
        ks = jax.random.split(k, 5)
        params[name] = {
            "wq": jax.random.normal(ks[0], (D, D), jnp.float32) * scale,
            "wk": jax.random.normal(ks[1], (D, D), jnp.float32) * scale,
            "wv": jax.random.normal(ks[2], (D, D), jnp.float32) * scale,
            "wo": jax.random.normal(ks[3], (D, D), jnp.float32) * scale,
            "b":  jax.random.normal(ks[4], (4, D), jnp.float32) * 0.01,
            "ln": jnp.concatenate(
                [jnp.ones((1, D), jnp.float32), jnp.zeros((1, D), jnp.float32)], axis=0),
        }
    return params


if __name__ == "__main__":
    key = jax.random.PRNGKey(0)
    B, D, H = 2, 32, 8
    S_cell, S_topo, S_track = 16, 8, 8

    keys = jax.random.split(key, 4)
    cells = jax.random.normal(keys[0], (B, S_cell, D), jnp.float32)
    topos = jax.random.normal(keys[1], (B, S_topo, D), jnp.float32)
    tracks = jax.random.normal(keys[2], (B, S_track, D), jnp.float32)

    # validity masks (True = valid token); pad a few tail positions
    cell_mask = jnp.ones((B, S_cell), jnp.bool_).at[1, -3:].set(False)
    topo_mask = jnp.ones((B, S_topo), jnp.bool_).at[1, -2:].set(False)
    track_mask = jnp.ones((B, S_track), jnp.bool_).at[0, -1:].set(False)

    params = init_params(keys[3], D)

    out_cells, out_topos, out_tracks = multimodal_interaction(
        cells, topos, tracks, cell_mask, topo_mask, track_mask, params,
        num_heads=H)
    jax.block_until_ready((out_cells, out_topos, out_tracks))

    assert out_cells.shape == (B, S_cell, D)
    assert out_topos.shape == (B, S_topo, D)
    assert out_tracks.shape == (B, S_track, D)
    assert bool(jnp.all(jnp.isfinite(out_cells)))
    assert bool(jnp.all(jnp.isfinite(out_topos)))
    assert bool(jnp.all(jnp.isfinite(out_tracks)))
    print("KERNEL_OK")
</pallas_src>

<mosaic_0001>
module attributes {stable_mosaic.version = 11 : i64} {
  func.func @_fused_kernel(%arg0: memref<32x32xf32, #tpu.memory_space<vmem>>, %arg1: memref<16x32xf32, #tpu.memory_space<vmem>>, %arg2: memref<16x32xf32, #tpu.memory_space<vmem>>, %arg3: memref<32x128xf32, #tpu.memory_space<vmem>>, %arg4: memref<32x128xf32, #tpu.memory_space<vmem>>, %arg5: memref<16x256xf32, #tpu.memory_space<vmem>>, %arg6: memref<16x128xf32, #tpu.memory_space<vmem>>, %arg7: memref<16x256xf32, #tpu.memory_space<vmem>>, %arg8: memref<16x128xf32, #tpu.memory_space<vmem>>, %arg9: memref<256x32xf32, #tpu.memory_space<vmem>>, %arg10: memref<256x64xf32, #tpu.memory_space<vmem>>, %arg11: memref<128x32xf32, #tpu.memory_space<vmem>>, %arg12: memref<128x64xf32, #tpu.memory_space<vmem>>, %arg13: memref<128x32xf32, #tpu.memory_space<vmem>>, %arg14: memref<128x64xf32, #tpu.memory_space<vmem>>, %arg15: memref<6x32x32xf32, #tpu.memory_space<vmem>>, %arg16: memref<6x32x96xf32, #tpu.memory_space<vmem>>, %arg17: memref<6x32x32xf32, #tpu.memory_space<vmem>>, %arg18: memref<6x1x32xf32, #tpu.memory_space<vmem>>, %arg19: memref<6x1x96xf32, #tpu.memory_space<vmem>>, %arg20: memref<6x1x32xf32, #tpu.memory_space<vmem>>, %arg21: memref<6x2x32xf32, #tpu.memory_space<vmem>>, %arg22: memref<32x32xf32, #tpu.memory_space<vmem>>, %arg23: memref<16x32xf32, #tpu.memory_space<vmem>>, %arg24: memref<16x32xf32, #tpu.memory_space<vmem>>) attributes {dimension_semantics = [], scalar_prefetch = 0 : i64, scratch_operands = 0 : i64, tpu.core_type = #tpu.core_type<tc>} {
    %c0 = arith.constant 0 : index
    %c0_0 = arith.constant 0 : index
    %0 = vector.load %arg0[%c0, %c0_0] : memref<32x32xf32, #tpu.memory_space<vmem>>, vector<32x32xf32>
    %c0_1 = arith.constant 0 : index
    %c0_2 = arith.constant 0 : index
    %1 = vector.load %arg1[%c0_1, %c0_2] : memref<16x32xf32, #tpu.memory_space<vmem>>, vector<16x32xf32>
    %c0_3 = arith.constant 0 : index
    %c0_4 = arith.constant 0 : index
    %2 = vector.load %arg2[%c0_3, %c0_4] : memref<16x32xf32, #tpu.memory_space<vmem>>, vector<16x32xf32>
    %c0_5 = arith.constant 0 : index
    %c0_6 = arith.constant 0 : index
    %c0_7 = arith.constant 0 : index
    %3 = vector.load %arg15[%c0_5, %c0_6, %c0_7] : memref<6x32x32xf32, #tpu.memory_space<vmem>>, vector<1x32x32xf32>
    %4 = vector.shape_cast %3 : vector<1x32x32xf32> to vector<32x32xf32>
    %c0_8 = arith.constant 0 : index
    %c0_9 = arith.constant 0 : index
    %c0_10 = arith.constant 0 : index
    %5 = vector.load %arg16[%c0_8, %c0_9, %c0_10] : memref<6x32x96xf32, #tpu.memory_space<vmem>>, vector<1x32x96xf32>
    %6 = vector.shape_cast %5 : vector<1x32x96xf32> to vector<32x96xf32>
    %c0_11 = arith.constant 0 : index
    %c0_12 = arith.constant 0 : index
    %c0_13 = arith.constant 0 : index
    %7 = vector.load %arg17[%c0_11, %c0_12, %c0_13] : memref<6x32x32xf32, #tpu.memory_space<vmem>>, vector<1x32x32xf32>
    %8 = vector.shape_cast %7 : vector<1x32x32xf32> to vector<32x32xf32>
    %c0_14 = arith.constant 0 : index
    %c0_15 = arith.constant 0 : index
    %c0_16 = arith.constant 0 : index
    %9 = vector.load %arg18[%c0_14, %c0_15, %c0_16] : memref<6x1x32xf32, #tpu.memory_space<vmem>>, vector<1x1x32xf32>
    %10 = vector.shape_cast %9 : vector<1x1x32xf32> to vector<1x32xf32>
    %c0_17 = arith.constant 0 : index
    %c0_18 = arith.constant 0 : index
    %c0_19 = arith.constant 0 : index
    %11 = vector.load %arg19[%c0_17, %c0_18, %c0_19] : memref<6x1x96xf32, #tpu.memory_space<vmem>>, vector<1x1x96xf32>
    %12 = vector.shape_cast %11 : vector<1x1x96xf32> to vector<1x96xf32>
    %c0_20 = arith.constant 0 : index
    %c0_21 = arith.constant 0 : index
    %c0_22 = arith.constant 0 : index
    %13 = vector.load %arg20[%c0_20, %c0_21, %c0_22] : memref<6x1x32xf32, #tpu.memory_space<vmem>>, vector<1x1x32xf32>
    %14 = vector.shape_cast %13 : vector<1x1x32xf32> to vector<1x32xf32>
    %c0_23 = arith.constant 0 : index
    %c0_24 = arith.constant 0 : index
    %c0_25 = arith.constant 0 : index
    %15 = vector.load %arg21[%c0_23, %c0_24, %c0_25] : memref<6x2x32xf32, #tpu.memory_space<vmem>>, vector<1x2x32xf32>
    %16 = vector.shape_cast %15 : vector<1x2x32xf32> to vector<2x32xf32>
    %cst = arith.constant dense<0.000000e+00> : vector<32x32xf32>
    %17 = tpu.matmul %0, %4, %cst {dimension_numbers = #tpu.dot_dimension_numbers<[1], [0], [0], [1], [0, 0, 1, 1], [], []>} : vector<32x32xf32>, vector<32x32xf32>, vector<32x32xf32> -> vector<32x32xf32>
    %18 = vector.broadcast %10 : vector<1x32xf32> to vector<32x32xf32>
    %19 = arith.addf %17, %18 : vector<32x32xf32>
    %cst_26 = arith.constant dense<0.000000e+00> : vector<16x96xf32>
    %20 = tpu.matmul %2, %6, %cst_26 {dimension_numbers = #tpu.dot_dimension_numbers<[1], [0], [0], [1], [0, 0, 1, 1], [], []>} : vector<16x32xf32>, vector<32x96xf32>, vector<16x96xf32> -> vector<16x96xf32>
    %21 = vector.broadcast %12 : vector<1x96xf32> to vector<16x96xf32>
    %22 = arith.addf %20, %21 : vector<16x96xf32>
    %23 = vector.extract_strided_slice %22 {offsets = [0, 0], sizes = [16, 32], strides = [1, 1]} : vector<16x96xf32> to vector<16x32xf32>
    %24 = vector.extract_strided_slice %22 {offsets = [0, 32], sizes = [16, 64], strides = [1, 1]} : vector<16x96xf32> to vector<16x64xf32>
    %25 = tpu.concatenate %23, %23, %23, %23, %23, %23, %23, %23 in 0 : vector<16x32xf32>, vector<16x32xf32>, vector<16x32xf32>, vector<16x32xf32>, vector<16x32xf32>, vector<16x32xf32>, vector<16x32xf32>, vector<16x32xf32> -> vector<128x32xf32>
    %c0_27 = arith.constant 0 : index
    %c0_28 = arith.constant 0 : index
    %26 = vector.load %arg13[%c0_27, %c0_28] : memref<128x32xf32, #tpu.memory_space<vmem>>, vector<128x32xf32>
    %27 = arith.mulf %25, %26 : vector<128x32xf32>
    %28 = tpu.concatenate %24, %24, %24, %24, %24, %24, %24, %24 in 0 : vector<16x64xf32>, vector<16x64xf32>, vector<16x64xf32>, vector<16x64xf32>, vector<16x64xf32>, vector<16x64xf32>, vector<16x64xf32>, vector<16x64xf32> -> vector<128x64xf32>
    %c0_29 = arith.constant 0 : index
    %c0_30 = arith.constant 0 : index
    %29 = vector.load %arg14[%c0_29, %c0_30] : memref<128x64xf32, #tpu.memory_space<vmem>>, vector<128x64xf32>
    %30 = arith.mulf %28, %29 : vector<128x64xf32>
    %cst_31 = arith.constant dense<0.000000e+00> : vector<32x128xf32>
    %31 = tpu.matmul %19, %27, %cst_31 {dimension_numbers = #tpu.dot_dimension_numbers<[1], [1], [0], [0], [0, 0, 1, 0], [], []>} : vector<32x32xf32>, vector<128x32xf32>, vector<32x128xf32> -> vector<32x128xf32>
    %c0_32 = arith.constant 0 : index
    %c0_33 = arith.constant 0 : index
    %32 = vector.load %arg3[%c0_32, %c0_33] : memref<32x128xf32, #tpu.memory_space<vmem>>, vector<32x128xf32>
    %33 = arith.addf %31, %32 : vector<32x128xf32>
    %cst_34 = arith.constant dense<0xFF800000> : vector<32xf32>
    %34 = vector.multi_reduction <maximumf>, %33, %cst_34 [1] : vector<32x128xf32> to vector<32xf32>
    %35 = vector.shape_cast %34 : vector<32xf32> to vector<32x1xf32>
    %36 = vector.broadcast %35 : vector<32x1xf32> to vector<32x128xf32>
    %37 = arith.subf %33, %36 : vector<32x128xf32>
    %38 = math.exp %37 : vector<32x128xf32>
    %cst_35 = arith.constant dense<0.000000e+00> : vector<32x64xf32>
    %39 = tpu.matmul %38, %30, %cst_35 {dimension_numbers = #tpu.dot_dimension_numbers<[1], [0], [0], [1], [0, 0, 1, 1], [], []>} : vector<32x128xf32>, vector<128x64xf32>, vector<32x64xf32> -> vector<32x64xf32>
    %40 = vector.extract_strided_slice %39 {offsets = [0, 32], sizes = [32, 32], strides = [1, 1]} : vector<32x64xf32> to vector<32x32xf32>
    %cst_36 = arith.constant 1.000000e-30 : f32
    %41 = vector.broadcast %cst_36 : f32 to vector<32x32xf32>
    %42 = arith.maximumf %40, %41 : vector<32x32xf32>
    %43 = vector.extract_strided_slice %39 {offsets = [0, 0], sizes = [32, 32], strides = [1, 1]} : vector<32x64xf32> to vector<32x32xf32>
    %44 = tpu.reciprocal %42 {approx = true} : vector<32x32xf32> -> vector<32x32xf32>
    %45 = arith.mulf %43, %44 : vector<32x32xf32>
    %cst_37 = arith.constant dense<0.000000e+00> : vector<32x32xf32>
    %46 = tpu.matmul %45, %8, %cst_37 {dimension_numbers = #tpu.dot_dimension_numbers<[1], [0], [0], [1], [0, 0, 1, 1], [], []>} : vector<32x32xf32>, vector<32x32xf32>, vector<32x32xf32> -> vector<32x32xf32>
    %47 = vector.broadcast %14 : vector<1x32xf32> to vector<32x32xf32>
    %48 = arith.addf %46, %47 : vector<32x32xf32>
    %49 = arith.addf %0, %48 : vector<32x32xf32>
    %cst_38 = arith.constant dense<0.000000e+00> : vector<32xf32>
    %50 = vector.multi_reduction <add>, %49, %cst_38 [1] : vector<32x32xf32> to vector<32xf32>
    %51 = vector.shape_cast %50 : vector<32xf32> to vector<32x1xf32>
    %cst_39 = arith.constant 3.200000e+01 : f32
    %52 = vector.broadcast %cst_39 : f32 to vector<32x1xf32>
    %53 = arith.divf %51, %52 : vector<32x1xf32>
    %54 = vector.broadcast %53 : vector<32x1xf32> to vector<32x32xf32>
    %55 = arith.subf %49, %54 : vector<32x32xf32>
    %56 = arith.mulf %55, %55 : vector<32x32xf32>
    %cst_40 = arith.constant dense<0.000000e+00> : vector<32xf32>
    %57 = vector.multi_reduction <add>, %56, %cst_40 [1] : vector<32x32xf32> to vector<32xf32>
    %58 = vector.shape_cast %57 : vector<32xf32> to vector<32x1xf32>
    %cst_41 = arith.constant 3.200000e+01 : f32
    %59 = vector.broadcast %cst_41 : f32 to vector<32x1xf32>
    %60 = arith.divf %58, %59 : vector<32x1xf32>
    %61 = vector.broadcast %53 : vector<32x1xf32> to vector<32x32xf32>
    %62 = arith.subf %49, %61 : vector<32x32xf32>
    %cst_42 = arith.constant 9.99999974E-6 : f32
    %63 = vector.broadcast %cst_42 : f32 to vector<32x1xf32>
    %64 = arith.addf %60, %63 : vector<32x1xf32>
    %65 = math.rsqrt %64 : vector<32x1xf32>
    %66 = vector.broadcast %65 : vector<32x1xf32> to vector<32x32xf32>
    %67 = arith.mulf %62, %66 : vector<32x32xf32>
    %68 = vector.extract_strided_slice %16 {offsets = [0, 0], sizes = [1, 32], strides = [1, 1]} : vector<2x32xf32> to vector<1x32xf32>
    %69 = vector.broadcast %68 : vector<1x32xf32> to vector<32x32xf32>
    %70 = arith.mulf %67, %69 : vector<32x32xf32>
    %71 = vector.extract_strided_slice %16 {offsets = [1, 0], sizes = [1, 32], strides = [1, 1]} : vector<2x32xf32> to vector<1x32xf32>
    %72 = vector.broadcast %71 : vector<1x32xf32> to vector<32x32xf32>
    %73 = arith.addf %70, %72 : vector<32x32xf32>
    %c1 = arith.constant 1 : index
    %c0_43 = arith.constant 0 : index
    %c0_44 = arith.constant 0 : index
    %74 = vector.load %arg15[%c1, %c0_43, %c0_44] : memref<6x32x32xf32, #tpu.memory_space<vmem>>, vector<1x32x32xf32>
    %75 = vector.shape_cast %74 : vector<1x32x32xf32> to vector<32x32xf32>
    %c1_45 = arith.constant 1 : index
    %c0_46 = arith.constant 0 : index
    %c0_47 = arith.constant 0 : index
    %76 = vector.load %arg16[%c1_45, %c0_46, %c0_47] : memref<6x32x96xf32, #tpu.memory_space<vmem>>, vector<1x32x96xf32>
    %77 = vector.shape_cast %76 : vector<1x32x96xf32> to vector<32x96xf32>
    %c1_48 = arith.constant 1 : index
    %c0_49 = arith.constant 0 : index
    %c0_50 = arith.constant 0 : index
    %78 = vector.load %arg17[%c1_48, %c0_49, %c0_50] : memref<6x32x32xf32, #tpu.memory_space<vmem>>, vector<1x32x32xf32>
    %79 = vector.shape_cast %78 : vector<1x32x32xf32> to vector<32x32xf32>
    %c1_51 = arith.constant 1 : index
    %c0_52 = arith.constant 0 : index
    %c0_53 = arith.constant 0 : index
    %80 = vector.load %arg18[%c1_51, %c0_52, %c0_53] : memref<6x1x32xf32, #tpu.memory_space<vmem>>, vector<1x1x32xf32>
    %81 = vector.shape_cast %80 : vector<1x1x32xf32> to vector<1x32xf32>
    %c1_54 = arith.constant 1 : index
    %c0_55 = arith.constant 0 : index
    %c0_56 = arith.constant 0 : index
    %82 = vector.load %arg19[%c1_54, %c0_55, %c0_56] : memref<6x1x96xf32, #tpu.memory_space<vmem>>, vector<1x1x96xf32>
    %83 = vector.shape_cast %82 : vector<1x1x96xf32> to vector<1x96xf32>
    %c1_57 = arith.constant 1 : index
    %c0_58 = arith.constant 0 : index
    %c0_59 = arith.constant 0 : index
    %84 = vector.load %arg20[%c1_57, %c0_58, %c0_59] : memref<6x1x32xf32, #tpu.memory_space<vmem>>, vector<1x1x32xf32>
    %85 = vector.shape_cast %84 : vector<1x1x32xf32> to vector<1x32xf32>
    %c1_60 = arith.constant 1 : index
    %c0_61 = arith.constant 0 : index
    %c0_62 = arith.constant 0 : index
    %86 = vector.load %arg21[%c1_60, %c0_61, %c0_62] : memref<6x2x32xf32, #tpu.memory_space<vmem>>, vector<1x2x32xf32>
    %87 = vector.shape_cast %86 : vector<1x2x32xf32> to vector<2x32xf32>
    %cst_63 = arith.constant dense<0.000000e+00> : vector<32x32xf32>
    %88 = tpu.matmul %73, %75, %cst_63 {dimension_numbers = #tpu.dot_dimension_numbers<[1], [0], [0], [1], [0, 0, 1, 1], [], []>} : vector<32x32xf32>, vector<32x32xf32>, vector<32x32xf32> -> vector<32x32xf32>
    %89 = vector.broadcast %81 : vector<1x32xf32> to vector<32x32xf32>
    %90 = arith.addf %88, %89 : vector<32x32xf32>
    %cst_64 = arith.constant dense<0.000000e+00> : vector<16x96xf32>
    %91 = tpu.matmul %1, %77, %cst_64 {dimension_numbers = #tpu.dot_dimension_numbers<[1], [0], [0], [1], [0, 0, 1, 1], [], []>} : vector<16x32xf32>, vector<32x96xf32>, vector<16x96xf32> -> vector<16x96xf32>
    %92 = vector.broadcast %83 : vector<1x96xf32> to vector<16x96xf32>
    %93 = arith.addf %91, %92 : vector<16x96xf32>
    %94 = vector.extract_strided_slice %93 {offsets = [0, 0], sizes = [16, 32], strides = [1, 1]} : vector<16x96xf32> to vector<16x32xf32>
    %95 = vector.extract_strided_slice %93 {offsets = [0, 32], sizes = [16, 64], strides = [1, 1]} : vector<16x96xf32> to vector<16x64xf32>
    %96 = tpu.concatenate %94, %94, %94, %94, %94, %94, %94, %94 in 0 : vector<16x32xf32>, vector<16x32xf32>, vector<16x32xf32>, vector<16x32xf32>, vector<16x32xf32>, vector<16x32xf32>, vector<16x32xf32>, vector<16x32xf32> -> vector<128x32xf32>
    %c0_65 = arith.constant 0 : index
    %c0_66 = arith.constant 0 : index
    %97 = vector.load %arg11[%c0_65, %c0_66] : memref<128x32xf32, #tpu.memory_space<vmem>>, vector<128x32xf32>
    %98 = arith.mulf %96, %97 : vector<128x32xf32>
    %99 = tpu.concatenate %95, %95, %95, %95, %95, %95, %95, %95 in 0 : vector<16x64xf32>, vector<16x64xf32>, vector<16x64xf32>, vector<16x64xf32>, vector<16x64xf32>, vector<16x64xf32>, vector<16x64xf32>, vector<16x64xf32> -> vector<128x64xf32>
    %c0_67 = arith.constant 0 : index
    %c0_68 = arith.constant 0 : index
    %100 = vector.load %arg12[%c0_67, %c0_68] : memref<128x64xf32, #tpu.memory_space<vmem>>, vector<128x64xf32>
    %101 = arith.mulf %99, %100 : vector<128x64xf32>
    %cst_69 = arith.constant dense<0.000000e+00> : vector<32x128xf32>
    %102 = tpu.matmul %90, %98, %cst_69 {dimension_numbers = #tpu.dot_dimension_numbers<[1], [1], [0], [0], [0, 0, 1, 0], [], []>} : vector<32x32xf32>, vector<128x32xf32>, vector<32x128xf32> -> vector<32x128xf32>
    %c0_70 = arith.constant 0 : index
    %c0_71 = arith.constant 0 : index
    %103 = vector.load %arg4[%c0_70, %c0_71] : memref<32x128xf32, #tpu.memory_space<vmem>>, vector<32x128xf32>
    %104 = arith.addf %102, %103 : vector<32x128xf32>
    %cst_72 = arith.constant dense<0xFF800000> : vector<32xf32>
    %105 = vector.multi_reduction <maximumf>, %104, %cst_72 [1] : vector<32x128xf32> to vector<32xf32>
    %106 = vector.shape_cast %105 : vector<32xf32> to vector<32x1xf32>
    %107 = vector.broadcast %106 : vector<32x1xf32> to vector<32x128xf32>
    %108 = arith.subf %104, %107 : vector<32x128xf32>
    %109 = math.exp %108 : vector<32x128xf32>
    %cst_73 = arith.constant dense<0.000000e+00> : vector<32x64xf32>
    %110 = tpu.matmul %109, %101, %cst_73 {dimension_numbers = #tpu.dot_dimension_numbers<[1], [0], [0], [1], [0, 0, 1, 1], [], []>} : vector<32x128xf32>, vector<128x64xf32>, vector<32x64xf32> -> vector<32x64xf32>
    %111 = vector.extract_strided_slice %110 {offsets = [0, 32], sizes = [32, 32], strides = [1, 1]} : vector<32x64xf32> to vector<32x32xf32>
    %cst_74 = arith.constant 1.000000e-30 : f32
    %112 = vector.broadcast %cst_74 : f32 to vector<32x32xf32>
    %113 = arith.maximumf %111, %112 : vector<32x32xf32>
    %114 = vector.extract_strided_slice %110 {offsets = [0, 0], sizes = [32, 32], strides = [1, 1]} : vector<32x64xf32> to vector<32x32xf32>
    %115 = tpu.reciprocal %113 {approx = true} : vector<32x32xf32> -> vector<32x32xf32>
    %116 = arith.mulf %114, %115 : vector<32x32xf32>
    %cst_75 = arith.constant dense<0.000000e+00> : vector<32x32xf32>
    %117 = tpu.matmul %116, %79, %cst_75 {dimension_numbers = #tpu.dot_dimension_numbers<[1], [0], [0], [1], [0, 0, 1, 1], [], []>} : vector<32x32xf32>, vector<32x32xf32>, vector<32x32xf32> -> vector<32x32xf32>
    %118 = vector.broadcast %85 : vector<1x32xf32> to vector<32x32xf32>
    %119 = arith.addf %117, %118 : vector<32x32xf32>
    %120 = arith.addf %73, %119 : vector<32x32xf32>
    %cst_76 = arith.constant dense<0.000000e+00> : vector<32xf32>
    %121 = vector.multi_reduction <add>, %120, %cst_76 [1] : vector<32x32xf32> to vector<32xf32>
    %122 = vector.shape_cast %121 : vector<32xf32> to vector<32x1xf32>
    %cst_77 = arith.constant 3.200000e+01 : f32
    %123 = vector.broadcast %cst_77 : f32 to vector<32x1xf32>
    %124 = arith.divf %122, %123 : vector<32x1xf32>
    %125 = vector.broadcast %124 : vector<32x1xf32> to vector<32x32xf32>
    %126 = arith.subf %120, %125 : vector<32x32xf32>
    %127 = arith.mulf %126, %126 : vector<32x32xf32>
    %cst_78 = arith.constant dense<0.000000e+00> : vector<32xf32>
    %128 = vector.multi_reduction <add>, %127, %cst_78 [1] : vector<32x32xf32> to vector<32xf32>
    %129 = vector.shape_cast %128 : vector<32xf32> to vector<32x1xf32>
    %cst_79 = arith.constant 3.200000e+01 : f32
    %130 = vector.broadcast %cst_79 : f32 to vector<32x1xf32>
    %131 = arith.divf %129, %130 : vector<32x1xf32>
    %132 = vector.broadcast %124 : vector<32x1xf32> to vector<32x32xf32>
    %133 = arith.subf %120, %132 : vector<32x32xf32>
    %cst_80 = arith.constant 9.99999974E-6 : f32
    %134 = vector.broadcast %cst_80 : f32 to vector<32x1xf32>
    %135 = arith.addf %131, %134 : vector<32x1xf32>
    %136 = math.rsqrt %135 : vector<32x1xf32>
    %137 = vector.broadcast %136 : vector<32x1xf32> to vector<32x32xf32>
    %138 = arith.mulf %133, %137 : vector<32x32xf32>
    %139 = vector.extract_strided_slice %87 {offsets = [0, 0], sizes = [1, 32], strides = [1, 1]} : vector<2x32xf32> to vector<1x32xf32>
    %140 = vector.broadcast %139 : vector<1x32xf32> to vector<32x32xf32>
    %141 = arith.mulf %138, %140 : vector<32x32xf32>
    %142 = vector.extract_strided_slice %87 {offsets = [1, 0], sizes = [1, 32], strides = [1, 1]} : vector<2x32xf32> to vector<1x32xf32>
    %143 = vector.broadcast %142 : vector<1x32xf32> to vector<32x32xf32>
    %144 = arith.addf %141, %143 : vector<32x32xf32>
    %c2 = arith.constant 2 : index
    %c0_81 = arith.constant 0 : index
    %c0_82 = arith.constant 0 : index
    %145 = vector.load %arg15[%c2, %c0_81, %c0_82] : memref<6x32x32xf32, #tpu.memory_space<vmem>>, vector<1x32x32xf32>
    %146 = vector.shape_cast %145 : vector<1x32x32xf32> to vector<32x32xf32>
    %c2_83 = arith.constant 2 : index
    %c0_84 = arith.constant 0 : index
    %c0_85 = arith.constant 0 : index
    %147 = vector.load %arg16[%c2_83, %c0_84, %c0_85] : memref<6x32x96xf32, #tpu.memory_space<vmem>>, vector<1x32x96xf32>
    %148 = vector.shape_cast %147 : vector<1x32x96xf32> to vector<32x96xf32>
    %c2_86 = arith.constant 2 : index
    %c0_87 = arith.constant 0 : index
    %c0_88 = arith.constant 0 : index
    %149 = vector.load %arg17[%c2_86, %c0_87, %c0_88] : memref<6x32x32xf32, #tpu.memory_space<vmem>>, vector<1x32x32xf32>
    %150 = vector.shape_cast %149 : vector<1x32x32xf32> to vector<32x32xf32>
    %c2_89 = arith.constant 2 : index
    %c0_90 = arith.constant 0 : index
    %c0_91 = arith.constant 0 : index
    %151 = vector.load %arg18[%c2_89, %c0_90, %c0_91] : memref<6x1x32xf32, #tpu.memory_space<vmem>>, vector<1x1x32xf32>
    %152 = vector.shape_cast %151 : vector<1x1x32xf32> to vector<1x32xf32>
    %c2_92 = arith.constant 2 : index
    %c0_93 = arith.constant 0 : index
    %c0_94 = arith.constant 0 : index
    %153 = vector.load %arg19[%c2_92, %c0_93, %c0_94] : memref<6x1x96xf32, #tpu.memory_space<vmem>>, vector<1x1x96xf32>
    %154 = vector.shape_cast %153 : vector<1x1x96xf32> to vector<1x96xf32>
    %c2_95 = arith.constant 2 : index
    %c0_96 = arith.constant 0 : index
    %c0_97 = arith.constant 0 : index
    %155 = vector.load %arg20[%c2_95, %c0_96, %c0_97] : memref<6x1x32xf32, #tpu.memory_space<vmem>>, vector<1x1x32xf32>
    %156 = vector.shape_cast %155 : vector<1x1x32xf32> to vector<1x32xf32>
    %c2_98 = arith.constant 2 : index
    %c0_99 = arith.constant 0 : index
    %c0_100 = arith.constant 0 : index
    %157 = vector.load %arg21[%c2_98, %c0_99, %c0_100] : memref<6x2x32xf32, #tpu.memory_space<vmem>>, vector<1x2x32xf32>
    %158 = vector.shape_cast %157 : vector<1x2x32xf32> to vector<2x32xf32>
    %cst_101 = arith.constant dense<0.000000e+00> : vector<16x32xf32>
    %159 = tpu.matmul %2, %146, %cst_101 {dimension_numbers = #tpu.dot_dimension_numbers<[1], [0], [0], [1], [0, 0, 1, 1], [], []>} : vector<16x32xf32>, vector<32x32xf32>, vector<16x32xf32> -> vector<16x32xf32>
    %160 = vector.broadcast %152 : vector<1x32xf32> to vector<16x32xf32>
    %161 = arith.addf %159, %160 : vector<16x32xf32>
    %cst_102 = arith.constant dense<0.000000e+00> : vector<32x96xf32>
    %162 = tpu.matmul %144, %148, %cst_102 {dimension_numbers = #tpu.dot_dimension_numbers<[1], [0], [0], [1], [0, 0, 1, 1], [], []>} : vector<32x32xf32>, vector<32x96xf32>, vector<32x96xf32> -> vector<32x96xf32>
    %163 = vector.broadcast %154 : vector<1x96xf32> to vector<32x96xf32>
    %164 = arith.addf %162, %163 : vector<32x96xf32>
    %165 = vector.extract_strided_slice %164 {offsets = [0, 0], sizes = [32, 32], strides = [1, 1]} : vector<32x96xf32> to vector<32x32xf32>
    %166 = vector.extract_strided_slice %164 {offsets = [0, 32], sizes = [32, 64], strides = [1, 1]} : vector<32x96xf32> to vector<32x64xf32>
    %167 = tpu.concatenate %165, %165, %165, %165, %165, %165, %165, %165 in 0 : vector<32x32xf32>, vector<32x32xf32>, vector<32x32xf32>, vector<32x32xf32>, vector<32x32xf32>, vector<32x32xf32>, vector<32x32xf32>, vector<32x32xf32> -> vector<256x32xf32>
    %c0_103 = arith.constant 0 : index
    %c0_104 = arith.constant 0 : index
    %168 = vector.load %arg9[%c0_103, %c0_104] : memref<256x32xf32, #tpu.memory_space<vmem>>, vector<256x32xf32>
    %169 = arith.mulf %167, %168 : vector<256x32xf32>
    %170 = tpu.concatenate %166, %166, %166, %166, %166, %166, %166, %166 in 0 : vector<32x64xf32>, vector<32x64xf32>, vector<32x64xf32>, vector<32x64xf32>, vector<32x64xf32>, vector<32x64xf32>, vector<32x64xf32>, vector<32x64xf32> -> vector<256x64xf32>
    %c0_105 = arith.constant 0 : index
    %c0_106 = arith.constant 0 : index
    %171 = vector.load %arg10[%c0_105, %c0_106] : memref<256x64xf32, #tpu.memory_space<vmem>>, vector<256x64xf32>
    %172 = arith.mulf %170, %171 : vector<256x64xf32>
    %cst_107 = arith.constant dense<0.000000e+00> : vector<16x256xf32>
    %173 = tpu.matmul %161, %169, %cst_107 {dimension_numbers = #tpu.dot_dimension_numbers<[1], [1], [0], [0], [0, 0, 1, 0], [], []>} : vector<16x32xf32>, vector<256x32xf32>, vector<16x256xf32> -> vector<16x256xf32>
    %c0_108 = arith.constant 0 : index
    %c0_109 = arith.constant 0 : index
    %174 = vector.load %arg5[%c0_108, %c0_109] : memref<16x256xf32, #tpu.memory_space<vmem>>, vector<16x256xf32>
    %175 = arith.addf %173, %174 : vector<16x256xf32>
    %cst_110 = arith.constant dense<0xFF800000> : vector<16xf32>
    %176 = vector.multi_reduction <maximumf>, %175, %cst_110 [1] : vector<16x256xf32> to vector<16xf32>
    %177 = vector.shape_cast %176 : vector<16xf32> to vector<16x1xf32>
    %178 = vector.broadcast %177 : vector<16x1xf32> to vector<16x256xf32>
    %179 = arith.subf %175, %178 : vector<16x256xf32>
    %180 = math.exp %179 : vector<16x256xf32>
    %cst_111 = arith.constant dense<0.000000e+00> : vector<16x64xf32>
    %181 = tpu.matmul %180, %172, %cst_111 {dimension_numbers = #tpu.dot_dimension_numbers<[1], [0], [0], [1], [0, 0, 1, 1], [], []>} : vector<16x256xf32>, vector<256x64xf32>, vector<16x64xf32> -> vector<16x64xf32>
    %182 = vector.extract_strided_slice %181 {offsets = [0, 32], sizes = [16, 32], strides = [1, 1]} : vector<16x64xf32> to vector<16x32xf32>
    %cst_112 = arith.constant 1.000000e-30 : f32
    %183 = vector.broadcast %cst_112 : f32 to vector<16x32xf32>
    %184 = arith.maximumf %182, %183 : vector<16x32xf32>
    %185 = vector.extract_strided_slice %181 {offsets = [0, 0], sizes = [16, 32], strides = [1, 1]} : vector<16x64xf32> to vector<16x32xf32>
    %186 = tpu.reciprocal %184 {approx = true} : vector<16x32xf32> -> vector<16x32xf32>
    %187 = arith.mulf %185, %186 : vector<16x32xf32>
    %cst_113 = arith.constant dense<0.000000e+00> : vector<16x32xf32>
    %188 = tpu.matmul %187, %150, %cst_113 {dimension_numbers = #tpu.dot_dimension_numbers<[1], [0], [0], [1], [0, 0, 1, 1], [], []>} : vector<16x32xf32>, vector<32x32xf32>, vector<16x32xf32> -> vector<16x32xf32>
    %189 = vector.broadcast %156 : vector<1x32xf32> to vector<16x32xf32>
    %190 = arith.addf %188, %189 : vector<16x32xf32>
    %191 = arith.addf %2, %190 : vector<16x32xf32>
    %cst_114 = arith.constant dense<0.000000e+00> : vector<16xf32>
    %192 = vector.multi_reduction <add>, %191, %cst_114 [1] : vector<16x32xf32> to vector<16xf32>
    %193 = vector.shape_cast %192 : vector<16xf32> to vector<16x1xf32>
    %cst_115 = arith.constant 3.200000e+01 : f32
    %194 = vector.broadcast %cst_115 : f32 to vector<16x1xf32>
    %195 = arith.divf %193, %194 : vector<16x1xf32>
    %196 = vector.broadcast %195 : vector<16x1xf32> to vector<16x32xf32>
    %197 = arith.subf %191, %196 : vector<16x32xf32>
    %198 = arith.mulf %197, %197 : vector<16x32xf32>
    %cst_116 = arith.constant dense<0.000000e+00> : vector<16xf32>
    %199 = vector.multi_reduction <add>, %198, %cst_116 [1] : vector<16x32xf32> to vector<16xf32>
    %200 = vector.shape_cast %199 : vector<16xf32> to vector<16x1xf32>
    %cst_117 = arith.constant 3.200000e+01 : f32
    %201 = vector.broadcast %cst_117 : f32 to vector<16x1xf32>
    %202 = arith.divf %200, %201 : vector<16x1xf32>
    %203 = vector.broadcast %195 : vector<16x1xf32> to vector<16x32xf32>
    %204 = arith.subf %191, %203 : vector<16x32xf32>
    %cst_118 = arith.constant 9.99999974E-6 : f32
    %205 = vector.broadcast %cst_118 : f32 to vector<16x1xf32>
    %206 = arith.addf %202, %205 : vector<16x1xf32>
    %207 = math.rsqrt %206 : vector<16x1xf32>
    %208 = vector.broadcast %207 : vector<16x1xf32> to vector<16x32xf32>
    %209 = arith.mulf %204, %208 : vector<16x32xf32>
    %210 = vector.extract_strided_slice %158 {offsets = [0, 0], sizes = [1, 32], strides = [1, 1]} : vector<2x32xf32> to vector<1x32xf32>
    %211 = vector.broadcast %210 : vector<1x32xf32> to vector<16x32xf32>
    %212 = arith.mulf %209, %211 : vector<16x32xf32>
    %213 = vector.extract_strided_slice %158 {offsets = [1, 0], sizes = [1, 32], strides = [1, 1]} : vector<2x32xf32> to vector<1x32xf32>
    %214 = vector.broadcast %213 : vector<1x32xf32> to vector<16x32xf32>
    %215 = arith.addf %212, %214 : vector<16x32xf32>
    %c3 = arith.constant 3 : index
    %c0_119 = arith.constant 0 : index
    %c0_120 = arith.constant 0 : index
    %216 = vector.load %arg15[%c3, %c0_119, %c0_120] : memref<6x32x32xf32, #tpu.memory_space<vmem>>, vector<1x32x32xf32>
    %217 = vector.shape_cast %216 : vector<1x32x32xf32> to vector<32x32xf32>
    %c3_121 = arith.constant 3 : index
    %c0_122 = arith.constant 0 : index
    %c0_123 = arith.constant 0 : index
    %218 = vector.load %arg16[%c3_121, %c0_122, %c0_123] : memref<6x32x96xf32, #tpu.memory_space<vmem>>, vector<1x32x96xf32>
    %219 = vector.shape_cast %218 : vector<1x32x96xf32> to vector<32x96xf32>
    %c3_124 = arith.constant 3 : index
    %c0_125 = arith.constant 0 : index
    %c0_126 = arith.constant 0 : index
    %220 = vector.load %arg17[%c3_124, %c0_125, %c0_126] : memref<6x32x32xf32, #tpu.memory_space<vmem>>, vector<1x32x32xf32>
    %221 = vector.shape_cast %220 : vector<1x32x32xf32> to vector<32x32xf32>
    %c3_127 = arith.constant 3 : index
    %c0_128 = arith.constant 0 : index
    %c0_129 = arith.constant 0 : index
    %222 = vector.load %arg18[%c3_127, %c0_128, %c0_129] : memref<6x1x32xf32, #tpu.memory_space<vmem>>, vector<1x1x32xf32>
    %223 = vector.shape_cast %222 : vector<1x1x32xf32> to vector<1x32xf32>
    %c3_130 = arith.constant 3 : index
    %c0_131 = arith.constant 0 : index
    %c0_132 = arith.constant 0 : index
    %224 = vector.load %arg19[%c3_130, %c0_131, %c0_132] : memref<6x1x96xf32, #tpu.memory_space<vmem>>, vector<1x1x96xf32>
    %225 = vector.shape_cast %224 : vector<1x1x96xf32> to vector<1x96xf32>
    %c3_133 = arith.constant 3 : index
    %c0_134 = arith.constant 0 : index
    %c0_135 = arith.constant 0 : index
    %226 = vector.load %arg20[%c3_133, %c0_134, %c0_135] : memref<6x1x32xf32, #tpu.memory_space<vmem>>, vector<1x1x32xf32>
    %227 = vector.shape_cast %226 : vector<1x1x32xf32> to vector<1x32xf32>
    %c3_136 = arith.constant 3 : index
    %c0_137 = arith.constant 0 : index
    %c0_138 = arith.constant 0 : index
    %228 = vector.load %arg21[%c3_136, %c0_137, %c0_138] : memref<6x2x32xf32, #tpu.memory_space<vmem>>, vector<1x2x32xf32>
    %229 = vector.shape_cast %228 : vector<1x2x32xf32> to vector<2x32xf32>
    %cst_139 = arith.constant dense<0.000000e+00> : vector<16x32xf32>
    %230 = tpu.matmul %215, %217, %cst_139 {dimension_numbers = #tpu.dot_dimension_numbers<[1], [0], [0], [1], [0, 0, 1, 1], [], []>} : vector<16x32xf32>, vector<32x32xf32>, vector<16x32xf32> -> vector<16x32xf32>
    %231 = vector.broadcast %223 : vector<1x32xf32> to vector<16x32xf32>
    %232 = arith.addf %230, %231 : vector<16x32xf32>
    %cst_140 = arith.constant dense<0.000000e+00> : vector<16x96xf32>
    %233 = tpu.matmul %1, %219, %cst_140 {dimension_numbers = #tpu.dot_dimension_numbers<[1], [0], [0], [1], [0, 0, 1, 1], [], []>} : vector<16x32xf32>, vector<32x96xf32>, vector<16x96xf32> -> vector<16x96xf32>
    %234 = vector.broadcast %225 : vector<1x96xf32> to vector<16x96xf32>
    %235 = arith.addf %233, %234 : vector<16x96xf32>
    %236 = vector.extract_strided_slice %235 {offsets = [0, 0], sizes = [16, 32], strides = [1, 1]} : vector<16x96xf32> to vector<16x32xf32>
    %237 = vector.extract_strided_slice %235 {offsets = [0, 32], sizes = [16, 64], strides = [1, 1]} : vector<16x96xf32> to vector<16x64xf32>
    %238 = tpu.concatenate %236, %236, %236, %236, %236, %236, %236, %236 in 0 : vector<16x32xf32>, vector<16x32xf32>, vector<16x32xf32>, vector<16x32xf32>, vector<16x32xf32>, vector<16x32xf32>, vector<16x32xf32>, vector<16x32xf32> -> vector<128x32xf32>
    %c0_141 = arith.constant 0 : index
    %c0_142 = arith.constant 0 : index
    %239 = vector.load %arg11[%c0_141, %c0_142] : memref<128x32xf32, #tpu.memory_space<vmem>>, vector<128x32xf32>
    %240 = arith.mulf %238, %239 : vector<128x32xf32>
    %241 = tpu.concatenate %237, %237, %237, %237, %237, %237, %237, %237 in 0 : vector<16x64xf32>, vector<16x64xf32>, vector<16x64xf32>, vector<16x64xf32>, vector<16x64xf32>, vector<16x64xf32>, vector<16x64xf32>, vector<16x64xf32> -> vector<128x64xf32>
    %c0_143 = arith.constant 0 : index
    %c0_144 = arith.constant 0 : index
    %242 = vector.load %arg12[%c0_143, %c0_144] : memref<128x64xf32, #tpu.memory_space<vmem>>, vector<128x64xf32>
    %243 = arith.mulf %241, %242 : vector<128x64xf32>
    %cst_145 = arith.constant dense<0.000000e+00> : vector<16x128xf32>
    %244 = tpu.matmul %232, %240, %cst_145 {dimension_numbers = #tpu.dot_dimension_numbers<[1], [1], [0], [0], [0, 0, 1, 0], [], []>} : vector<16x32xf32>, vector<128x32xf32>, vector<16x128xf32> -> vector<16x128xf32>
    %c0_146 = arith.constant 0 : index
    %c0_147 = arith.constant 0 : index
    %245 = vector.load %arg6[%c0_146, %c0_147] : memref<16x128xf32, #tpu.memory_space<vmem>>, vector<16x128xf32>
    %246 = arith.addf %244, %245 : vector<16x128xf32>
    %cst_148 = arith.constant dense<0xFF800000> : vector<16xf32>
    %247 = vector.multi_reduction <maximumf>, %246, %cst_148 [1] : vector<16x128xf32> to vector<16xf32>
    %248 = vector.shape_cast %247 : vector<16xf32> to vector<16x1xf32>
    %249 = vector.broadcast %248 : vector<16x1xf32> to vector<16x128xf32>
    %250 = arith.subf %246, %249 : vector<16x128xf32>
    %251 = math.exp %250 : vector<16x128xf32>
    %cst_149 = arith.constant dense<0.000000e+00> : vector<16x64xf32>
    %252 = tpu.matmul %251, %243, %cst_149 {dimension_numbers = #tpu.dot_dimension_numbers<[1], [0], [0], [1], [0, 0, 1, 1], [], []>} : vector<16x128xf32>, vector<128x64xf32>, vector<16x64xf32> -> vector<16x64xf32>
    %253 = vector.extract_strided_slice %252 {offsets = [0, 32], sizes = [16, 32], strides = [1, 1]} : vector<16x64xf32> to vector<16x32xf32>
    %cst_150 = arith.constant 1.000000e-30 : f32
    %254 = vector.broadcast %cst_150 : f32 to vector<16x32xf32>
    %255 = arith.maximumf %253, %254 : vector<16x32xf32>
    %256 = vector.extract_strided_slice %252 {offsets = [0, 0], sizes = [16, 32], strides = [1, 1]} : vector<16x64xf32> to vector<16x32xf32>
    %257 = tpu.reciprocal %255 {approx = true} : vector<16x32xf32> -> vector<16x32xf32>
    %258 = arith.mulf %256, %257 : vector<16x32xf32>
    %cst_151 = arith.constant dense<0.000000e+00> : vector<16x32xf32>
    %259 = tpu.matmul %258, %221, %cst_151 {dimension_numbers = #tpu.dot_dimension_numbers<[1], [0], [0], [1], [0, 0, 1, 1], [], []>} : vector<16x32xf32>, vector<32x32xf32>, vector<16x32xf32> -> vector<16x32xf32>
    %260 = vector.broadcast %227 : vector<1x32xf32> to vector<16x32xf32>
    %261 = arith.addf %259, %260 : vector<16x32xf32>
    %262 = arith.addf %215, %261 : vector<16x32xf32>
    %cst_152 = arith.constant dense<0.000000e+00> : vector<16xf32>
    %263 = vector.multi_reduction <add>, %262, %cst_152 [1] : vector<16x32xf32> to vector<16xf32>
    %264 = vector.shape_cast %263 : vector<16xf32> to vector<16x1xf32>
    %cst_153 = arith.constant 3.200000e+01 : f32
    %265 = vector.broadcast %cst_153 : f32 to vector<16x1xf32>
    %266 = arith.divf %264, %265 : vector<16x1xf32>
    %267 = vector.broadcast %266 : vector<16x1xf32> to vector<16x32xf32>
    %268 = arith.subf %262, %267 : vector<16x32xf32>
    %269 = arith.mulf %268, %268 : vector<16x32xf32>
    %cst_154 = arith.constant dense<0.000000e+00> : vector<16xf32>
    %270 = vector.multi_reduction <add>, %269, %cst_154 [1] : vector<16x32xf32> to vector<16xf32>
    %271 = vector.shape_cast %270 : vector<16xf32> to vector<16x1xf32>
    %cst_155 = arith.constant 3.200000e+01 : f32
    %272 = vector.broadcast %cst_155 : f32 to vector<16x1xf32>
    %273 = arith.divf %271, %272 : vector<16x1xf32>
    %274 = vector.broadcast %266 : vector<16x1xf32> to vector<16x32xf32>
    %275 = arith.subf %262, %274 : vector<16x32xf32>
    %cst_156 = arith.constant 9.99999974E-6 : f32
    %276 = vector.broadcast %cst_156 : f32 to vector<16x1xf32>
    %277 = arith.addf %273, %276 : vector<16x1xf32>
    %278 = math.rsqrt %277 : vector<16x1xf32>
    %279 = vector.broadcast %278 : vector<16x1xf32> to vector<16x32xf32>
    %280 = arith.mulf %275, %279 : vector<16x32xf32>
    %281 = vector.extract_strided_slice %229 {offsets = [0, 0], sizes = [1, 32], strides = [1, 1]} : vector<2x32xf32> to vector<1x32xf32>
    %282 = vector.broadcast %281 : vector<1x32xf32> to vector<16x32xf32>
    %283 = arith.mulf %280, %282 : vector<16x32xf32>
    %284 = vector.extract_strided_slice %229 {offsets = [1, 0], sizes = [1, 32], strides = [1, 1]} : vector<2x32xf32> to vector<1x32xf32>
    %285 = vector.broadcast %284 : vector<1x32xf32> to vector<16x32xf32>
    %286 = arith.addf %283, %285 : vector<16x32xf32>
    %c4 = arith.constant 4 : index
    %c0_157 = arith.constant 0 : index
    %c0_158 = arith.constant 0 : index
    %287 = vector.load %arg15[%c4, %c0_157, %c0_158] : memref<6x32x32xf32, #tpu.memory_space<vmem>>, vector<1x32x32xf32>
    %288 = vector.shape_cast %287 : vector<1x32x32xf32> to vector<32x32xf32>
    %c4_159 = arith.constant 4 : index
    %c0_160 = arith.constant 0 : index
    %c0_161 = arith.constant 0 : index
    %289 = vector.load %arg16[%c4_159, %c0_160, %c0_161] : memref<6x32x96xf32, #tpu.memory_space<vmem>>, vector<1x32x96xf32>
    %290 = vector.shape_cast %289 : vector<1x32x96xf32> to vector<32x96xf32>
    %c4_162 = arith.constant 4 : index
    %c0_163 = arith.constant 0 : index
    %c0_164 = arith.constant 0 : index
    %291 = vector.load %arg17[%c4_162, %c0_163, %c0_164] : memref<6x32x32xf32, #tpu.memory_space<vmem>>, vector<1x32x32xf32>
    %292 = vector.shape_cast %291 : vector<1x32x32xf32> to vector<32x32xf32>
    %c4_165 = arith.constant 4 : index
    %c0_166 = arith.constant 0 : index
    %c0_167 = arith.constant 0 : index
    %293 = vector.load %arg18[%c4_165, %c0_166, %c0_167] : memref<6x1x32xf32, #tpu.memory_space<vmem>>, vector<1x1x32xf32>
    %294 = vector.shape_cast %293 : vector<1x1x32xf32> to vector<1x32xf32>
    %c4_168 = arith.constant 4 : index
    %c0_169 = arith.constant 0 : index
    %c0_170 = arith.constant 0 : index
    %295 = vector.load %arg19[%c4_168, %c0_169, %c0_170] : memref<6x1x96xf32, #tpu.memory_space<vmem>>, vector<1x1x96xf32>
    %296 = vector.shape_cast %295 : vector<1x1x96xf32> to vector<1x96xf32>
    %c4_171 = arith.constant 4 : index
    %c0_172 = arith.constant 0 : index
    %c0_173 = arith.constant 0 : index
    %297 = vector.load %arg20[%c4_171, %c0_172, %c0_173] : memref<6x1x32xf32, #tpu.memory_space<vmem>>, vector<1x1x32xf32>
    %298 = vector.shape_cast %297 : vector<1x1x32xf32> to vector<1x32xf32>
    %c4_174 = arith.constant 4 : index
    %c0_175 = arith.constant 0 : index
    %c0_176 = arith.constant 0 : index
    %299 = vector.load %arg21[%c4_174, %c0_175, %c0_176] : memref<6x2x32xf32, #tpu.memory_space<vmem>>, vector<1x2x32xf32>
    %300 = vector.shape_cast %299 : vector<1x2x32xf32> to vector<2x32xf32>
    %cst_177 = arith.constant dense<0.000000e+00> : vector<16x32xf32>
    %301 = tpu.matmul %1, %288, %cst_177 {dimension_numbers = #tpu.dot_dimension_numbers<[1], [0], [0], [1], [0, 0, 1, 1], [], []>} : vector<16x32xf32>, vector<32x32xf32>, vector<16x32xf32> -> vector<16x32xf32>
    %302 = vector.broadcast %294 : vector<1x32xf32> to vector<16x32xf32>
    %303 = arith.addf %301, %302 : vector<16x32xf32>
    %cst_178 = arith.constant dense<0.000000e+00> : vector<32x96xf32>
    %304 = tpu.matmul %144, %290, %cst_178 {dimension_numbers = #tpu.dot_dimension_numbers<[1], [0], [0], [1], [0, 0, 1, 1], [], []>} : vector<32x32xf32>, vector<32x96xf32>, vector<32x96xf32> -> vector<32x96xf32>
    %305 = vector.broadcast %296 : vector<1x96xf32> to vector<32x96xf32>
    %306 = arith.addf %304, %305 : vector<32x96xf32>
    %307 = vector.extract_strided_slice %306 {offsets = [0, 0], sizes = [32, 32], strides = [1, 1]} : vector<32x96xf32> to vector<32x32xf32>
    %308 = vector.extract_strided_slice %306 {offsets = [0, 32], sizes = [32, 64], strides = [1, 1]} : vector<32x96xf32> to vector<32x64xf32>
    %309 = tpu.concatenate %307, %307, %307, %307, %307, %307, %307, %307 in 0 : vector<32x32xf32>, vector<32x32xf32>, vector<32x32xf32>, vector<32x32xf32>, vector<32x32xf32>, vector<32x32xf32>, vector<32x32xf32>, vector<32x32xf32> -> vector<256x32xf32>
    %c0_179 = arith.constant 0 : index
    %c0_180 = arith.constant 0 : index
    %310 = vector.load %arg9[%c0_179, %c0_180] : memref<256x32xf32, #tpu.memory_space<vmem>>, vector<256x32xf32>
    %311 = arith.mulf %309, %310 : vector<256x32xf32>
    %312 = tpu.concatenate %308, %308, %308, %308, %308, %308, %308, %308 in 0 : vector<32x64xf32>, vector<32x64xf32>, vector<32x64xf32>, vector<32x64xf32>, vector<32x64xf32>, vector<32x64xf32>, vector<32x64xf32>, vector<32x64xf32> -> vector<256x64xf32>
    %c0_181 = arith.constant 0 : index
    %c0_182 = arith.constant 0 : index
    %313 = vector.load %arg10[%c0_181, %c0_182] : memref<256x64xf32, #tpu.memory_space<vmem>>, vector<256x64xf32>
    %314 = arith.mulf %312, %313 : vector<256x64xf32>
    %cst_183 = arith.constant dense<0.000000e+00> : vector<16x256xf32>
    %315 = tpu.matmul %303, %311, %cst_183 {dimension_numbers = #tpu.dot_dimension_numbers<[1], [1], [0], [0], [0, 0, 1, 0], [], []>} : vector<16x32xf32>, vector<256x32xf32>, vector<16x256xf32> -> vector<16x256xf32>
    %c0_184 = arith.constant 0 : index
    %c0_185 = arith.constant 0 : index
    %316 = vector.load %arg7[%c0_184, %c0_185] : memref<16x256xf32, #tpu.memory_space<vmem>>, vector<16x256xf32>
    %317 = arith.addf %315, %316 : vector<16x256xf32>
    %cst_186 = arith.constant dense<0xFF800000> : vector<16xf32>
    %318 = vector.multi_reduction <maximumf>, %317, %cst_186 [1] : vector<16x256xf32> to vector<16xf32>
    %319 = vector.shape_cast %318 : vector<16xf32> to vector<16x1xf32>
    %320 = vector.broadcast %319 : vector<16x1xf32> to vector<16x256xf32>
    %321 = arith.subf %317, %320 : vector<16x256xf32>
    %322 = math.exp %321 : vector<16x256xf32>
    %cst_187 = arith.constant dense<0.000000e+00> : vector<16x64xf32>
    %323 = tpu.matmul %322, %314, %cst_187 {dimension_numbers = #tpu.dot_dimension_numbers<[1], [0], [0], [1], [0, 0, 1, 1], [], []>} : vector<16x256xf32>, vector<256x64xf32>, vector<16x64xf32> -> vector<16x64xf32>
    %324 = vector.extract_strided_slice %323 {offsets = [0, 32], sizes = [16, 32], strides = [1, 1]} : vector<16x64xf32> to vector<16x32xf32>
    %cst_188 = arith.constant 1.000000e-30 : f32
    %325 = vector.broadcast %cst_188 : f32 to vector<16x32xf32>
    %326 = arith.maximumf %324, %325 : vector<16x32xf32>
    %327 = vector.extract_strided_slice %323 {offsets = [0, 0], sizes = [16, 32], strides = [1, 1]} : vector<16x64xf32> to vector<16x32xf32>
    %328 = tpu.reciprocal %326 {approx = true} : vector<16x32xf32> -> vector<16x32xf32>
    %329 = arith.mulf %327, %328 : vector<16x32xf32>
    %cst_189 = arith.constant dense<0.000000e+00> : vector<16x32xf32>
    %330 = tpu.matmul %329, %292, %cst_189 {dimension_numbers = #tpu.dot_dimension_numbers<[1], [0], [0], [1], [0, 0, 1, 1], [], []>} : vector<16x32xf32>, vector<32x32xf32>, vector<16x32xf32> -> vector<16x32xf32>
    %331 = vector.broadcast %298 : vector<1x32xf32> to vector<16x32xf32>
    %332 = arith.addf %330, %331 : vector<16x32xf32>
    %333 = arith.addf %1, %332 : vector<16x32xf32>
    %cst_190 = arith.constant dense<0.000000e+00> : vector<16xf32>
    %334 = vector.multi_reduction <add>, %333, %cst_190 [1] : vector<16x32xf32> to vector<16xf32>
    %335 = vector.shape_cast %334 : vector<16xf32> to vector<16x1xf32>
    %cst_191 = arith.constant 3.200000e+01 : f32
    %336 = vector.broadcast %cst_191 : f32 to vector<16x1xf32>
    %337 = arith.divf %335, %336 : vector<16x1xf32>
    %338 = vector.broadcast %337 : vector<16x1xf32> to vector<16x32xf32>
    %339 = arith.subf %333, %338 : vector<16x32xf32>
    %340 = arith.mulf %339, %339 : vector<16x32xf32>
    %cst_192 = arith.constant dense<0.000000e+00> : vector<16xf32>
    %341 = vector.multi_reduction <add>, %340, %cst_192 [1] : vector<16x32xf32> to vector<16xf32>
    %342 = vector.shape_cast %341 : vector<16xf32> to vector<16x1xf32>
    %cst_193 = arith.constant 3.200000e+01 : f32
    %343 = vector.broadcast %cst_193 : f32 to vector<16x1xf32>
    %344 = arith.divf %342, %343 : vector<16x1xf32>
    %345 = vector.broadcast %337 : vector<16x1xf32> to vector<16x32xf32>
    %346 = arith.subf %333, %345 : vector<16x32xf32>
    %cst_194 = arith.constant 9.99999974E-6 : f32
    %347 = vector.broadcast %cst_194 : f32 to vector<16x1xf32>
    %348 = arith.addf %344, %347 : vector<16x1xf32>
    %349 = math.rsqrt %348 : vector<16x1xf32>
    %350 = vector.broadcast %349 : vector<16x1xf32> to vector<16x32xf32>
    %351 = arith.mulf %346, %350 : vector<16x32xf32>
    %352 = vector.extract_strided_slice %300 {offsets = [0, 0], sizes = [1, 32], strides = [1, 1]} : vector<2x32xf32> to vector<1x32xf32>
    %353 = vector.broadcast %352 : vector<1x32xf32> to vector<16x32xf32>
    %354 = arith.mulf %351, %353 : vector<16x32xf32>
    %355 = vector.extract_strided_slice %300 {offsets = [1, 0], sizes = [1, 32], strides = [1, 1]} : vector<2x32xf32> to vector<1x32xf32>
    %356 = vector.broadcast %355 : vector<1x32xf32> to vector<16x32xf32>
    %357 = arith.addf %354, %356 : vector<16x32xf32>
    %c5 = arith.constant 5 : index
    %c0_195 = arith.constant 0 : index
    %c0_196 = arith.constant 0 : index
    %358 = vector.load %arg15[%c5, %c0_195, %c0_196] : memref<6x32x32xf32, #tpu.memory_space<vmem>>, vector<1x32x32xf32>
    %359 = vector.shape_cast %358 : vector<1x32x32xf32> to vector<32x32xf32>
    %c5_197 = arith.constant 5 : index
    %c0_198 = arith.constant 0 : index
    %c0_199 = arith.constant 0 : index
    %360 = vector.load %arg16[%c5_197, %c0_198, %c0_199] : memref<6x32x96xf32, #tpu.memory_space<vmem>>, vector<1x32x96xf32>
    %361 = vector.shape_cast %360 : vector<1x32x96xf32> to vector<32x96xf32>
    %c5_200 = arith.constant 5 : index
    %c0_201 = arith.constant 0 : index
    %c0_202 = arith.constant 0 : index
    %362 = vector.load %arg17[%c5_200, %c0_201, %c0_202] : memref<6x32x32xf32, #tpu.memory_space<vmem>>, vector<1x32x32xf32>
    %363 = vector.shape_cast %362 : vector<1x32x32xf32> to vector<32x32xf32>
    %c5_203 = arith.constant 5 : index
    %c0_204 = arith.constant 0 : index
    %c0_205 = arith.constant 0 : index
    %364 = vector.load %arg18[%c5_203, %c0_204, %c0_205] : memref<6x1x32xf32, #tpu.memory_space<vmem>>, vector<1x1x32xf32>
    %365 = vector.shape_cast %364 : vector<1x1x32xf32> to vector<1x32xf32>
    %c5_206 = arith.constant 5 : index
    %c0_207 = arith.constant 0 : index
    %c0_208 = arith.constant 0 : index
    %366 = vector.load %arg19[%c5_206, %c0_207, %c0_208] : memref<6x1x96xf32, #tpu.memory_space<vmem>>, vector<1x1x96xf32>
    %367 = vector.shape_cast %366 : vector<1x1x96xf32> to vector<1x96xf32>
    %c5_209 = arith.constant 5 : index
    %c0_210 = arith.constant 0 : index
    %c0_211 = arith.constant 0 : index
    %368 = vector.load %arg20[%c5_209, %c0_210, %c0_211] : memref<6x1x32xf32, #tpu.memory_space<vmem>>, vector<1x1x32xf32>
    %369 = vector.shape_cast %368 : vector<1x1x32xf32> to vector<1x32xf32>
    %c5_212 = arith.constant 5 : index
    %c0_213 = arith.constant 0 : index
    %c0_214 = arith.constant 0 : index
    %370 = vector.load %arg21[%c5_212, %c0_213, %c0_214] : memref<6x2x32xf32, #tpu.memory_space<vmem>>, vector<1x2x32xf32>
    %371 = vector.shape_cast %370 : vector<1x2x32xf32> to vector<2x32xf32>
    %cst_215 = arith.constant dense<0.000000e+00> : vector<16x32xf32>
    %372 = tpu.matmul %357, %359, %cst_215 {dimension_numbers = #tpu.dot_dimension_numbers<[1], [0], [0], [1], [0, 0, 1, 1], [], []>} : vector<16x32xf32>, vector<32x32xf32>, vector<16x32xf32> -> vector<16x32xf32>
    %373 = vector.broadcast %365 : vector<1x32xf32> to vector<16x32xf32>
    %374 = arith.addf %372, %373 : vector<16x32xf32>
    %cst_216 = arith.constant dense<0.000000e+00> : vector<16x96xf32>
    %375 = tpu.matmul %286, %361, %cst_216 {dimension_numbers = #tpu.dot_dimension_numbers<[1], [0], [0], [1], [0, 0, 1, 1], [], []>} : vector<16x32xf32>, vector<32x96xf32>, vector<16x96xf32> -> vector<16x96xf32>
    %376 = vector.broadcast %367 : vector<1x96xf32> to vector<16x96xf32>
    %377 = arith.addf %375, %376 : vector<16x96xf32>
    %378 = vector.extract_strided_slice %377 {offsets = [0, 0], sizes = [16, 32], strides = [1, 1]} : vector<16x96xf32> to vector<16x32xf32>
    %379 = vector.extract_strided_slice %377 {offsets = [0, 32], sizes = [16, 64], strides = [1, 1]} : vector<16x96xf32> to vector<16x64xf32>
    %380 = tpu.concatenate %378, %378, %378, %378, %378, %378, %378, %378 in 0 : vector<16x32xf32>, vector<16x32xf32>, vector<16x32xf32>, vector<16x32xf32>, vector<16x32xf32>, vector<16x32xf32>, vector<16x32xf32>, vector<16x32xf32> -> vector<128x32xf32>
    %c0_217 = arith.constant 0 : index
    %c0_218 = arith.constant 0 : index
    %381 = vector.load %arg13[%c0_217, %c0_218] : memref<128x32xf32, #tpu.memory_space<vmem>>, vector<128x32xf32>
    %382 = arith.mulf %380, %381 : vector<128x32xf32>
    %383 = tpu.concatenate %379, %379, %379, %379, %379, %379, %379, %379 in 0 : vector<16x64xf32>, vector<16x64xf32>, vector<16x64xf32>, vector<16x64xf32>, vector<16x64xf32>, vector<16x64xf32>, vector<16x64xf32>, vector<16x64xf32> -> vector<128x64xf32>
    %c0_219 = arith.constant 0 : index
    %c0_220 = arith.constant 0 : index
    %384 = vector.load %arg14[%c0_219, %c0_220] : memref<128x64xf32, #tpu.memory_space<vmem>>, vector<128x64xf32>
    %385 = arith.mulf %383, %384 : vector<128x64xf32>
    %cst_221 = arith.constant dense<0.000000e+00> : vector<16x128xf32>
    %386 = tpu.matmul %374, %382, %cst_221 {dimension_numbers = #tpu.dot_dimension_numbers<[1], [1], [0], [0], [0, 0, 1, 0], [], []>} : vector<16x32xf32>, vector<128x32xf32>, vector<16x128xf32> -> vector<16x128xf32>
    %c0_222 = arith.constant 0 : index
    %c0_223 = arith.constant 0 : index
    %387 = vector.load %arg8[%c0_222, %c0_223] : memref<16x128xf32, #tpu.memory_space<vmem>>, vector<16x128xf32>
    %388 = arith.addf %386, %387 : vector<16x128xf32>
    %cst_224 = arith.constant dense<0xFF800000> : vector<16xf32>
    %389 = vector.multi_reduction <maximumf>, %388, %cst_224 [1] : vector<16x128xf32> to vector<16xf32>
    %390 = vector.shape_cast %389 : vector<16xf32> to vector<16x1xf32>
    %391 = vector.broadcast %390 : vector<16x1xf32> to vector<16x128xf32>
    %392 = arith.subf %388, %391 : vector<16x128xf32>
    %393 = math.exp %392 : vector<16x128xf32>
    %cst_225 = arith.constant dense<0.000000e+00> : vector<16x64xf32>
    %394 = tpu.matmul %393, %385, %cst_225 {dimension_numbers = #tpu.dot_dimension_numbers<[1], [0], [0], [1], [0, 0, 1, 1], [], []>} : vector<16x128xf32>, vector<128x64xf32>, vector<16x64xf32> -> vector<16x64xf32>
    %395 = vector.extract_strided_slice %394 {offsets = [0, 32], sizes = [16, 32], strides = [1, 1]} : vector<16x64xf32> to vector<16x32xf32>
    %cst_226 = arith.constant 1.000000e-30 : f32
    %396 = vector.broadcast %cst_226 : f32 to vector<16x32xf32>
    %397 = arith.maximumf %395, %396 : vector<16x32xf32>
    %398 = vector.extract_strided_slice %394 {offsets = [0, 0], sizes = [16, 32], strides = [1, 1]} : vector<16x64xf32> to vector<16x32xf32>
    %399 = tpu.reciprocal %397 {approx = true} : vector<16x32xf32> -> vector<16x32xf32>
    %400 = arith.mulf %398, %399 : vector<16x32xf32>
    %cst_227 = arith.constant dense<0.000000e+00> : vector<16x32xf32>
    %401 = tpu.matmul %400, %363, %cst_227 {dimension_numbers = #tpu.dot_dimension_numbers<[1], [0], [0], [1], [0, 0, 1, 1], [], []>} : vector<16x32xf32>, vector<32x32xf32>, vector<16x32xf32> -> vector<16x32xf32>
    %402 = vector.broadcast %369 : vector<1x32xf32> to vector<16x32xf32>
    %403 = arith.addf %401, %402 : vector<16x32xf32>
    %404 = arith.addf %357, %403 : vector<16x32xf32>
    %cst_228 = arith.constant dense<0.000000e+00> : vector<16xf32>
    %405 = vector.multi_reduction <add>, %404, %cst_228 [1] : vector<16x32xf32> to vector<16xf32>
    %406 = vector.shape_cast %405 : vector<16xf32> to vector<16x1xf32>
    %cst_229 = arith.constant 3.200000e+01 : f32
    %407 = vector.broadcast %cst_229 : f32 to vector<16x1xf32>
    %408 = arith.divf %406, %407 : vector<16x1xf32>
    %409 = vector.broadcast %408 : vector<16x1xf32> to vector<16x32xf32>
    %410 = arith.subf %404, %409 : vector<16x32xf32>
    %411 = arith.mulf %410, %410 : vector<16x32xf32>
    %cst_230 = arith.constant dense<0.000000e+00> : vector<16xf32>
    %412 = vector.multi_reduction <add>, %411, %cst_230 [1] : vector<16x32xf32> to vector<16xf32>
    %413 = vector.shape_cast %412 : vector<16xf32> to vector<16x1xf32>
    %cst_231 = arith.constant 3.200000e+01 : f32
    %414 = vector.broadcast %cst_231 : f32 to vector<16x1xf32>
    %415 = arith.divf %413, %414 : vector<16x1xf32>
    %416 = vector.broadcast %408 : vector<16x1xf32> to vector<16x32xf32>
    %417 = arith.subf %404, %416 : vector<16x32xf32>
    %cst_232 = arith.constant 9.99999974E-6 : f32
    %418 = vector.broadcast %cst_232 : f32 to vector<16x1xf32>
    %419 = arith.addf %415, %418 : vector<16x1xf32>
    %420 = math.rsqrt %419 : vector<16x1xf32>
    %421 = vector.broadcast %420 : vector<16x1xf32> to vector<16x32xf32>
    %422 = arith.mulf %417, %421 : vector<16x32xf32>
    %423 = vector.extract_strided_slice %371 {offsets = [0, 0], sizes = [1, 32], strides = [1, 1]} : vector<2x32xf32> to vector<1x32xf32>
    %424 = vector.broadcast %423 : vector<1x32xf32> to vector<16x32xf32>
    %425 = arith.mulf %422, %424 : vector<16x32xf32>
    %426 = vector.extract_strided_slice %371 {offsets = [1, 0], sizes = [1, 32], strides = [1, 1]} : vector<2x32xf32> to vector<1x32xf32>
    %427 = vector.broadcast %426 : vector<1x32xf32> to vector<16x32xf32>
    %428 = arith.addf %425, %427 : vector<16x32xf32>
    %c0_233 = arith.constant 0 : index
    %c0_234 = arith.constant 0 : index
    %429 = vector.load %arg22[%c0_233, %c0_234] : memref<32x32xf32, #tpu.memory_space<vmem>>, vector<32x32xf32>
    tpu.vector_store %arg22[%c0_233, %c0_234], %144 {strides = array<i32>} : memref<32x32xf32, #tpu.memory_space<vmem>>, vector<32x32xf32>,
    %c0_235 = arith.constant 0 : index
    %c0_236 = arith.constant 0 : index
    %430 = vector.load %arg23[%c0_235, %c0_236] : memref<16x32xf32, #tpu.memory_space<vmem>>, vector<16x32xf32>
    tpu.vector_store %arg23[%c0_235, %c0_236], %428 {strides = array<i32>} : memref<16x32xf32, #tpu.memory_space<vmem>>, vector<16x32xf32>,
    %c0_237 = arith.constant 0 : index
    %c0_238 = arith.constant 0 : index
    %431 = vector.load %arg24[%c0_237, %c0_238] : memref<16x32xf32, #tpu.memory_space<vmem>>, vector<16x32xf32>
    tpu.vector_store %arg24[%c0_237, %c0_238], %286 {strides = array<i32>} : memref<16x32xf32, #tpu.memory_space<vmem>>, vector<16x32xf32>,
    return
  }
}

</mosaic_0001>

<bundles_post_ra>
// kernel: tile.100
= control target key start
LH: loop header
LB: loop body
LE: loop exit
PB: predicated region body
PF: predicated region fallthrough
CT: control target
= control target key end

     0   :  { %v13_v2 = vmov 0   ;;  %s30_s0 = inlined_call_operand.vmem [shape: pred[32], index: 0, kind: input, shape index: {}]   ;;  %s31_s1 = inlined_call_operand.vmem [shape: pred[8,32], index: 1, kind: output, shape index: {}]  }
   0x1   :  { %v4_v0 = vld [vmem:[%s30_s0] ss:$0 sm:$0xff] }
   0x2   :  { %v7_v1 = vand.u32 255, %v4_v0 }
   0x4   :  { %v8_v3 = vpack.c.b16 %v13_v2, %v7_v1 }
   0x6   :  { %v9_v4 = vpack.c.b8 %v13_v2, %v8_v3 }
   0x8   :  { %11 = vst [vmem:[%s31_s1] sm:$0x3] %v9_v4 }

// kernel: tile.99
= control target key start
LH: loop header
LB: loop body
LE: loop exit
PB: predicated region body
PF: predicated region fallthrough
CT: control target
= control target key end

     0   :  { %vm19_vm0 = vcmask 130048   ;;  %vm25_vm1 = vcmask 261248   ;;  %v39_v6 = vmov 0   ;;  %s56_s0 = inlined_call_operand.vmem [shape: pred[2,16], index: 0, kind: input, shape index: {}]   ;;  %s57_s1 = inlined_call_operand.vmem [shape: pred[32], index: 1, kind: output, shape index: {}]  }
   0x1   :  { %v12_v0 = vld [vmem:[%s56_s0] sm:$0x1]  ;;  %s38_s0 = smov 16  }
   0x2   :  { %v13_v1 = vunpack.c.0.s8 %v12_v0 }
   0x4   :  { %17 = vst [vmem:[#allocation1] sm:$0xf] %v13_v1 }
   0xb   :  { %v22_v2 = vld [vmem:[#allocation1 + $0x1] sm:$0x1]   ;;  %v18_v3 = vld [vmem:[#allocation1] sm:$0x1]  }
   0xc   :  { %23 = vrot.lane.b32.xlu0 %v22_v2, %s38_s0  ;;  %20 = vst.msk [vmem:[#allocation0] sm:$0x1] %vm19_vm0, %v18_v3  }
  0x7e   :  { %v24_v4 = vpop.permute.xlu0 %23  }
  0x7f   :  { %26 = vst.msk [vmem:[#allocation0] sm:$0x1] %vm25_vm1, %v24_v4  }
  0x86   :  { %v31_v5 = vld [vmem:[#allocation0] sm:$0xf] }
  0x87   :  { %v33_v7 = vpack.c.b16 %v39_v6, %v31_v5 }
  0x89   :  { %v34_v8 = vpack.c.b8 %v39_v6, %v33_v7 }
  0x8b   :  { %35 = vst [vmem:[%s57_s1] sm:$0x1] %v34_v8 }

// kernel: tile.91
= control target key start
LH: loop header
LB: loop body
LE: loop exit
PB: predicated region body
PF: predicated region fallthrough
CT: control target
= control target key end

     0   :  { %vm19_vm0 = vcmask 64512   ;;  %vm25_vm1 = vcmask 130112   ;;  %v39_v6 = vmov 0   ;;  %s56_s0 = inlined_call_operand.vmem [shape: pred[2,8], index: 0, kind: input, shape index: {}]   ;;  %s57_s1 = inlined_call_operand.vmem [shape: pred[16], index: 1, kind: output, shape index: {}]  }
   0x1   :  { %v12_v0 = vld [vmem:[%s56_s0] sm:$0x1]  ;;  %s38_s0 = smov 8  }
   0x2   :  { %v13_v1 = vunpack.c.0.s8 %v12_v0 }
   0x4   :  { %17 = vst [vmem:[#allocation1] sm:$0xf] %v13_v1 }
   0xb   :  { %v22_v2 = vld [vmem:[#allocation1 + $0x1] sm:$0x1]   ;;  %v18_v3 = vld [vmem:[#allocation1] sm:$0x1]  }
   0xc   :  { %23 = vrot.lane.b32.xlu0 %v22_v2, %s38_s0  ;;  %20 = vst.msk [vmem:[#allocation0] sm:$0x1] %vm19_vm0, %v18_v3  }
  0x7e   :  { %v24_v4 = vpop.permute.xlu0 %23  }
  0x7f   :  { %26 = vst.msk [vmem:[#allocation0] sm:$0x1] %vm25_vm1, %v24_v4  }
  0x86   :  { %v31_v5 = vld [vmem:[#allocation0] sm:$0xf] }
  0x87   :  { %v33_v7 = vpack.c.b16 %v39_v6, %v31_v5 }
  0x89   :  { %v34_v8 = vpack.c.b8 %v39_v6, %v33_v7 }
  0x8b   :  { %35 = vst [vmem:[%s57_s1] sm:$0x1] %v34_v8 }

// kernel: tile.92
= control target key start
LH: loop header
LB: loop body
LE: loop exit
PB: predicated region body
PF: predicated region fallthrough
CT: control target
= control target key end

     0   :  { %v13_v2 = vmov 0   ;;  %s30_s0 = inlined_call_operand.vmem [shape: pred[16], index: 0, kind: input, shape index: {}]   ;;  %s31_s1 = inlined_call_operand.vmem [shape: pred[8,16], index: 1, kind: output, shape index: {}]  }
   0x1   :  { %v4_v0 = vld [vmem:[%s30_s0] ss:$0 sm:$0xff] }
   0x2   :  { %v7_v1 = vand.u32 255, %v4_v0 }
   0x4   :  { %v8_v3 = vpack.c.b16 %v13_v2, %v7_v1 }
   0x6   :  { %v9_v4 = vpack.c.b8 %v13_v2, %v8_v3 }
   0x8   :  { %11 = vst [vmem:[%s31_s1] sm:$0x3] %v9_v4 }

// kernel: tile.79
= control target key start
LH: loop header
LB: loop body
LE: loop exit
PB: predicated region body
PF: predicated region fallthrough
CT: control target
= control target key end

     0   :  { %vm7_vm0 = vcmask 64512   ;;  %vm13_vm1 = vcmask 130112   ;;  %s39_s0 = inlined_call_operand.vmem [shape: s32[2,8], index: 0, kind: input, shape index: {}]   ;;  %s40_s1 = inlined_call_operand.vmem [shape: s32[16], index: 1, kind: output, shape index: {}]  }
   0x1   :  { %v4_v0 = vld [vmem:[%s39_s0] sm:$0x3]  ;;  %s22_s0 = smov 8  }
   0x2   :  { %5 = vst [vmem:[#allocation1] sm:$0x3] %v4_v0 }
   0x9   :  { %v10_v1 = vld [vmem:[#allocation1 + $0x1] sm:$0x1]   ;;  %v6_v2 = vld [vmem:[#allocation1] sm:$0x1]  }
   0xa   :  { %11 = vrot.lane.b32.xlu0 %v10_v1, %s22_s0  ;;  %8 = vst.msk [vmem:[#allocation0] sm:$0x1] %vm7_vm0, %v6_v2  }
  0x7c   :  { %v12_v3 = vpop.permute.xlu0 %11  }
  0x7d   :  { %14 = vst.msk [vmem:[#allocation0] sm:$0x1] %vm13_vm1, %v12_v3  }
  0x84   :  { %v18_v4 = vld [vmem:[#allocation0] sm:$0x1] }
  0x85   :  { %20 = vst [vmem:[%s40_s1] sm:$0x1] %v18_v4 }

// kernel: ne.67
= control target key start
LH: loop header
LB: loop body
LE: loop exit
PB: predicated region body
PF: predicated region fallthrough
CT: control target
= control target key end

     0   :  { %vm7_vm0 = vcmask 130048   ;;  %vm13_vm1 = vcmask 261248   ;;  %s39_s0 = inlined_call_operand.vmem [shape: s32[2,16], index: 0, kind: input, shape index: {}]   ;;  %s40_s1 = inlined_call_operand.vmem [shape: s32[32], index: 1, kind: output, shape index: {}]  }
   0x1   :  { %v4_v0 = vld [vmem:[%s39_s0] sm:$0x3]  ;;  %s22_s0 = smov 16  }
   0x2   :  { %5 = vst [vmem:[#allocation1] sm:$0x3] %v4_v0 }
   0x9   :  { %v10_v1 = vld [vmem:[#allocation1 + $0x1] sm:$0x1]   ;;  %v6_v2 = vld [vmem:[#allocation1] sm:$0x1]  }
   0xa   :  { %11 = vrot.lane.b32.xlu0 %v10_v1, %s22_s0  ;;  %8 = vst.msk [vmem:[#allocation0] sm:$0x1] %vm7_vm0, %v6_v2  }
  0x7c   :  { %v12_v3 = vpop.permute.xlu0 %11  }
  0x7d   :  { %14 = vst.msk [vmem:[#allocation0] sm:$0x1] %vm13_vm1, %v12_v3  }
  0x84   :  { %v18_v4 = vld [vmem:[#allocation0] sm:$0x1] }
  0x85   :  { %20 = vst [vmem:[%s40_s1] sm:$0x1] %v18_v4 }

// kernel: tile.96
= control target key start
LH: loop header
LB: loop body
LE: loop exit
PB: predicated region body
PF: predicated region fallthrough
CT: control target
= control target key end

     0   :  { %s22_s0 = inlined_call_operand.vmem [shape: s32[32], index: 0, kind: input, shape index: {}]   ;;  %s23_s1 = inlined_call_operand.vmem [shape: s32[8,32], index: 1, kind: output, shape index: {}]  }
   0x1   :  { %v4_v0 = vld [vmem:[%s22_s0] ss:$0 sm:$0xff] }
   0x2   :  { %5 = vst [vmem:[%s23_s1] sm:$0xff] %v4_v0 }

// kernel: ne.84
= control target key start
LH: loop header
LB: loop body
LE: loop exit
PB: predicated region body
PF: predicated region fallthrough
CT: control target
= control target key end

     0   :  { %s7_s6 = smov 3  ;;  %s14_s9 = smov 3  ;;  %vm4_vm0 = vcmask 261120   ;;  %vm11_vm1 = vcmask 1048320   ;;  %vm18_vm2 = vcmask 785920   ;;  %vm25_vm3 = vcmask 523520   ;;  %s67_s0 = inlined_call_operand.vmem [shape: s32[8,32], index: 0, kind: input, shape index: {}]   ;;  %s68_s1 = inlined_call_operand.vmem [shape: s32[256], index: 1, kind: output, shape index: {}]  }
   0x1   :  { %v33_v0 = vld [vmem:[%s67_s0 + $0x3] ss:$4 sm:%s7_s6]   ;;  %s39_s10 = smov 96   ;;  %s21_s11 = smov 3  ;;  %v34_v1 = vld [vmem:[%s67_s0 + $0x2] ss:$4 sm:%s14_s9]  }
   0x2   :  { %9 = vrot.lane.b32.xlu0 %v33_v0, %s39_s10  ;;  %v35_v2 = vld [vmem:[%s67_s0 + $0x1] ss:$4 sm:%s21_s11]   ;;  %s2_s16 = smov 3  ;;  %s40_s17 = smov 32  }
   0x3   :  { %23 = vrot.lane.b32.xlu1 %v35_v2, %s40_s17  ;;  %v3_v3 = vld [vmem:[%s67_s0] ss:$4 sm:%s2_s16]   ;;  %s41_s0 = smov 64  }
   0x4   :  { %5 = vst.msk [vmem:[#allocation0] sm:$0x3] %vm4_vm0, %v3_v3  }
   0x6   :  { %16 = vrot.lane.b32.xlu0 %v34_v1, %s41_s0 }
  0x74   :  { %v10_v4 = vpop.permute.xlu0 %9  }
  0x75   :  { %12 = vst.msk [vmem:[#allocation0] sm:$0x3] %vm11_vm1, %v10_v4   ;;  %v24_v5 = vpop.permute.xlu1 %23  }
  0x78   :  { %v17_v6 = vpop.permute.xlu0 %16  }
  0x79   :  { %19 = vst.msk [vmem:[#allocation0] sm:$0x3] %vm18_vm2, %v17_v6  }
  0x7a   :  { %26 = vst.msk [vmem:[#allocation0] sm:$0x3] %vm25_vm3, %v24_v5  }
  0x81   :  { %v30_v7 = vld [vmem:[#allocation0] sm:$0x3] }
  0x82   :  { %32 = vst [vmem:[%s68_s1] sm:$0x3] %v30_v7 }

// kernel: tile.80
= control target key start
LH: loop header
LB: loop body
LE: loop exit
PB: predicated region body
PF: predicated region fallthrough
CT: control target
= control target key end

     0   :  { %s22_s0 = inlined_call_operand.vmem [shape: s32[16], index: 0, kind: input, shape index: {}]   ;;  %s23_s1 = inlined_call_operand.vmem [shape: s32[8,16], index: 1, kind: output, shape index: {}]  }
   0x1   :  { %v4_v0 = vld [vmem:[%s22_s0] ss:$0 sm:$0xff] }
   0x2   :  { %5 = vst [vmem:[%s23_s1] sm:$0xff] %v4_v0 }

// kernel: ne.70
= control target key start
LH: loop header
LB: loop body
LE: loop exit
PB: predicated region body
PF: predicated region fallthrough
CT: control target
= control target key end

     0   :  { %s67_s10 = smov 112   ;;  %s68_s11 = smov 80   ;;  %vm3_vm0 = vcmask 130048   ;;  %vm9_vm1 = vcmask 1048448   ;;  %vm15_vm2 = vcmask 917248   ;;  %vm21_vm3 = vcmask 786048   ;;  %s111_s0 = inlined_call_operand.vmem [shape: s32[8,16], index: 0, kind: input, shape index: {}]   ;;  %s112_s1 = inlined_call_operand.vmem [shape: s32[128], index: 1, kind: output, shape index: {}]  }
   0x1   :  { %v53_v0 = vld [vmem:[%s111_s0 + $0x7] sm:$0x1]   ;;  %v55_v1 = vld [vmem:[%s111_s0 + $0x5] sm:$0x1]   ;;  %v54_v2 = vld [vmem:[%s111_s0 + $0x6] sm:$0x1]  }
   0x2   :  { %7 = vrot.lane.b32.xlu0 %v53_v0, %s67_s10  ;;  %19 = vrot.lane.b32.xlu1 %v55_v1, %s68_s11  ;;  %v56_v3 = vld [vmem:[%s111_s0 + $0x4] sm:$0x1]   ;;  %v2_v4 = vld [vmem:[%s111_s0] sm:$0x1]   ;;  %s69_s18 = smov 96   ;;  %s70_s19 = smov 64  }
   0x3   :  { %4 = vst.msk [vmem:[#allocation0] sm:$0x1] %vm3_vm0, %v2_v4   ;;  %v57_v5 = vld [vmem:[%s111_s0 + $0x3] sm:$0x1]   ;;  %v58_v6 = vld [vmem:[%s111_s0 + $0x2] sm:$0x1]  }
   0x4   :  { %s71_s24 = smov 48   ;;  %s72_s25 = smov 32   ;;  %v59_v7 = vld [vmem:[%s111_s0 + $0x1] sm:$0x1]   ;;  %vm27_vm4 = vcmask 654848   ;;  %vm33_vm5 = vcmask 523648  }
   0x5   :  { %s73_s0 = smov 16   ;;  %vm39_vm6 = vcmask 392448   ;;  %vm45_vm7 = vcmask 261248  }
   0x6   :  { %13 = vrot.lane.b32.xlu0 %v54_v2, %s69_s18  ;;  %25 = vrot.lane.b32.xlu1 %v56_v3, %s70_s19 }
   0xa   :  { %31 = vrot.lane.b32.xlu0 %v57_v5, %s71_s24  ;;  %37 = vrot.lane.b32.xlu1 %v58_v6, %s72_s25 }
   0xe   :  { %43 = vrot.lane.b32.xlu0 %v59_v7, %s73_s0 }
  0x74   :  { %v8_v8 = vpop.permute.xlu0 %7   ;;  %v20_v9 = vpop.permute.xlu1 %19  }
  0x75   :  { %10 = vst.msk [vmem:[#allocation0] sm:$0x1] %vm9_vm1, %v8_v8  }
  0x78   :  { %v14_v10 = vpop.permute.xlu0 %13   ;;  %v26_v11 = vpop.permute.xlu1 %25  }
  0x79   :  { %16 = vst.msk [vmem:[#allocation0] sm:$0x1] %vm15_vm2, %v14_v10  }
  0x7a   :  { %22 = vst.msk [vmem:[#allocation0] sm:$0x1] %vm21_vm3, %v20_v9  }
  0x7b   :  { %28 = vst.msk [vmem:[#allocation0] sm:$0x1] %vm27_vm4, %v26_v11  }
  0x7c   :  { %v32_v12 = vpop.permute.xlu0 %31   ;;  %v38_v13 = vpop.permute.xlu1 %37  }
  0x7d   :  { %34 = vst.msk [vmem:[#allocation0] sm:$0x1] %vm33_vm5, %v32_v12  }
  0x7e   :  { %40 = vst.msk [vmem:[#allocation0] sm:$0x1] %vm39_vm6, %v38_v13  }
  0x80   :  { %v44_v14 = vpop.permute.xlu0 %43  }
  0x81   :  { %46 = vst.msk [vmem:[#allocation0] sm:$0x1] %vm45_vm7, %v44_v14  }
  0x88   :  { %v50_v15 = vld [vmem:[#allocation0] sm:$0x1] }
  0x89   :  { %52 = vst [vmem:[%s112_s1] sm:$0x1] %v50_v15 }

// kernel: multimodal_interaction.1
= control target key start
LH: loop header
LB: loop body
LE: loop exit
PB: predicated region body
PF: predicated region fallthrough
CT: control target
= control target key end

     0   :  { %s9819_s0 = inlined_call_operand.vmem [shape: f32[32,32], index: 0, kind: input, shape index: {}]   ;;  %s9820_s1 = inlined_call_operand.vmem [shape: f32[16,32], index: 1, kind: input, shape index: {}]   ;;  %s9821_s2 = inlined_call_operand.vmem [shape: f32[16,32], index: 2, kind: input, shape index: {}]   ;;  %s9822_s3 = inlined_call_operand.vmem [shape: f32[32,128], index: 3, kind: input, shape index: {}]   ;;  %s9823_s4 = inlined_call_operand.vmem [shape: f32[32,128], index: 4, kind: input, shape index: {}]   ;;  %s9824_s5 = inlined_call_operand.vmem [shape: f32[16,256], index: 5, kind: input, shape index: {}, may-alias: {5,7}]   ;;  %s9825_s6 = inlined_call_operand.vmem [shape: f32[16,128], index: 6, kind: input, shape index: {}]   ;;  %s9826_s7 = inlined_call_operand.vmem [shape: f32[16,256], index: 7, kind: input, shape index: {}, may-alias: {5,7}]   ;;  %s9827_s8 = inlined_call_operand.vmem [shape: f32[16,128], index: 8, kind: input, shape index: {}]   ;;  %s9828_s9 = inlined_call_operand.vmem [shape: f32[256,32], index: 9, kind: input, shape index: {}]   ;;  %s9829_s10 = inlined_call_operand.vmem [shape: f32[256,64], index: 10, kind: input, shape index: {}]   ;;  %s9830_s11 = inlined_call_operand.vmem [shape: f32[128,32], index: 11, kind: input, shape index: {}, may-alias: {11,13}]   ;;  %s9831_s12 = inlined_call_operand.vmem [shape: f32[128,64], index: 12, kind: input, shape index: {}, may-alias: {12,14}]   ;;  %s9832_s13 = inlined_call_operand.vmem [shape: f32[128,32], index: 13, kind: input, shape index: {}, may-alias: {11,13}]   ;;  %s9833_s14 = inlined_call_operand.vmem [shape: f32[128,64], index: 14, kind: input, shape index: {}, may-alias: {12,14}]   ;;  %s9834_s15 = inlined_call_operand.vmem [shape: f32[6,32,32], index: 15, kind: input, shape index: {}]   ;;  %s9835_s16 = inlined_call_operand.vmem [shape: f32[6,32,96], index: 16, kind: input, shape index: {}]   ;;  %s9836_s17 = inlined_call_operand.vmem [shape: f32[6,32,32], index: 17, kind: input, shape index: {}]   ;;  %s9837_s18 = inlined_call_operand.vmem [shape: f32[6,1,32], index: 18, kind: input, shape index: {}]   ;;  %s9838_s19 = inlined_call_operand.vmem [shape: f32[6,1,96], index: 19, kind: input, shape index: {}]   ;;  %s9839_s20 = inlined_call_operand.vmem [shape: f32[6,1,32], index: 20, kind: input, shape index: {}]   ;;  %s9840_s21 = inlined_call_operand.vmem [shape: f32[6,2,32], index: 21, kind: input, shape index: {}]   ;;  %s9841_s22 = inlined_call_operand.hbm [shape: f32[32,32], index: 22, kind: output, shape index: {0}]   ;;  %s9842_s23 = inlined_call_operand.hbm [shape: f32[16,32], index: 23, kind: output, shape index: {1}]   ;;  %s9843_s24 = inlined_call_operand.hbm [shape: f32[16,32], index: 24, kind: output, shape index: {2}]  }
   0x1   :  { %9900 = sst [smem:[#allocation56_spill]] %s9819_s0 }
   0x2   :  { %9901 = sst [smem:[#allocation57_spill]] %s9820_s1 }
   0x3   :  { %9902 = sst [smem:[#allocation58_spill]] %s9821_s2 }
   0x4   :  { %9903 = sst [smem:[#allocation59_spill]] %s9822_s3 }
   0x5   :  { %9904 = sst [smem:[#allocation60_spill]] %s9823_s4 }
   0x6   :  { %9905 = sst [smem:[#allocation61_spill]] %s9824_s5 }
   0x7   :  { %9906 = sst [smem:[#allocation62_spill]] %s9825_s6 }
   0x8   :  { %9907 = sst [smem:[#allocation63_spill]] %s9826_s7 }
   0x9   :  { %9908 = sst [smem:[#allocation64_spill]] %s9827_s8 }
   0xa   :  { %30 = vsyncpa [#allocation3], 0  ;;  %v84_v0 = vld [vmem:[%s9834_s15] sm:$0xff]  ;;  %v85_v1 = vld [vmem:[%s9834_s15 + $0x8] sm:$0xff]  ;;  %vm106_vm0 = vcmask 261120   ;;  %s9909_s3 = sld [smem:[#allocation56_spill]] }
   0xb   :  { %v86_v2 = vld [vmem:[%s9834_s15 + $0x10] sm:$0xff]  ;;  %v6182_v3 = vpack.c.bf16 %v85_v1, %v84_v0  ;;  %v87_v4 = vld [vmem:[%s9834_s15 + $0x18] sm:$0xff]  ;;  %v88_v7 = vld [vmem:[%s9835_s16] sm:$0xff]  ;;  %s7377_s27 = smov 32  }
   0xc   :  { %v6186_v6 = vpack.c.bf16 %v87_v4, %v86_v2  ;;  %v89_v8 = vld [vmem:[%s9835_s16 + $0x8] sm:$0xff]  ;;  %v325_v9 = vld [vmem:[%s9833_s14 + $0x10] sm:$0xff]  ;;  %v323_v11 = vld [vmem:[%s9833_s14] sm:$0xff] }
   0xd   :  { %6183 = vmatprep.subr.bf16.mxu0 %v6182_v3  ;;  %v6190_v10 = vpack.c.bf16 %v89_v8, %v88_v7  ;;  %359 = vrot.lane.b32.xlu1 %v325_v9, %s7377_s27  ;;  %v90_v12 = vld [vmem:[%s9835_s16 + $0x10] sm:$0xff]  ;;  %v91_v13 = vld [vmem:[%s9835_s16 + $0x18] sm:$0xff]  ;;  %v324_v15 = vld [vmem:[%s9833_s14 + $0x8] sm:$0xff] }
   0xe   :  { %6185 = vmatpush3.bf16.msra.mxu0 %v6182_v3  ;;  %355 = vrot.lane.b32.xlu0 %v323_v11, %s7377_s27  ;;  %v326_v14 = vld [vmem:[%s9833_s14 + $0x18] sm:$0xff]  ;;  %v6194_v18 = vpack.c.bf16 %v91_v13, %v90_v12  ;;  %v328_v19 = vld [vmem:[%s9833_s14 + $0x28] sm:$0xff] }
   0xf   :  { %6187 = vmatprep.subr.bf16.mxu0 %v6186_v6 }
  0x10   :  { %v7524_v5 = vld [vmem:[%s9909_s3] sm:$0xff]  ;;  %v7557_v16 = vld [vmem:[%s9909_s3 + $0x8] sm:$0xff]  ;;  %v7562_v17 = vld [vmem:[%s9909_s3 + $0x10] sm:$0xff] }
  0x11   :  { %5682 = vmatprep.mubr.msk.f32.mxu0 %vm106_vm0, %v7524_v5  ;;  %361 = vrot.lane.b32.xlu1 %v326_v14, %s7377_s27 }
  0x12   :  { %6189 = vmatpush3.bf16.msra.mxu0 %v6186_v6  ;;  %357 = vrot.lane.b32.xlu0 %v324_v15, %s7377_s27 }
  0x13   :  { %6191 = vmatprep.subr.bf16.mxu0 %v6190_v10 }
  0x14   :  { %31 = vsyncpa [#allocation5], 0  ;;  %v327_v20 = vld [vmem:[%s9833_s14 + $0x20] sm:$0xff]  ;;  %v7579_v21 = vld [vmem:[%s9909_s3 + $0x18] sm:$0xff]  ;;  %s9910_s4 = sld [smem:[#allocation58_spill]]  ;;  %s7378_s6 = smov 96  }
  0x15   :  { %5683 = vmatmul.mubr.msk.f32.vlgmr.msra.gmra.mrb[0].mxu0 %vm106_vm0, %v7557_v16  ;;  %365 = vrot.lane.b32.xlu1 %v328_v19, %s7377_s27  ;;  %v330_v23 = vld [vmem:[%s9833_s14 + $0x38] sm:$0xff]  ;;  %v329_v24 = vld [vmem:[%s9833_s14 + $0x30] sm:$0xff]  ;;  %v332_v26 = vld [vmem:[%s9833_s14 + $0x48] sm:$0xff]  ;;  %s9929_s29 = sld [smem:[#allocation59_spill]]  ;;  %s9930_s7 = sld [smem:[#allocation57_spill]] }
  0x16   :  { %6193 = vmatpush3.bf16.msra.mxu0 %v6190_v10  ;;  %5685 = vmatprep.mubr.msk.f32.mxu0 %vm106_vm0, %v7562_v17  ;;  %v331_v27 = vld [vmem:[%s9833_s14 + $0x40] sm:$0xff]  ;;  %v334_v28 = vld [vmem:[%s9833_s14 + $0x58] sm:$0xff]  ;;  %v333_v29 = vld [vmem:[%s9833_s14 + $0x50] sm:$0xff]  ;;  %s9941_s25 = sld [smem:[#allocation60_spill]]  ;;  %s9963_s3 = sld [smem:[#allocation61_spill]] }
  0x17   :  { %6195 = vmatprep.subr.bf16.mxu0 %v6194_v18  ;;  %363 = vrot.lane.b32.xlu0 %v327_v20, %s7377_s27  ;;  %v336_v30 = vld [vmem:[%s9833_s14 + $0x68] sm:$0xff]  ;;  %v335_v31 = vld [vmem:[%s9833_s14 + $0x60] sm:$0xff]  ;;  %v338_v32 = vld [vmem:[%s9833_s14 + $0x78] sm:$0xff]  ;;  %s9975_s28 = sld [smem:[#allocation62_spill]]  ;;  %s9997_s8 = sld [smem:[#allocation63_spill]] }
  0x18   :  { %v337_v33 = vld [vmem:[%s9833_s14 + $0x70] sm:$0xff]  ;;  %v4964_v46 = vld [vmem:[%s9837_s18] ss:$0 sm:$0xff]  ;;  %v292_v60 = vld [vmem:[%s9832_s13 + $0x8] sm:$0xff] }
  0x19   :  { %5686 = vmatmul.mubr.msk.f32.gmra.mrb[2].mxu0 %vm106_vm0, %v7579_v21  ;;  %369 = vrot.lane.b32.xlu1 %v330_v23, %s7377_s27  ;;  %v4969_v57 = vld [vmem:[%s9838_s19] ss:$0 sm:$0xff]  ;;  %v293_v2 = vld [vmem:[%s9832_s13 + $0x10] sm:$0xff]  ;;  %v294_v3 = vld [vmem:[%s9832_s13 + $0x18] sm:$0xff] }
  0x1a   :  { %v82_v22 = vld [vmem:[%s9910_s4] sm:$0xff]  ;;  %6197 = vmatpush3.bf16.msra.mxu0 %v6194_v18  ;;  %v83_v25 = vld [vmem:[%s9910_s4 + $0x8] sm:$0xff]  ;;  %vm7726_vm1 = vmpackc.low %vm106_vm0, %vm106_vm0 }
  0x1b   :  { %5696 = vmatprep.mubr.msk.f32.mxu0 %vm106_vm0, %v82_v22  ;;  %367 = vrot.lane.b32.xlu0 %v329_v24, %s7377_s27  ;;  %v291_v0 = vld [vmem:[%s9832_s13] sm:$0xff]  ;;  %v296_v20 = vld [vmem:[%s9832_s13 + $0x28] sm:$0xff] }
  0x1c   :  { %v295_v19 = vld [vmem:[%s9832_s13 + $0x20] sm:$0xff] }
  0x1d   :  { %5697 = vmatmul.mubr.msk.f32.vlgmr.msra.gmra.mrb[4].mxu0 %vm106_vm0, %v83_v25  ;;  %373 = vrot.lane.b32.xlu1 %v332_v26, %s7377_s27 }
  0x1f   :  { %371 = vrot.lane.b32.xlu0 %v331_v27, %s7377_s27  ;;  %v297_v27 = vld [vmem:[%s9832_s13 + $0x30] sm:$0xff] }
  0x21   :  { %377 = vrot.lane.b32.xlu1 %v334_v28, %s7377_s27 }
  0x23   :  { %375 = vrot.lane.b32.xlu0 %v333_v29, %s7377_s27 }
  0x25   :  { %381 = vrot.lane.b32.xlu1 %v336_v30, %s7377_s27 }
  0x27   :  { %379 = vrot.lane.b32.xlu0 %v335_v31, %s7377_s27 }
  0x29   :  { %385 = vrot.lane.b32.xlu1 %v338_v32, %s7377_s27  ;;  %v298_v32 = vld [vmem:[%s9832_s13 + $0x38] sm:$0xff] }
  0x2b   :  { %383 = vrot.lane.b32.xlu0 %v337_v33, %s7377_s27  ;;  %v299_v33 = vld [vmem:[%s9832_s13 + $0x40] sm:$0xff] }
  0x7f   :  { %v7633_v34 = vpop.permute.xlu1 %359 }
  0x80   :  { %9911 = vst [vmem:[#allocation9_spill] sm:$0xff] %v7633_v34  ;;  %v7635_v35 = vpop.permute.xlu0 %355 }
  0x81   :  { %9912 = vst [vmem:[#allocation10_spill] sm:$0xff] %v7635_v35 }
  0x83   :  { %v7637_v36 = vpop.permute.xlu1 %361 }
  0x84   :  { %9913 = vst [vmem:[#allocation11_spill] sm:$0xff] %v7637_v36  ;;  %v7639_v37 = vpop.permute.xlu0 %357 }
  0x85   :  { %9914 = vst [vmem:[#allocation12_spill] sm:$0xff] %v7639_v37 }
  0x87   :  { %v7641_v38 = vpop.permute.xlu1 %365 }
  0x88   :  { %9915 = vst [vmem:[#allocation13_spill] sm:$0xff] %v7641_v38 }
  0x89   :  { %v7643_v39 = vpop.permute.xlu0 %363 }
  0x8a   :  { %9916 = vst [vmem:[#allocation14_spill] sm:$0xff] %v7643_v39 }
  0x8b   :  { %v7645_v40 = vpop.permute.xlu1 %369 }
  0x8c   :  { %9917 = vst [vmem:[#allocation15_spill] sm:$0xff] %v7645_v40 }
  0x8d   :  { %v7647_v41 = vpop.permute.xlu0 %367 }
  0x8e   :  { %9918 = vst [vmem:[#allocation16_spill] sm:$0xff] %v7647_v41 }
  0x8f   :  { %v7649_v42 = vpop.permute.xlu1 %373 }
  0x90   :  { %9919 = vst [vmem:[#allocation17_spill] sm:$0xff] %v7649_v42 }
  0x91   :  { %v7651_v43 = vpop.permute.xlu0 %371 }
  0x92   :  { %9920 = vst [vmem:[#allocation18_spill] sm:$0xff] %v7651_v43 }
  0x93   :  { %v7653_v44 = vpop.permute.xlu1 %377 }
  0x94   :  { %9921 = vst [vmem:[#allocation19_spill] sm:$0xff] %v7653_v44 }
  0x95   :  { %v7655_v45 = vpop.permute.xlu0 %375 }
  0x96   :  { %9922 = vst [vmem:[#allocation20_spill] sm:$0xff] %v7655_v45 }
  0x97   :  { %v7662_v51 = vpop.permute.xlu1 %381 }
  0x98   :  { %9923 = vst [vmem:[#allocation21_spill] sm:$0xff] %v7662_v51 }
  0x99   :  { %v7664_v52 = vpop.permute.xlu0 %379 }
  0x9a   :  { %9924 = vst [vmem:[#allocation22_spill] sm:$0xff] %v7664_v52 }
  0x9b   :  { %v7674_v59 = vpop.permute.xlu1 %385 }
  0x9c   :  { %9925 = vst [vmem:[#allocation23_spill] sm:$0xff] %v7674_v59 }
  0x9d   :  { %v7681_v63 = vpop.permute.xlu0 %383 }
  0x9e   :  { %9926 = vst [vmem:[#allocation24_spill] sm:$0xff] %v7681_v63 }
  0xe8   :  { %v5684_v47 = vpop.f32.mrb[0].mxu0 }
  0xe9   :  { %v7660_v48 = vadd.f32 %v5684_v47, %v4964_v46  ;;  %v185_v49 = vpop.f32.mrb[1].mxu0 }
  0xea   :  { %v186_v50 = vadd.f32 %v4964_v46, %v185_v49 }
  0xec   :  { %v5687_v53 = vpop.f32.mrb[2].mxu0  ;;  %5731 = vmatprep.mubr.msk.f32.mxu0 %vm106_vm0, %v186_v50 }
  0xed   :  { %v7667_v54 = vadd.f32 %v5687_v53, %v4964_v46  ;;  %v195_v55 = vpop.f32.mrb[3].mxu0  ;;  %v301_v53 = vld [vmem:[%s9832_s13 + $0x50] sm:$0xff] }
  0xee   :  { %v7669_v56 = vadd.f32 %v4964_v46, %v195_v55  ;;  %v300_v46 = vld [vmem:[%s9832_s13 + $0x48] sm:$0xff]  ;;  %v302_v55 = vld [vmem:[%s9832_s13 + $0x58] sm:$0xff] }
  0xf0   :  { %v5698_v58 = vpop.f32.mrb[4].mxu0 }
  0xf1   :  { %v7679_v61 = vadd.f32 %v5698_v58, %v4969_v57  ;;  %v282_v62 = vpop.f32.mrb[5].mxu0 }
  0xf2   :  { %v7686_v1 = vadd.f32 %v4969_v57, %v282_v62 }
  0xf3   :  { %v7696_v4 = vmul.f32 %v7674_v59, %v7679_v61  ;;  %v410_v6 = vmul.f32 %v7645_v40, %v7679_v61  ;;  %v404_v7 = vmul.f32 %v7639_v37, %v7679_v61  ;;  %v308_v8 = vmul.f32 %v292_v60, %v7679_v61  ;;  %v2026_v37 = vld [vmem:[%s9828_s9 + $0x80] sm:$0xff] }
  0xf4   :  { %v7705_v9 = vmul.f32 %v7681_v63, %v7686_v1  ;;  %v409_v10 = vmul.f32 %v7647_v41, %v7686_v1  ;;  %v403_v11 = vmul.f32 %v7635_v35, %v7686_v1  ;;  %v307_v12 = vmul.f32 %v291_v0, %v7686_v1  ;;  %v303_v0 = vld [vmem:[%s9832_s13 + $0x60] sm:$0xff] }
  0xf5   :  { %v309_v13 = vmul.f32 %v293_v2, %v7686_v1  ;;  %v310_v14 = vmul.f32 %v294_v3, %v7679_v61  ;;  %v413_v15 = vmul.f32 %v7655_v45, %v7686_v1  ;;  %v414_v18 = vmul.f32 %v7653_v44, %v7679_v61  ;;  %v304_v2 = vld [vmem:[%s9832_s13 + $0x68] sm:$0xff]  ;;  %v1168_v44 = vld [vmem:[%s9830_s11 + $0x70] sm:$0xff] }
  0xf6   :  { %v6828_v22 = vpack.i.bf16 %v410_v6, %v409_v10  ;;  %v6813_v23 = vpack.i.bf16 %v404_v7, %v403_v11  ;;  %v6198_v24 = vpack.c.bf16 %v308_v8, %v307_v12  ;;  %v405_v26 = vmul.f32 %v7633_v34, %v7686_v1  ;;  %v305_v10 = vld [vmem:[%s9832_s13 + $0x70] sm:$0xff]  ;;  %v306_v11 = vld [vmem:[%s9832_s13 + $0x78] sm:$0xff] }
  0xf7   :  { %v6204_v28 = vpack.c.bf16 %v310_v14, %v309_v13  ;;  %v6838_v29 = vpack.i.bf16 %v414_v18, %v413_v15  ;;  %v406_v30 = vmul.f32 %v7637_v36, %v7679_v61  ;;  %v407_v31 = vmul.f32 %v7643_v39, %v7686_v1  ;;  %v2011_v39 = vld [vmem:[%s9828_s9 + $0x8] sm:$0xff]  ;;  %v2010_v36 = vld [vmem:[%s9828_s9] sm:$0xff] }
  0xf8   :  { %6829 = vrot.lane.b32.xlu1 %v6828_v22, %s7378_s6  ;;  %6814 = vrot.lane.b32.xlu0 %v6813_v23, %s7378_s6  ;;  %v408_v47 = vmul.f32 %v7641_v38, %v7679_v61  ;;  %v311_v49 = vmul.f32 %v295_v19, %v7686_v1  ;;  %v312_v50 = vmul.f32 %v296_v20, %v7679_v61  ;;  %v2027_v38 = vld [vmem:[%s9828_s9 + $0x88] sm:$0xff] }
  0xf9   :  { %6200 = vmatprep.subr.msk.bf16.mxu0 %vm7726_vm1, %v6198_v24  ;;  %v6818_v57 = vpack.i.bf16 %v406_v30, %v405_v26  ;;  %v411_v58 = vmul.f32 %v7651_v43, %v7686_v1  ;;  %v412_v60 = vmul.f32 %v7649_v42, %v7679_v61  ;;  %v313_v62 = vmul.f32 %v297_v27, %v7686_v1 }
  0xfa   :  { %6203 = vmatpush3.bf16.xpose.msk.msra.mxu0 %vm7726_vm1, %v6198_v24  ;;  %v6823_v3 = vpack.i.bf16 %v408_v47, %v407_v31  ;;  %v6210_v6 = vpack.c.bf16 %v312_v50, %v311_v49  ;;  %v314_v7 = vmul.f32 %v298_v32, %v7679_v61  ;;  %v315_v8 = vmul.f32 %v299_v33, %v7686_v1 }
  0xfb   :  { %6206 = vmatprep.subr.msk.bf16.mxu0 %vm7726_vm1, %v6204_v28  ;;  %v6833_v12 = vpack.i.bf16 %v412_v60, %v411_v58  ;;  %v316_v13 = vmul.f32 %v300_v46, %v7679_v61  ;;  %v317_v14 = vmul.f32 %v301_v53, %v7686_v1  ;;  %v318_v15 = vmul.f32 %v302_v55, %v7679_v61 }
  0xfc   :  { %6839 = vrot.lane.b32.xlu1 %v6838_v29, %s7378_s6  ;;  %6819 = vrot.lane.b32.xlu0 %v6818_v57, %s7378_s6  ;;  %v6216_v18 = vpack.c.bf16 %v314_v7, %v313_v62  ;;  %v319_v19 = vmul.f32 %v303_v0, %v7686_v1  ;;  %v320_v20 = vmul.f32 %v304_v2, %v7679_v61 }
  0xfd   :  { %v6222_v22 = vpack.c.bf16 %v316_v13, %v315_v8  ;;  %v6228_v23 = vpack.c.bf16 %v318_v15, %v317_v14  ;;  %v321_v24 = vmul.f32 %v305_v10, %v7686_v1  ;;  %v322_v26 = vmul.f32 %v306_v11, %v7679_v61  ;;  %v419_v13 = vld [vmem:[%s9929_s29] sm:$0xff] }
  0xfe   :  { %v6234_v27 = vpack.c.bf16 %v320_v20, %v319_v19  ;;  %v7796_v30 = vmul.f32 %v7664_v52, %v7686_v1  ;;  %v7800_v29 = vmul.f32 %v7662_v51, %v7679_v61  ;;  %v6848_v31 = vpack.i.bf16 %v7696_v4, %v7705_v9  ;;  %v422_v20 = vld [vmem:[%s9929_s29 + $0x18] sm:$0xff] }
  0xff   :  { %v6240_v32 = vpack.c.bf16 %v322_v26, %v321_v24  ;;  %v421_v26 = vld [vmem:[%s9929_s29 + $0x10] sm:$0xff] }
 0x100   :  { %6824 = vrot.lane.b32.xlu0 %v6823_v3, %s7378_s6  ;;  %v6843_v33 = vpack.i.bf16 %v7800_v29, %v7796_v30 }
 0x102   :  { %6209 = vmatpush3.bf16.xpose.msk.msra.mxu0 %vm7726_vm1, %v6204_v28 }
 0x103   :  { %6212 = vmatprep.subr.msk.bf16.mxu0 %vm7726_vm1, %v6210_v6 }
 0x104   :  { %6834 = vrot.lane.b32.xlu0 %v6833_v12, %s7378_s6  ;;  %v420_v12 = vld [vmem:[%s9929_s29 + $0x8] sm:$0xff] }
 0x10a   :  { %6215 = vmatpush3.bf16.xpose.msk.msra.mxu0 %vm7726_vm1, %v6210_v6 }
 0x10b   :  { %6218 = vmatprep.subr.msk.bf16.mxu0 %vm7726_vm1, %v6216_v18 }
 0x112   :  { %6221 = vmatpush3.bf16.xpose.msk.msra.mxu0 %vm7726_vm1, %v6216_v18 }
 0x113   :  { %6224 = vmatprep.subr.msk.bf16.mxu0 %vm7726_vm1, %v6222_v22 }
 0x11a   :  { %6227 = vmatpush3.bf16.xpose.msk.msra.mxu0 %vm7726_vm1, %v6222_v22 }
 0x11b   :  { %6230 = vmatprep.subr.msk.bf16.mxu0 %vm7726_vm1, %v6228_v23 }
 0x122   :  { %6233 = vmatpush3.bf16.xpose.msk.msra.mxu0 %vm7726_vm1, %v6228_v23 }
 0x123   :  { %6236 = vmatprep.subr.msk.bf16.mxu0 %vm7726_vm1, %v6234_v27 }
 0x12a   :  { %6239 = vmatpush3.bf16.xpose.msk.msra.mxu0 %vm7726_vm1, %v6234_v27 }
 0x12b   :  { %6242 = vmatprep.subr.msk.bf16.mxu0 %vm7726_vm1, %v6240_v32 }
 0x132   :  { %6245 = vmatpush3.bf16.xpose.msk.msra.mxu0 %vm7726_vm1, %v6240_v32 }
 0x139   :  { %5732 = vmatmul.mubr.msk.f32.vlgmr.msra.gmra.mrb[6].mxu0 %vm106_vm0, %v7660_v48 }
 0x13a   :  { %5734 = vmatprep.mubr.msk.f32.mxu0 %vm106_vm0, %v7669_v56 }
 0x13d   :  { %5735 = vmatmul.mubr.msk.f32.gmra.mrb[8].mxu0 %vm106_vm0, %v7667_v54 }
 0x16a   :  { %v6815_v61 = vpop.permute.xlu0 %6814  ;;  %v6830_v53 = vpop.permute.xlu1 %6829 }
 0x16b   :  { %v6817_v1 = vunpack.i.h.bf16 %v6815_v61  ;;  %v6816_v28 = vunpack.i.l.bf16 %v6815_v61  ;;  %v6832_v58 = vunpack.i.h.bf16 %v6830_v53  ;;  %v6831_v48 = vunpack.i.l.bf16 %v6830_v53 }
 0x16d   :  { %v6246_v46 = vpack.c.bf16 %v6817_v1, %v6816_v28  ;;  %v6258_v3 = vpack.c.bf16 %v6832_v58, %v6831_v48 }
 0x16e   :  { %v6820_v47 = vpop.permute.xlu0 %6819  ;;  %v6840_v6 = vpop.permute.xlu1 %6839 }
 0x16f   :  { %v6822_v49 = vunpack.i.h.bf16 %v6820_v47  ;;  %v6821_v50 = vunpack.i.l.bf16 %v6820_v47  ;;  %6247 = vmatprep.subr.bf16.mxu1 %v6246_v46  ;;  %v6842_v7 = vunpack.i.h.bf16 %v6840_v6  ;;  %v6841_v8 = vunpack.i.l.bf16 %v6840_v6 }
 0x170   :  { %6249 = vmatpush3.bf16.msra.mxu1 %v6246_v46 }
 0x171   :  { %v6250_v55 = vpack.c.bf16 %v6822_v49, %v6821_v50  ;;  %v6266_v11 = vpack.c.bf16 %v6842_v7, %v6841_v8 }
 0x172   :  { %v6825_v57 = vpop.permute.xlu0 %6824 }
 0x173   :  { %v6827_v60 = vunpack.i.h.bf16 %v6825_v57  ;;  %v6826_v62 = vunpack.i.l.bf16 %v6825_v57  ;;  %6251 = vmatprep.subr.bf16.mxu1 %v6250_v55 }
 0x174   :  { %6253 = vmatpush3.bf16.msra.mxu1 %v6250_v55 }
 0x175   :  { %v6254_v56 = vpack.c.bf16 %v6827_v60, %v6826_v62 }
 0x176   :  { %v6835_v54 = vpop.permute.xlu0 %6834 }
 0x177   :  { %v6837_v0 = vunpack.i.h.bf16 %v6835_v54  ;;  %v6836_v2 = vunpack.i.l.bf16 %v6835_v54  ;;  %6255 = vmatprep.subr.bf16.mxu1 %v6254_v56 }
 0x178   :  { %6257 = vmatpush3.bf16.msra.mxu1 %v6254_v56 }
 0x179   :  { %6259 = vmatprep.subr.bf16.mxu1 %v6258_v3  ;;  %v6262_v10 = vpack.c.bf16 %v6837_v0, %v6836_v2  ;;  %v92_v2 = vld [vmem:[%s9836_s17] sm:$0xff] }
 0x17c   :  { %6261 = vmatpush3.bf16.msra.mxu1 %v6258_v3  ;;  %v93_v3 = vld [vmem:[%s9836_s17 + $0x8] sm:$0xff] }
 0x17d   :  { %6263 = vmatprep.subr.bf16.mxu1 %v6262_v10  ;;  %v6278_v6 = vpack.c.bf16 %v93_v3, %v92_v2 }
 0x180   :  { %6265 = vmatpush3.bf16.msra.mxu1 %v6262_v10 }
 0x181   :  { %6267 = vmatprep.subr.bf16.mxu1 %v6266_v11 }
 0x184   :  { %6269 = vmatpush3.bf16.msra.mxu1 %v6266_v11  ;;  %v94_v11 = vld [vmem:[%s9836_s17 + $0x10] sm:$0xff] }
 0x20c   :  { %v5733_v14 = vpop.f32.mrb[6].mxu0 }
 0x20d   :  { %v555_v15 = vadd.f32 %v5733_v14, %v420_v12  ;;  %v549_v18 = vpop.f32.mrb[7].mxu0  ;;  %v95_v12 = vld [vmem:[%s9836_s17 + $0x18] sm:$0xff] }
 0x20e   :  { %v550_v19 = vadd.f32 %v549_v18, %v419_v13  ;;  %v6282_v14 = vpack.c.bf16 %v95_v12, %v94_v11 }
 0x20f   :  { %570 = vmax.xlane.f32.xlu0 %v555_v15 }
 0x210   :  { %v5736_v22 = vpop.f32.mrb[8].mxu0  ;;  %568 = vmax.xlane.f32.xlu1 %v550_v19 }
 0x211   :  { %v565_v23 = vadd.f32 %v5736_v22, %v422_v20  ;;  %v559_v24 = vpop.f32.mrb[9].mxu0 }
 0x212   :  { %v560_v27 = vadd.f32 %v559_v24, %v421_v26 }
 0x214   :  { %574 = vmax.xlane.f32.xlu1 %v565_v23 }
 0x218   :  { %572 = vmax.xlane.f32.xlu1 %v560_v27 }
 0x225   :  { %6844 = vrot.lane.b32.xlu0 %v6843_v33, %s7378_s6 }
 0x229   :  { %6849 = vrot.lane.b32.xlu1 %v6848_v31, %s7378_s6 }
 0x29c   :  { %v571_v32 = vpop.xlane.xlu0 %570 }
 0x29d   :  { %v569_v61 = vpop.xlane.xlu1 %568  ;;  %v577_v28 = vsub.f32 %v555_v15, %v571_v32 }
 0x29e   :  { %v576_v1 = vsub.f32 %v550_v19, %v569_v61 }
 0x29f   :  { %v582_v55 = vmul.f32 1.442695, %v577_v28 }
 0x2a0   :  { %v580_v46 = vmul.f32 1.442695, %v576_v1  ;;  %v6845_v47 = vpop.permute.xlu0 %6844 }
 0x2a1   :  { %v6847_v49 = vunpack.i.h.bf16 %v6845_v47  ;;  %v6846_v50 = vunpack.i.l.bf16 %v6845_v47  ;;  %v575_v53 = vpop.xlane.xlu1 %574 }
 0x2a2   :  { %7133 = vpow2.f32 %v580_v46  ;;  %v579_v57 = vsub.f32 %v565_v23, %v575_v53 }
 0x2a3   :  { %v6270_v58 = vpack.c.bf16 %v6847_v49, %v6846_v50  ;;  %7135 = vpow2.f32 %v582_v55  ;;  %v4992_v50 = vld [vmem:[%s9839_s20] ss:$0 sm:$0xff] }
 0x2a4   :  { %v586_v4 = vmul.f32 1.442695, %v579_v57 }
 0x2a5   :  { %6271 = vmatprep.subr.bf16.mxu1 %v6270_v58  ;;  %v573_v30 = vpop.xlane.xlu1 %572 }
 0x2a6   :  { %v578_v29 = vsub.f32 %v560_v27, %v573_v30  ;;  %6273 = vmatpush3.bf16.msra.mxu1 %v6270_v58 }
 0x2a8   :  { %v584_v9 = vmul.f32 1.442695, %v578_v29 }
 0x2a9   :  { %v6850_v31 = vpop.permute.xlu1 %6849 }
 0x2aa   :  { %7137 = vpow2.f32 %v584_v9  ;;  %v6852_v33 = vunpack.i.h.bf16 %v6850_v31  ;;  %v6851_v48 = vunpack.i.l.bf16 %v6850_v31 }
 0x2ab   :  { %7139 = vpow2.f32 %v586_v4 }
 0x2ac   :  { %v7134_v60 = vpop.eup %7133  ;;  %v6274_v62 = vpack.c.bf16 %v6852_v33, %v6851_v48 }
 0x2ad   :  { %5769 = vmatprep.mubr.f32.mxu1 %v7134_v60  ;;  %v7136_v56 = vpop.eup %7135 }
 0x2ae   :  { %6275 = vmatprep.subr.bf16.mxu1 %v6274_v62 }
 0x2af   :  { %6277 = vmatpush3.bf16.msra.mxu1 %v6274_v62 }
 0x2b0   :  { %6279 = vmatprep.subr.bf16.mxu1 %v6278_v6 }
 0x2b2   :  { %5770 = vmatmul.mubr.f32.vlgmr.msra.gmra.mrb[0].mxu1 %v7136_v56 }
 0x2b3   :  { %6281 = vmatpush3.bf16.msra.mxu1 %v6278_v6 }
 0x2b4   :  { %v7138_v54 = vpop.eup %7137  ;;  %6283 = vmatprep.subr.bf16.mxu1 %v6282_v14 }
 0x2b5   :  { %v7140_v0 = vpop.eup %7139  ;;  %5772 = vmatprep.mubr.f32.mxu1 %v7138_v54 }
 0x2b6   :  { %5773 = vmatmul.mubr.f32.gmra.mrb[2].mxu1 %v7140_v0 }
 0x2b7   :  { %6285 = vmatpush3.bf16.msra.mxu1 %v6282_v14 }
 0x385   :  { %v5771_v7 = vpop.f32.mrb[0].mxu1 }
 0x386   :  { %v738_v8 = vmax.f32 %v5771_v7, 1e-30  ;;  %v718_v10 = vpop.f32.mrb[1].mxu1 }
 0x387   :  { %v737_v13 = vmax.f32 %v718_v10, 1e-30 }
 0x388   :  { %7141 = vrcp.f32 %v738_v8 }
 0x389   :  { %7143 = vrcp.f32 %v737_v13  ;;  %v5774_v15 = vpop.f32.mrb[2].mxu1 }
 0x38a   :  { %v740_v18 = vmax.f32 %v5774_v15, 1e-30  ;;  %v728_v19 = vpop.f32.mrb[3].mxu1 }
 0x38b   :  { %v739_v20 = vmax.f32 %v728_v19, 1e-30 }
 0x38c   :  { %7145 = vrcp.f32 %v740_v18 }
 0x38d   :  { %7147 = vrcp.f32 %v739_v20 }
 0x392   :  { %v7142_v22 = vpop.eup %7141 }
 0x393   :  { %v7144_v23 = vpop.eup %7143  ;;  %751 = vrot.lane.b32.xlu1 %v7142_v22, %s7378_s6 }
 0x394   :  { %749 = vrot.lane.b32.xlu0 %v7144_v23, %s7378_s6 }
 0x396   :  { %v7146_v24 = vpop.eup %7145 }
 0x397   :  { %v7148_v26 = vpop.eup %7147  ;;  %755 = vrot.lane.b32.xlu1 %v7146_v24, %s7378_s6  ;;  %v4997_v24 = vld [vmem:[%s9834_s15 + $0x20] sm:$0xff] }
 0x398   :  { %753 = vrot.lane.b32.xlu0 %v7148_v26, %s7378_s6  ;;  %v4998_v26 = vld [vmem:[%s9834_s15 + $0x28] sm:$0xff] }
 0x405   :  { %v752_v27 = vpop.permute.xlu1 %751 }
 0x406   :  { %v750_v32 = vpop.permute.xlu0 %749  ;;  %v762_v1 = vmul.f32 %v5771_v7, %v752_v27  ;;  %v4999_v27 = vld [vmem:[%s9834_s15 + $0x30] sm:$0xff] }
 0x407   :  { %v761_v61 = vmul.f32 %v750_v32, %v718_v10  ;;  %v6286_v32 = vpack.c.bf16 %v4998_v26, %v4997_v24 }
 0x409   :  { %5783 = vmatprep.mubr.msk.f32.mxu1 %vm106_vm0, %v761_v61  ;;  %v756_v28 = vpop.permute.xlu1 %755  ;;  %v5000_v61 = vld [vmem:[%s9834_s15 + $0x38] sm:$0xff]  ;;  %6287 = vmatprep.subr.bf16.mxu1 %v6286_v32 }
 0x40a   :  { %5784 = vmatmul.mubr.msk.f32.vlgmr.msra.gmra.mrb[4].mxu1 %vm106_vm0, %v762_v1  ;;  %v754_v46 = vpop.permute.xlu0 %753  ;;  %v764_v49 = vmul.f32 %v5774_v15, %v756_v28  ;;  %v6290_v1 = vpack.c.bf16 %v5000_v61, %v4999_v27  ;;  %v5001_v28 = vld [vmem:[%s9835_s16 + $0x20] sm:$0xff] }
 0x40b   :  { %v763_v47 = vmul.f32 %v754_v46, %v728_v19  ;;  %6289 = vmatpush3.bf16.msra.mxu1 %v6286_v32  ;;  %v5002_v46 = vld [vmem:[%s9835_s16 + $0x28] sm:$0xff] }
 0x40c   :  { %6291 = vmatprep.subr.bf16.mxu1 %v6290_v1 }
 0x40d   :  { %5786 = vmatprep.mubr.msk.f32.mxu1 %vm106_vm0, %v763_v47  ;;  %v7929_v47 = vpack.c.bf16 %v5002_v46, %v5001_v28  ;;  %v5003_v46 = vld [vmem:[%s9835_s16 + $0x30] sm:$0xff] }
 0x40e   :  { %5787 = vmatmul.mubr.msk.f32.gmra.mrb[6].mxu1 %vm106_vm0, %v764_v49  ;;  %v1186_v49 = vld [vmem:[%s9831_s12] sm:$0xff] }
 0x40f   :  { %6293 = vmatpush3.bf16.msra.mxu1 %v6290_v1 }
 0x410   :  { %6295 = vmatprep.subr.bf16.mxu1 %v7929_v47 }
 0x4dd   :  { %v5785_v53 = vpop.f32.mrb[4].mxu1 }
 0x4de   :  { %v855_v55 = vadd.f32 %v5785_v53, %v4992_v50  ;;  %v849_v57 = vpop.f32.mrb[5].mxu1  ;;  %v1188_v53 = vld [vmem:[%s9831_s12 + $0x10] sm:$0xff] }
 0x4df   :  { %v850_v58 = vadd.f32 %v4992_v50, %v849_v57  ;;  %v1189_v57 = vld [vmem:[%s9831_s12 + $0x18] sm:$0xff] }
 0x4e0   :  { %v869_v30 = vadd.f32 %v855_v55, %v7557_v16  ;;  %v1190_v55 = vld [vmem:[%s9831_s12 + $0x20] sm:$0xff] }
 0x4e1   :  { %v5788_v29 = vpop.f32.mrb[6].mxu1  ;;  %v868_v4 = vadd.f32 %v850_v58, %v7524_v5  ;;  %v1192_v58 = vld [vmem:[%s9831_s12 + $0x30] sm:$0xff] }
 0x4e2   :  { %v859_v9 = vpop.f32.mrb[7].mxu1  ;;  %v875_v31 = vsel %vm106_vm0, %v869_v30, 0.0  ;;  %v865_v33 = vadd.f32 %v5788_v29, %v4992_v50  ;;  %v1194_v29 = vld [vmem:[%s9831_s12 + $0x40] sm:$0xff] }
 0x4e3   :  { %v860_v48 = vadd.f32 %v4992_v50, %v859_v9  ;;  %876 = vadd.xlane.f32.xlu1 %v875_v31  ;;  %v872_v60 = vsel %vm106_vm0, %v868_v4, 0.0  ;;  %v1187_v50 = vld [vmem:[%s9831_s12 + $0x8] sm:$0xff]  ;;  %v1196_v9 = vld [vmem:[%s9831_s12 + $0x50] sm:$0xff] }
 0x4e4   :  { %873 = vadd.xlane.f32.xlu0 %v872_v60  ;;  %v871_v54 = vadd.f32 %v865_v33, %v7579_v21  ;;  %v1195_v31 = vld [vmem:[%s9831_s12 + $0x48] sm:$0xff]  ;;  %v1198_v33 = vld [vmem:[%s9831_s12 + $0x60] sm:$0xff]  ;;  %v1200_v60 = vld [vmem:[%s9831_s12 + $0x70] sm:$0xff] }
 0x4e5   :  { %v870_v62 = vadd.f32 %v860_v48, %v7562_v17  ;;  %v1197_v48 = vld [vmem:[%s9831_s12 + $0x58] sm:$0xff] }
 0x4e6   :  { %v881_v16 = vsel %vm106_vm0, %v871_v54, 0.0 }
 0x4e7   :  { %v878_v56 = vsel %vm106_vm0, %v870_v62, 0.0 }
 0x4e8   :  { %879 = vadd.xlane.f32.xlu0 %v878_v56  ;;  %v1201_v56 = vld [vmem:[%s9831_s12 + $0x78] sm:$0xff] }
 0x4ec   :  { %882 = vadd.xlane.f32.xlu0 %v881_v16 }
 0x570   :  { %v877_v5 = vpop.xlane.xlu1 %876 }
 0x571   :  { %v886_v0 = vmul.f32 0.03125, %v877_v5  ;;  %v874_v2 = vpop.xlane.xlu0 %873 }
 0x572   :  { %v885_v3 = vmul.f32 0.03125, %v874_v2 }
 0x573   :  { %v7891_v6 = vsub.f32 %v869_v30, %v886_v0  ;;  %v1191_v30 = vld [vmem:[%s9831_s12 + $0x28] sm:$0xff]  ;;  %v925_v0 = vlaneseq }
 0x574   :  { %v7893_v7 = vsub.f32 %v868_v4, %v885_v3  ;;  %v1193_v4 = vld [vmem:[%s9831_s12 + $0x38] sm:$0xff] }
 0x575   :  { %v880_v8 = vpop.xlane.xlu0 %879  ;;  %v894_v17 = vmul.f32 %v7891_v6, %v7891_v6 }
 0x576   :  { %v887_v10 = vmul.f32 0.03125, %v880_v8  ;;  %v893_v21 = vmul.f32 %v7893_v7, %v7893_v7 }
 0x577   :  { %v900_v11 = vsel %vm106_vm0, %v894_v17, 0.0 }
 0x578   :  { %v7900_v12 = vsub.f32 %v870_v62, %v887_v10  ;;  %901 = vadd.xlane.f32.xlu0 %v900_v11  ;;  %v897_v13 = vsel %vm106_vm0, %v893_v21, 0.0  ;;  %v1199_v62 = vld [vmem:[%s9831_s12 + $0x68] sm:$0xff]  ;;  %v926_v10 = vshrl.u32 %v925_v0, 7  ;;  %v5013_v0 = vld [vmem:[%s9837_s18 + $0x1] ss:$0 sm:$0xff] }
 0x579   :  { %898 = vadd.xlane.f32.xlu1 %v897_v13  ;;  %v883_v14 = vpop.xlane.xlu0 %882 }
 0x57a   :  { %v888_v15 = vmul.f32 0.03125, %v883_v14  ;;  %v895_v18 = vmul.f32 %v7900_v12, %v7900_v12  ;;  %v7996_v14 = vsub.s32 0, %v926_v10 }
 0x57c   :  { %v7905_v19 = vsub.f32 %v871_v54, %v888_v15  ;;  %v903_v20 = vsel %vm106_vm0, %v895_v18, 0.0  ;;  %v99_v18 = vld [vmem:[%s9840_s21] sm:$0x3] }
 0x57d   :  { %904 = vadd.xlane.f32.xlu1 %v903_v20 }
 0x57e   :  { %v896_v22 = vmul.f32 %v7905_v19, %v7905_v19 }
 0x580   :  { %v906_v23 = vsel %vm106_vm0, %v896_v22, 0.0  ;;  %v8001_v22 = vsub.s32 1, %v926_v10 }
 0x581   :  { %907 = vadd.xlane.f32.xlu0 %v906_v23  ;;  %v928_v23 = vrot.slane %v99_v18, %v7996_v14 }
 0x582   :  { %v936_v61 = vrot.slane %v99_v18, %v8001_v22 }
 0x58e   :  { %1218 = vrot.lane.b32.xlu1 %v1186_v49, %s7377_s27  ;;  %v5004_v49 = vld [vmem:[%s9835_s16 + $0x38] sm:$0xff] }
 0x592   :  { %1222 = vrot.lane.b32.xlu1 %v1188_v53, %s7377_s27 }
 0x596   :  { %1224 = vrot.lane.b32.xlu1 %v1189_v57, %s7377_s27 }
 0x597   :  { %1220 = vrot.lane.b32.xlu0 %v1187_v50, %s7377_s27 }
 0x59a   :  { %1228 = vrot.lane.b32.xlu1 %v1191_v30, %s7377_s27 }
 0x59b   :  { %1226 = vrot.lane.b32.xlu0 %v1190_v55, %s7377_s27 }
 0x59e   :  { %1232 = vrot.lane.b32.xlu1 %v1193_v4, %s7377_s27 }
 0x59f   :  { %1230 = vrot.lane.b32.xlu0 %v1192_v58, %s7377_s27 }
 0x5a2   :  { %1236 = vrot.lane.b32.xlu1 %v1195_v31, %s7377_s27 }
 0x5a3   :  { %1234 = vrot.lane.b32.xlu0 %v1194_v29, %s7377_s27 }
 0x5a6   :  { %1240 = vrot.lane.b32.xlu1 %v1197_v48, %s7377_s27 }
 0x5a7   :  { %1238 = vrot.lane.b32.xlu0 %v1196_v9, %s7377_s27  ;;  %v80_v9 = vld [vmem:[%s9930_s7] sm:$0xff] }
 0x5aa   :  { %1244 = vrot.lane.b32.xlu1 %v1199_v62, %s7377_s27 }
 0x5ab   :  { %1242 = vrot.lane.b32.xlu0 %v1198_v33, %s7377_s27 }
 0x5ae   :  { %1248 = vrot.lane.b32.xlu1 %v1201_v56, %s7377_s27 }
 0x5af   :  { %1246 = vrot.lane.b32.xlu0 %v1200_v60, %s7377_s27 }
 0x605   :  { %v902_v54 = vpop.xlane.xlu0 %901 }
 0x606   :  { %v910_v16 = vmul.f32 0.03125, %v902_v54  ;;  %v899_v5 = vpop.xlane.xlu1 %898 }
 0x607   :  { %v909_v2 = vmul.f32 0.03125, %v899_v5 }
 0x608   :  { %v914_v3 = vadd.f32 1e-05, %v910_v16 }
 0x609   :  { %v913_v8 = vadd.f32 1e-05, %v909_v2 }
 0x60a   :  { %7149 = vrsqrt.f32 %v914_v3  ;;  %v905_v17 = vpop.xlane.xlu1 %904 }
 0x60b   :  { %7151 = vrsqrt.f32 %v913_v8  ;;  %v911_v21 = vmul.f32 0.03125, %v905_v17 }
 0x60d   :  { %v915_v11 = vadd.f32 1e-05, %v911_v21 }
 0x60e   :  { %v908_v13 = vpop.xlane.xlu0 %907 }
 0x60f   :  { %7153 = vrsqrt.f32 %v915_v11  ;;  %v912_v15 = vmul.f32 0.03125, %v908_v13 }
 0x611   :  { %v916_v20 = vadd.f32 1e-05, %v912_v15 }
 0x612   :  { %v8046_v48 = vpop.permute.xlu0 %1220 }
 0x613   :  { %7155 = vrsqrt.f32 %v916_v20 }
 0x614   :  { %v7150_v24 = vpop.eup %7149 }
 0x615   :  { %v7152_v26 = vpop.eup %7151  ;;  %v922_v27 = vmul.f32 %v7150_v24, %v7891_v6  ;;  %v5018_v24 = vld [vmem:[%s9838_s19 + $0x1] ss:$0 sm:$0xff] }
 0x616   :  { %v921_v32 = vmul.f32 %v7152_v26, %v7893_v7  ;;  %v6298_v7 = vpack.c.bf16 %v5004_v49, %v5003_v46  ;;  %v8050_v62 = vpop.permute.xlu0 %1226  ;;  %v1154_v49 = vld [vmem:[%s9830_s11] sm:$0xff] }
 0x617   :  { %v930_v1 = vmul.f32 %v928_v23, %v922_v27 }
 0x618   :  { %v929_v28 = vmul.f32 %v928_v23, %v921_v32  ;;  %v1155_v32 = vld [vmem:[%s9830_s11 + $0x8] sm:$0xff] }
 0x619   :  { %v7154_v50 = vpop.eup %7153  ;;  %v8016_v6 = vadd.f32 %v936_v61, %v930_v1 }
 0x61a   :  { %v8013_v53 = vadd.f32 %v936_v61, %v929_v28  ;;  %v923_v55 = vmul.f32 %v7154_v50, %v7900_v12  ;;  %v8054_v54 = vpop.permute.xlu0 %1230  ;;  %v1156_v50 = vld [vmem:[%s9830_s11 + $0x10] sm:$0xff] }
 0x61b   :  { %9932 = vst [vmem:[#allocation26_spill] sm:$0xff] %v8054_v54 }
 0x61c   :  { %5797 = vmatprep.mubr.msk.f32.mxu1 %vm106_vm0, %v8013_v53  ;;  %v931_v57 = vmul.f32 %v928_v23, %v923_v55 }
 0x61d   :  { %v7156_v58 = vpop.eup %7155  ;;  %5798 = vmatmul.mubr.msk.f32.vlgmr.msra.gmra.mrb[8].mxu1 %vm106_vm0, %v8016_v6 }
 0x61e   :  { %v8022_v30 = vadd.f32 %v936_v61, %v931_v57  ;;  %6297 = vmatpush3.bf16.msra.mxu1 %v7929_v47  ;;  %v924_v29 = vmul.f32 %v7156_v58, %v7905_v19  ;;  %v81_v19 = vld [vmem:[%s9930_s7 + $0x8] sm:$0xff]  ;;  %v8040_v47 = vpop.permute.xlu1 %1218  ;;  %v8058_v5 = vpop.permute.xlu0 %1234 }
 0x61f   :  { %6299 = vmatprep.subr.bf16.mxu1 %v6298_v7  ;;  %9934 = vst [vmem:[#allocation28_spill] sm:$0xff] %v8058_v5  ;;  %v1159_v57 = vld [vmem:[%s9830_s11 + $0x28] sm:$0xff] }
 0x620   :  { %5800 = vmatprep.mubr.msk.f32.mxu1 %vm106_vm0, %v8022_v30  ;;  %v932_v12 = vmul.f32 %v928_v23, %v924_v29 }
 0x622   :  { %v8028_v4 = vadd.f32 %v936_v61, %v932_v12  ;;  %6301 = vmatpush3.bf16.msra.mxu1 %v6298_v7  ;;  %v8042_v31 = vpop.permute.xlu1 %1222  ;;  %v8065_v8 = vpop.permute.xlu0 %1238  ;;  %v1157_v61 = vld [vmem:[%s9830_s11 + $0x18] sm:$0xff]  ;;  %v1158_v7 = vld [vmem:[%s9830_s11 + $0x20] sm:$0xff] }
 0x623   :  { %9936 = vst [vmem:[#allocation30_spill] sm:$0xff] %v8065_v8 }
 0x624   :  { %5801 = vmatmul.mubr.msk.f32.gmra.mrb[10].mxu1 %vm106_vm0, %v8028_v4 }
 0x625   :  { %5811 = vmatprep.mubr.msk.f32.mxu1 %vm106_vm0, %v80_v9 }
 0x626   :  { %v8044_v33 = vpop.permute.xlu1 %1224  ;;  %v8072_v13 = vpop.permute.xlu0 %1242 }
 0x627   :  { %9938 = vst [vmem:[#allocation32_spill] sm:$0xff] %v8072_v13 }
 0x628   :  { %5812 = vmatmul.mubr.msk.f32.vlgmr.msra.gmra.mrb[12].mxu1 %vm106_vm0, %v81_v19  ;;  %v1160_v19 = vld [vmem:[%s9830_s11 + $0x30] sm:$0xff] }
 0x62a   :  { %v8048_v60 = vpop.permute.xlu1 %1228  ;;  %v8091_v46 = vpop.permute.xlu0 %1246 }
 0x62b   :  { %9940 = vst [vmem:[#allocation34_spill] sm:$0xff] %v8091_v46 }
 0x62e   :  { %v8052_v56 = vpop.permute.xlu1 %1232 }
 0x62f   :  { %9931 = vst [vmem:[#allocation25_spill] sm:$0xff] %v8052_v56 }
 0x632   :  { %v8056_v16 = vpop.permute.xlu1 %1236 }
 0x633   :  { %9933 = vst [vmem:[#allocation27_spill] sm:$0xff] %v8056_v16 }
 0x636   :  { %v8063_v2 = vpop.permute.xlu1 %1240 }
 0x637   :  { %9935 = vst [vmem:[#allocation29_spill] sm:$0xff] %v8063_v2 }
 0x63a   :  { %v8070_v11 = vpop.permute.xlu1 %1244 }
 0x63b   :  { %9937 = vst [vmem:[#allocation31_spill] sm:$0xff] %v8070_v11 }
 0x63e   :  { %v8081_v27 = vpop.permute.xlu1 %1248 }
 0x63f   :  { %9939 = vst [vmem:[#allocation33_spill] sm:$0xff] %v8081_v27 }
 0x6f0   :  { %v5799_v3 = vpop.f32.mrb[8].mxu1 }
 0x6f1   :  { %v8067_v17 = vadd.f32 %v5799_v3, %v5013_v0  ;;  %v1048_v10 = vpop.f32.mrb[9].mxu1 }
 0x6f2   :  { %v1049_v21 = vadd.f32 %v5013_v0, %v1048_v10 }
 0x6f4   :  { %5846 = vmatprep.mubr.msk.f32.mxu1 %vm106_vm0, %v1049_v21 }
 0x6f7   :  { %v5802_v15 = vpop.f32.mrb[10].mxu1 }
 0x6f8   :  { %v8074_v18 = vadd.f32 %v5802_v15, %v5013_v0  ;;  %v1058_v20 = vpop.f32.mrb[11].mxu1  ;;  %v1161_v15 = vld [vmem:[%s9830_s11 + $0x38] sm:$0xff] }
 0x6f9   :  { %v8076_v23 = vadd.f32 %v5013_v0, %v1058_v20  ;;  %v1162_v20 = vld [vmem:[%s9830_s11 + $0x40] sm:$0xff] }
 0x6fb   :  { %v5813_v26 = vpop.f32.mrb[12].mxu1 }
 0x6fc   :  { %v8089_v1 = vadd.f32 %v5813_v26, %v5018_v24  ;;  %v1145_v28 = vpop.f32.mrb[13].mxu1 }
 0x6fd   :  { %v1146_v55 = vadd.f32 %v5018_v24, %v1145_v28  ;;  %v1163_v28 = vld [vmem:[%s9830_s11 + $0x48] sm:$0xff] }
 0x6fe   :  { %v8107_v58 = vmul.f32 %v8081_v27, %v8089_v1  ;;  %v1171_v29 = vmul.f32 %v1155_v32, %v8089_v1  ;;  %v1267_v12 = vmul.f32 %v8046_v48, %v8089_v1  ;;  %v1173_v9 = vmul.f32 %v1157_v61, %v8089_v1 }
 0x6ff   :  { %v8117_v0 = vmul.f32 %v8091_v46, %v1146_v55  ;;  %v1170_v3 = vmul.f32 %v1154_v49, %v1146_v55  ;;  %v1266_v10 = vmul.f32 %v8040_v47, %v1146_v55  ;;  %v1172_v21 = vmul.f32 %v1156_v50, %v1146_v55  ;;  %v1164_v49 = vld [vmem:[%s9830_s11 + $0x50] sm:$0xff]  ;;  %v1165_v50 = vld [vmem:[%s9830_s11 + $0x58] sm:$0xff] }
 0x700   :  { %v1268_v24 = vmul.f32 %v8042_v31, %v1146_v55  ;;  %v1269_v26 = vmul.f32 %v8044_v33, %v8089_v1  ;;  %v1174_v32 = vmul.f32 %v1158_v7, %v1146_v55  ;;  %v1175_v61 = vmul.f32 %v1159_v57, %v8089_v1  ;;  %v1166_v7 = vld [vmem:[%s9830_s11 + $0x60] sm:$0xff]  ;;  %v1167_v57 = vld [vmem:[%s9830_s11 + $0x68] sm:$0xff] }
 0x701   :  { %v6302_v59 = vpack.c.bf16 %v1171_v29, %v1170_v3  ;;  %v6853_v63 = vpack.i.bf16 %v1267_v12, %v1266_v10  ;;  %v6308_v51 = vpack.c.bf16 %v1173_v9, %v1172_v21  ;;  %v1176_v52 = vmul.f32 %v1160_v19, %v1146_v55  ;;  %v1169_v12 = vld [vmem:[%s9830_s11 + $0x78] sm:$0xff] }
 0x702   :  { %v6858_v45 = vpack.i.bf16 %v1269_v26, %v1268_v24  ;;  %v6314_v42 = vpack.c.bf16 %v1175_v61, %v1174_v32  ;;  %v1177_v43 = vmul.f32 %v1161_v15, %v8089_v1  ;;  %v1178_v29 = vmul.f32 %v1162_v20, %v1146_v55 }
 0x703   :  { %6304 = vmatprep.subr.msk.bf16.mxu1 %vm7726_vm1, %v6302_v59  ;;  %6854 = vrot.lane.b32.xlu0 %v6853_v63, %s7378_s6  ;;  %v1179_v9 = vmul.f32 %v1163_v28, %v8089_v1  ;;  %v1180_v19 = vmul.f32 %v1164_v49, %v1146_v55  ;;  %v1181_v3 = vmul.f32 %v1165_v50, %v8089_v1 }
 0x704   :  { %6307 = vmatpush3.bf16.xpose.msk.msra.mxu1 %vm7726_vm1, %v6302_v59  ;;  %v6320_v10 = vpack.c.bf16 %v1177_v43, %v1176_v52  ;;  %v1182_v21 = vmul.f32 %v1166_v7, %v1146_v55  ;;  %v1183_v15 = vmul.f32 %v1167_v57, %v8089_v1  ;;  %v1184_v20 = vmul.f32 %v1168_v44, %v1146_v55 }
 0x705   :  { %6310 = vmatprep.subr.msk.bf16.mxu1 %vm7726_vm1, %v6308_v51  ;;  %v6326_v24 = vpack.c.bf16 %v1179_v9, %v1178_v29  ;;  %v6332_v26 = vpack.c.bf16 %v1181_v3, %v1180_v19  ;;  %v1185_v63 = vmul.f32 %v1169_v12, %v8089_v1  ;;  %v1270_v32 = vmul.f32 %v8050_v62, %v1146_v55 }
 0x706   :  { %v6338_v61 = vpack.c.bf16 %v1183_v15, %v1182_v21  ;;  %v1271_v28 = vmul.f32 %v8048_v60, %v8089_v1  ;;  %v1272_v59 = vmul.f32 %v8054_v54, %v1146_v55  ;;  %v1273_v43 = vmul.f32 %v8052_v56, %v8089_v1  ;;  %v2013_v54 = vld [vmem:[%s9828_s9 + $0x18] sm:$0xff] }
 0x707   :  { %6859 = vrot.lane.b32.xlu0 %v6858_v45, %s7378_s6  ;;  %v6344_v44 = vpack.c.bf16 %v1185_v63, %v1184_v20  ;;  %v1274_v52 = vmul.f32 %v8058_v5, %v1146_v55  ;;  %v1275_v49 = vmul.f32 %v8056_v16, %v8089_v1  ;;  %v1276_v50 = vmul.f32 %v8065_v8, %v1146_v55 }
 0x708   :  { %v6863_v7 = vpack.i.bf16 %v1271_v28, %v1270_v32  ;;  %v6868_v57 = vpack.i.bf16 %v1273_v43, %v1272_v59  ;;  %v1277_v29 = vmul.f32 %v8063_v2, %v8089_v1  ;;  %v1278_v12 = vmul.f32 %v8072_v13, %v1146_v55  ;;  %v1284_v59 = vld [vmem:[%s9941_s25 + $0x10] sm:$0xff] }
 0x709   :  { %v6873_v9 = vpack.i.bf16 %v1275_v49, %v1274_v52  ;;  %v1279_v19 = vmul.f32 %v8070_v11, %v8089_v1  ;;  %v6888_v45 = vpack.i.bf16 %v8107_v58, %v8117_v0 }
 0x70a   :  { %v6878_v3 = vpack.i.bf16 %v1277_v29, %v1276_v50 }
 0x70b   :  { %v6883_v21 = vpack.i.bf16 %v1279_v19, %v1278_v12 }
 0x70c   :  { %6313 = vmatpush3.bf16.xpose.msk.msra.mxu1 %vm7726_vm1, %v6308_v51 }
 0x70d   :  { %6316 = vmatprep.subr.msk.bf16.mxu1 %vm7726_vm1, %v6314_v42 }
 0x714   :  { %6319 = vmatpush3.bf16.xpose.msk.msra.mxu1 %vm7726_vm1, %v6314_v42 }
 0x715   :  { %6322 = vmatprep.subr.msk.bf16.mxu1 %vm7726_vm1, %v6320_v10 }
 0x71c   :  { %6325 = vmatpush3.bf16.xpose.msk.msra.mxu1 %vm7726_vm1, %v6320_v10 }
 0x71d   :  { %6328 = vmatprep.subr.msk.bf16.mxu1 %vm7726_vm1, %v6326_v24 }
 0x724   :  { %6331 = vmatpush3.bf16.xpose.msk.msra.mxu1 %vm7726_vm1, %v6326_v24 }
 0x725   :  { %6334 = vmatprep.subr.msk.bf16.mxu1 %vm7726_vm1, %v6332_v26 }
 0x72c   :  { %6337 = vmatpush3.bf16.xpose.msk.msra.mxu1 %vm7726_vm1, %v6332_v26 }
 0x72d   :  { %6340 = vmatprep.subr.msk.bf16.mxu1 %vm7726_vm1, %v6338_v61 }
 0x734   :  { %6343 = vmatpush3.bf16.xpose.msk.msra.mxu1 %vm7726_vm1, %v6338_v61  ;;  %v1285_v61 = vld [vmem:[%s9941_s25 + $0x18] sm:$0xff] }
 0x735   :  { %6346 = vmatprep.subr.msk.bf16.mxu1 %vm7726_vm1, %v6344_v44 }
 0x73c   :  { %6349 = vmatpush3.bf16.xpose.msk.msra.mxu1 %vm7726_vm1, %v6344_v44 }
 0x743   :  { %5847 = vmatmul.mubr.msk.f32.vlgmr.msra.gmra.mrb[14].mxu1 %vm106_vm0, %v8067_v17  ;;  %v1283_v17 = vld [vmem:[%s9941_s25 + $0x8] sm:$0xff] }
 0x744   :  { %5849 = vmatprep.mubr.msk.f32.mxu1 %vm106_vm0, %v8076_v23 }
 0x747   :  { %5850 = vmatmul.mubr.msk.f32.gmra.mrb[16].mxu1 %vm106_vm0, %v8074_v18  ;;  %v1282_v18 = vld [vmem:[%s9941_s25] sm:$0xff] }
 0x775   :  { %v6855_v42 = vpop.permute.xlu0 %6854 }
 0x776   :  { %v6857_v51 = vunpack.i.h.bf16 %v6855_v42  ;;  %v6856_v1 = vunpack.i.l.bf16 %v6855_v42 }
 0x778   :  { %v6350_v55 = vpack.c.bf16 %v6857_v51, %v6856_v1 }
 0x779   :  { %v6860_v58 = vpop.permute.xlu0 %6859 }
 0x77a   :  { %v6862_v0 = vunpack.i.h.bf16 %v6860_v58  ;;  %v6861_v10 = vunpack.i.l.bf16 %v6860_v58  ;;  %6351 = vmatprep.subr.bf16.mxu0 %v6350_v55 }
 0x77b   :  { %6353 = vmatpush3.bf16.msra.mxu0 %v6350_v55 }
 0x77c   :  { %v6354_v15 = vpack.c.bf16 %v6862_v0, %v6861_v10 }
 0x77e   :  { %6355 = vmatprep.subr.bf16.mxu0 %v6354_v15 }
 0x77f   :  { %6357 = vmatpush3.bf16.msra.mxu0 %v6354_v15 }
 0x816   :  { %v5848_v23 = vpop.f32.mrb[14].mxu1 }
 0x817   :  { %v1418_v20 = vadd.f32 %v5848_v23, %v1283_v17  ;;  %v1412_v24 = vpop.f32.mrb[15].mxu1 }
 0x818   :  { %v1413_v26 = vadd.f32 %v1412_v24, %v1282_v18 }
 0x819   :  { %1433 = vmax.xlane.f32.xlu0 %v1418_v20 }
 0x81a   :  { %1431 = vmax.xlane.f32.xlu1 %v1413_v26  ;;  %v5851_v63 = vpop.f32.mrb[16].mxu1 }
 0x81b   :  { %v1422_v32 = vpop.f32.mrb[17].mxu1  ;;  %v1428_v28 = vadd.f32 %v5851_v63, %v1285_v61 }
 0x81c   :  { %v1423_v43 = vadd.f32 %v1422_v32, %v1284_v59 }
 0x82b   :  { %6864 = vrot.lane.b32.xlu1 %v6863_v7, %s7378_s6 }
 0x82f   :  { %6869 = vrot.lane.b32.xlu0 %v6868_v57, %s7378_s6 }
 0x833   :  { %6874 = vrot.lane.b32.xlu0 %v6873_v9, %s7378_s6 }
 0x837   :  { %6879 = vrot.lane.b32.xlu0 %v6878_v3, %s7378_s6 }
 0x83b   :  { %6884 = vrot.lane.b32.xlu0 %v6883_v21, %s7378_s6 }
 0x84f   :  { %1437 = vmax.xlane.f32.xlu1 %v1428_v28 }
 0x85a   :  { %1435 = vmax.xlane.f32.xlu0 %v1423_v43 }
 0x870   :  { %6889 = vrot.lane.b32.xlu0 %v6888_v45, %s7378_s6 }
 0x8a6   :  { %v1434_v44 = vpop.xlane.xlu0 %1433 }
 0x8a7   :  { %v1432_v52 = vpop.xlane.xlu1 %1431 }
 0x8a8   :  { %v1439_v49 = vsub.f32 %v1413_v26, %v1432_v52  ;;  %v1440_v26 = vsub.f32 %v1418_v20, %v1434_v44 }
 0x8aa   :  { %v1443_v50 = vmul.f32 1.442695, %v1439_v49  ;;  %v6870_v7 = vpop.permute.xlu0 %6869  ;;  %v1445_v32 = vmul.f32 1.442695, %v1440_v26 }
 0x8ab   :  { %v6872_v57 = vunpack.i.h.bf16 %v6870_v7  ;;  %v6865_v29 = vpop.permute.xlu1 %6864  ;;  %v6871_v12 = vunpack.i.l.bf16 %v6870_v7 }
 0x8ac   :  { %7157 = vpow2.f32 %v1443_v50  ;;  %v6867_v9 = vunpack.i.h.bf16 %v6865_v29  ;;  %v6866_v19 = vunpack.i.l.bf16 %v6865_v29 }
 0x8ad   :  { %v6362_v1 = vpack.c.bf16 %v6872_v57, %v6871_v12  ;;  %7159 = vpow2.f32 %v1445_v32 }
 0x8ae   :  { %v6875_v3 = vpop.permute.xlu0 %6874  ;;  %v6358_v21 = vpack.c.bf16 %v6867_v9, %v6866_v19 }
 0x8af   :  { %v6877_v42 = vunpack.i.h.bf16 %v6875_v3  ;;  %v6876_v51 = vunpack.i.l.bf16 %v6875_v3 }
 0x8b0   :  { %6359 = vmatprep.subr.bf16.mxu0 %v6358_v21 }
 0x8b1   :  { %6361 = vmatpush3.bf16.msra.mxu0 %v6358_v21  ;;  %v6366_v0 = vpack.c.bf16 %v6877_v42, %v6876_v51  ;;  %v5007_v51 = vld [vmem:[%s9836_s17 + $0x30] sm:$0xff] }
 0x8b2   :  { %v6880_v55 = vpop.permute.xlu0 %6879  ;;  %6363 = vmatprep.subr.bf16.mxu0 %v6362_v1 }
 0x8b3   :  { %v6882_v45 = vunpack.i.h.bf16 %v6880_v55  ;;  %v6881_v58 = vunpack.i.l.bf16 %v6880_v55 }
 0x8b5   :  { %6365 = vmatpush3.bf16.msra.mxu0 %v6362_v1  ;;  %v6370_v23 = vpack.c.bf16 %v6882_v45, %v6881_v58  ;;  %v5008_v1 = vld [vmem:[%s9836_s17 + $0x38] sm:$0xff] }
 0x8b6   :  { %v7158_v10 = vpop.eup %7157  ;;  %v6885_v15 = vpop.permute.xlu0 %6884  ;;  %6367 = vmatprep.subr.bf16.mxu0 %v6366_v0  ;;  %v6386_v55 = vpack.c.bf16 %v5008_v1, %v5007_v51 }
 0x8b7   :  { %5884 = vmatprep.mubr.f32.mxu0 %v7158_v10  ;;  %v6887_v17 = vunpack.i.h.bf16 %v6885_v15  ;;  %v6886_v18 = vunpack.i.l.bf16 %v6885_v15  ;;  %v7160_v9 = vpop.eup %7159 }
 0x8b9   :  { %6369 = vmatpush3.bf16.msra.mxu0 %v6366_v0  ;;  %v6374_v24 = vpack.c.bf16 %v6887_v17, %v6886_v18 }
 0x8ba   :  { %6371 = vmatprep.subr.bf16.mxu0 %v6370_v23 }
 0x8bd   :  { %6373 = vmatpush3.bf16.msra.mxu0 %v6370_v23 }
 0x8be   :  { %6375 = vmatprep.subr.bf16.mxu0 %v6374_v24 }
 0x8c1   :  { %6377 = vmatpush3.bf16.msra.mxu0 %v6374_v24 }
 0x8dc   :  { %v1438_v63 = vpop.xlane.xlu1 %1437 }
 0x8dd   :  { %v1442_v61 = vsub.f32 %v1428_v28, %v1438_v63  ;;  %v5005_v28 = vld [vmem:[%s9836_s17 + $0x20] sm:$0xff] }
 0x8df   :  { %v1449_v49 = vmul.f32 1.442695, %v1442_v61 }
 0x8e7   :  { %v1436_v59 = vpop.xlane.xlu0 %1435 }
 0x8e8   :  { %v1441_v52 = vsub.f32 %v1423_v43, %v1436_v59  ;;  %v5006_v43 = vld [vmem:[%s9836_s17 + $0x28] sm:$0xff] }
 0x8e9   :  { %v6382_v44 = vpack.c.bf16 %v5006_v43, %v5005_v28 }
 0x8ea   :  { %v1447_v50 = vmul.f32 1.442695, %v1441_v52 }
 0x8eb   :  { %v6890_v7 = vpop.permute.xlu0 %6889 }
 0x8ec   :  { %7161 = vpow2.f32 %v1447_v50  ;;  %v6892_v57 = vunpack.i.h.bf16 %v6890_v7  ;;  %v6891_v29 = vunpack.i.l.bf16 %v6890_v7  ;;  %v7237_v7 = vld [vmem:[%s9910_s4] sm:$0xff] }
 0x8ed   :  { %7163 = vpow2.f32 %v1449_v49 }
 0x8ee   :  { %v6378_v12 = vpack.c.bf16 %v6892_v57, %v6891_v29  ;;  %v5041_v57 = vld [vmem:[%s9839_s20 + $0x1] ss:$0 sm:$0xff] }
 0x8f0   :  { %6379 = vmatprep.subr.bf16.mxu0 %v6378_v12 }
 0x8f1   :  { %6381 = vmatpush3.bf16.msra.mxu0 %v6378_v12 }
 0x8f2   :  { %6383 = vmatprep.subr.bf16.mxu0 %v6382_v44 }
 0x8f4   :  { %5885 = vmatmul.mubr.f32.vlgmr.msra.gmra.mrb[10].mxu0 %v7160_v9 }
 0x8f5   :  { %6385 = vmatpush3.bf16.msra.mxu0 %v6382_v44 }
 0x8f6   :  { %v7162_v19 = vpop.eup %7161  ;;  %6387 = vmatprep.subr.bf16.mxu0 %v6386_v55 }
 0x8f7   :  { %v7164_v20 = vpop.eup %7163  ;;  %5887 = vmatprep.mubr.f32.mxu0 %v7162_v19 }
 0x8f8   :  { %5888 = vmatmul.mubr.f32.gmra.mrb[12].mxu0 %v7164_v20 }
 0x8f9   :  { %6389 = vmatpush3.bf16.msra.mxu0 %v6386_v55 }
 0x9c7   :  { %v5886_v3 = vpop.f32.mrb[10].mxu0 }
 0x9c8   :  { %v1581_v21 = vpop.f32.mrb[11].mxu0  ;;  %v1601_v45 = vmax.f32 %v5886_v3, 1e-30 }
 0x9c9   :  { %v1600_v42 = vmax.f32 %v1581_v21, 1e-30 }
 0x9cb   :  { %7165 = vrcp.f32 %v1600_v42  ;;  %v5889_v58 = vpop.f32.mrb[12].mxu0 }
 0x9cc   :  { %v1603_v0 = vmax.f32 %v5889_v58, 1e-30  ;;  %v1591_v10 = vpop.f32.mrb[13].mxu0 }
 0x9cd   :  { %v1602_v15 = vmax.f32 %v1591_v10, 1e-30 }
 0x9ce   :  { %7167 = vrcp.f32 %v1603_v0 }
 0x9cf   :  { %7169 = vrcp.f32 %v1601_v45 }
 0x9d0   :  { %7171 = vrcp.f32 %v1602_v15 }
 0x9d5   :  { %v7166_v17 = vpop.eup %7165 }
 0x9d6   :  { %1612 = vrot.lane.b32.xlu0 %v7166_v17, %s7378_s6 }
 0x9d8   :  { %v7168_v18 = vpop.eup %7167 }
 0x9d9   :  { %v7170_v23 = vpop.eup %7169  ;;  %1618 = vrot.lane.b32.xlu1 %v7168_v18, %s7378_s6 }
 0x9da   :  { %1614 = vrot.lane.b32.xlu0 %v7170_v23, %s7378_s6  ;;  %v7172_v24 = vpop.eup %7171 }
 0x9de   :  { %1616 = vrot.lane.b32.xlu0 %v7172_v24, %s7378_s6 }
 0xa48   :  { %v1613_v26 = vpop.permute.xlu0 %1612 }
 0xa49   :  { %v1624_v63 = vmul.f32 %v1613_v26, %v1581_v21 }
 0xa4b   :  { %5898 = vmatprep.mubr.msk.f32.mxu0 %vm106_vm0, %v1624_v63  ;;  %v1619_v59 = vpop.permute.xlu1 %1618 }
 0xa4c   :  { %v1615_v32 = vpop.permute.xlu0 %1614  ;;  %v1627_v50 = vmul.f32 %v5889_v58, %v1619_v59 }
 0xa4d   :  { %v1625_v61 = vmul.f32 %v5886_v3, %v1615_v32 }
 0xa4f   :  { %5899 = vmatmul.mubr.msk.f32.vlgmr.msra.gmra.mrb[14].mxu0 %vm106_vm0, %v1625_v61 }
 0xa50   :  { %v1617_v52 = vpop.permute.xlu0 %1616 }
 0xa51   :  { %v1626_v49 = vmul.f32 %v1617_v52, %v1591_v10 }
 0xa53   :  { %5901 = vmatprep.mubr.msk.f32.mxu0 %vm106_vm0, %v1626_v49 }
 0xa54   :  { %5902 = vmatmul.mubr.msk.f32.gmra.mrb[16].mxu0 %vm106_vm0, %v1627_v50 }
 0xa55   :  { %5912 = vmatprep.mubr.msk.f32.mxu0 %vm106_vm0, %v7237_v7 }
 0xb22   :  { %v5900_v29 = vpop.f32.mrb[14].mxu0 }
 0xb23   :  { %v1718_v12 = vadd.f32 %v5900_v29, %v5041_v57  ;;  %v1712_v9 = vpop.f32.mrb[15].mxu0  ;;  %v5047_v29 = vld [vmem:[%s9834_s15 + $0x48] sm:$0xff] }
 0xb24   :  { %v1713_v19 = vadd.f32 %v5041_v57, %v1712_v9  ;;  %v5048_v9 = vld [vmem:[%s9834_s15 + $0x50] sm:$0xff] }
 0xb25   :  { %v1732_v20 = vadd.f32 %v1718_v12, %v8016_v6 }
 0xb26   :  { %v1731_v28 = vadd.f32 %v1713_v19, %v8013_v53  ;;  %v5049_v19 = vld [vmem:[%s9834_s15 + $0x58] sm:$0xff] }
 0xb27   :  { %v5903_v43 = vpop.f32.mrb[16].mxu0  ;;  %v1738_v44 = vsel %vm106_vm0, %v1732_v20, 0.0 }
 0xb28   :  { %1739 = vadd.xlane.f32.xlu1 %v1738_v44  ;;  %v1722_v3 = vpop.f32.mrb[17].mxu0  ;;  %v1735_v21 = vsel %vm106_vm0, %v1731_v28, 0.0  ;;  %v1728_v42 = vadd.f32 %v5903_v43, %v5041_v57  ;;  %v5051_v43 = vld [vmem:[%s9835_s16 + $0x48] sm:$0xff] }
 0xb29   :  { %v1723_v51 = vadd.f32 %v5041_v57, %v1722_v3  ;;  %1736 = vadd.xlane.f32.xlu0 %v1735_v21  ;;  %v5046_v57 = vld [vmem:[%s9834_s15 + $0x40] sm:$0xff]  ;;  %v5052_v3 = vld [vmem:[%s9835_s16 + $0x50] sm:$0xff]  ;;  %v5053_v21 = vld [vmem:[%s9835_s16 + $0x58] sm:$0xff] }
 0xb2a   :  { %v1734_v45 = vadd.f32 %v1728_v42, %v8028_v4  ;;  %v6390_v12 = vpack.c.bf16 %v5047_v29, %v5046_v57  ;;  %v6402_v42 = vpack.c.bf16 %v5053_v21, %v5052_v3  ;;  %v2101_v57 = vld [vmem:[%s9829_s10 + $0xd8] sm:$0xff]  ;;  %v2100_v29 = vld [vmem:[%s9829_s10 + $0xd0] sm:$0xff] }
 0xb2b   :  { %v1733_v1 = vadd.f32 %v1723_v51, %v8022_v30  ;;  %v8313_v51 = vld [vmem:[%s9910_s4 + $0x8] sm:$0xff]  ;;  %v2104_v3 = vld [vmem:[%s9829_s10 + $0xf0] sm:$0xff]  ;;  %v2089_v21 = vld [vmem:[%s9829_s10 + $0x78] sm:$0xff] }
 0xb2c   :  { %v1744_v6 = vsel %vm106_vm0, %v1734_v45, 0.0  ;;  %6391 = vmatprep.subr.bf16.mxu0 %v6390_v12 }
 0xb2d   :  { %v1741_v55 = vsel %vm106_vm0, %v1733_v1, 0.0  ;;  %6393 = vmatpush3.bf16.msra.mxu0 %v6390_v12  ;;  %v2085_v12 = vld [vmem:[%s9829_s10 + $0x58] sm:$0xff] }
 0xb2e   :  { %1742 = vadd.xlane.f32.xlu0 %v1741_v55  ;;  %v2091_v55 = vld [vmem:[%s9829_s10 + $0x88] sm:$0xff] }
 0xb32   :  { %1745 = vadd.xlane.f32.xlu0 %v1744_v6  ;;  %v2074_v6 = vld [vmem:[%s9829_s10] sm:$0xff] }
 0xbb5   :  { %v1740_v53 = vpop.xlane.xlu1 %1739 }
 0xbb6   :  { %v1748_v58 = vmul.f32 0.03125, %v1740_v53  ;;  %v1737_v0 = vpop.xlane.xlu0 %1736  ;;  %v2093_v53 = vld [vmem:[%s9829_s10 + $0x98] sm:$0xff] }
 0xbb7   :  { %v1747_v10 = vmul.f32 0.03125, %v1737_v0  ;;  %v2077_v0 = vld [vmem:[%s9829_s10 + $0x18] sm:$0xff] }
 0xbb8   :  { %v8266_v15 = vsub.f32 %v1732_v20, %v1748_v58  ;;  %v5050_v20 = vld [vmem:[%s9835_s16 + $0x40] sm:$0xff]  ;;  %v2092_v58 = vld [vmem:[%s9829_s10 + $0x90] sm:$0xff] }
 0xbb9   :  { %v8268_v17 = vsub.f32 %v1731_v28, %v1747_v10  ;;  %v6394_v28 = vpack.c.bf16 %v5049_v19, %v5048_v9  ;;  %v6398_v44 = vpack.c.bf16 %v5051_v43, %v5050_v20  ;;  %v2076_v10 = vld [vmem:[%s9829_s10 + $0x10] sm:$0xff]  ;;  %v2103_v19 = vld [vmem:[%s9829_s10 + $0xe8] sm:$0xff]  ;;  %v2102_v20 = vld [vmem:[%s9829_s10 + $0xe0] sm:$0xff] }
 0xbba   :  { %v1756_v4 = vmul.f32 %v8266_v15, %v8266_v15  ;;  %v2084_v9 = vld [vmem:[%s9829_s10 + $0x50] sm:$0xff]  ;;  %v2086_v43 = vld [vmem:[%s9829_s10 + $0x60] sm:$0xff] }
 0xbbb   :  { %v1743_v18 = vpop.xlane.xlu0 %1742  ;;  %v1755_v30 = vmul.f32 %v8268_v17, %v8268_v17  ;;  %6395 = vmatprep.subr.bf16.mxu0 %v6394_v28 }
 0xbbc   :  { %v1749_v23 = vmul.f32 0.03125, %v1743_v18  ;;  %v1762_v61 = vsel %vm106_vm0, %v1756_v4, 0.0  ;;  %6397 = vmatpush3.bf16.msra.mxu0 %v6394_v28  ;;  %v2095_v18 = vld [vmem:[%s9829_s10 + $0xa8] sm:$0xff]  ;;  %v2097_v4 = vld [vmem:[%s9829_s10 + $0xb8] sm:$0xff] }
 0xbbd   :  { %v1759_v24 = vsel %vm106_vm0, %v1755_v30, 0.0  ;;  %6399 = vmatprep.subr.bf16.mxu0 %v6398_v44  ;;  %v2094_v30 = vld [vmem:[%s9829_s10 + $0xa0] sm:$0xff]  ;;  %v2087_v28 = vld [vmem:[%s9829_s10 + $0x68] sm:$0xff] }
 0xbbe   :  { %v8275_v26 = vsub.f32 %v1733_v1, %v1749_v23  ;;  %1760 = vadd.xlane.f32.xlu0 %v1759_v24  ;;  %v2090_v1 = vld [vmem:[%s9829_s10 + $0x80] sm:$0xff]  ;;  %v2079_v23 = vld [vmem:[%s9829_s10 + $0x28] sm:$0xff] }
 0xbbf   :  { %v1746_v63 = vpop.xlane.xlu0 %1745  ;;  %5913 = vmatmul.mubr.msk.f32.vlgmr.msra.gmra.mrb[18].mxu0 %vm106_vm0, %v8313_v51  ;;  %v2078_v24 = vld [vmem:[%s9829_s10 + $0x20] sm:$0xff] }
 0xbc0   :  { %v1750_v32 = vmul.f32 0.03125, %v1746_v63  ;;  %v1757_v59 = vmul.f32 %v8275_v26, %v8275_v26  ;;  %6401 = vmatpush3.bf16.msra.mxu0 %v6398_v44  ;;  %v2096_v63 = vld [vmem:[%s9829_s10 + $0xb0] sm:$0xff]  ;;  %v2105_v44 = vld [vmem:[%s9829_s10 + $0xf8] sm:$0xff] }
 0xbc1   :  { %6403 = vmatprep.subr.bf16.mxu0 %v6402_v42 }
 0xbc2   :  { %v8280_v52 = vsub.f32 %v1734_v45, %v1750_v32  ;;  %1763 = vadd.xlane.f32.xlu0 %v1762_v61  ;;  %v1765_v50 = vsel %vm106_vm0, %v1757_v59, 0.0  ;;  %v2075_v45 = vld [vmem:[%s9829_s10 + $0x8] sm:$0xff]  ;;  %v2081_v32 = vld [vmem:[%s9829_s10 + $0x38] sm:$0xff]  ;;  %v2080_v61 = vld [vmem:[%s9829_s10 + $0x30] sm:$0xff] }
 0xbc3   :  { %v2099_v59 = vld [vmem:[%s9829_s10 + $0xc8] sm:$0xff] }
 0xbc4   :  { %v1758_v49 = vmul.f32 %v8280_v52, %v8280_v52  ;;  %6405 = vmatpush3.bf16.msra.mxu0 %v6402_v42  ;;  %v2088_v42 = vld [vmem:[%s9829_s10 + $0x70] sm:$0xff] }
 0xbc6   :  { %1766 = vadd.xlane.f32.xlu0 %v1765_v50  ;;  %v1768_v7 = vsel %vm106_vm0, %v1758_v49, 0.0  ;;  %v2098_v49 = vld [vmem:[%s9829_s10 + $0xc0] sm:$0xff]  ;;  %v2083_v50 = vld [vmem:[%s9829_s10 + $0x48] sm:$0xff] }
 0xbc7   :  { %1769 = vadd.xlane.f32.xlu1 %v1768_v7  ;;  %v2082_v7 = vld [vmem:[%s9829_s10 + $0x40] sm:$0xff]  ;;  %s10014_s10 = sld [smem:[#allocation64_spill]] }
 0xbd8   :  { %2172 = vrot.lane.b32.xlu1 %v2091_v55, %s7377_s27 }
 0xbdc   :  { %2170 = vrot.lane.b32.xlu0 %v2090_v1, %s7377_s27  ;;  %2138 = vrot.lane.b32.xlu1 %v2074_v6, %s7377_s27 }
 0xbe0   :  { %2140 = vrot.lane.b32.xlu0 %v2075_v45, %s7377_s27  ;;  %2174 = vrot.lane.b32.xlu1 %v2092_v58, %s7377_s27 }
 0xbe4   :  { %2176 = vrot.lane.b32.xlu0 %v2093_v53, %s7377_s27  ;;  %2142 = vrot.lane.b32.xlu1 %v2076_v10, %s7377_s27 }
 0xbe8   :  { %2144 = vrot.lane.b32.xlu0 %v2077_v0, %s7377_s27  ;;  %2178 = vrot.lane.b32.xlu1 %v2094_v30, %s7377_s27 }
 0xbec   :  { %2180 = vrot.lane.b32.xlu0 %v2095_v18, %s7377_s27  ;;  %2146 = vrot.lane.b32.xlu1 %v2078_v24, %s7377_s27  ;;  %v5012_v24 = vld [vmem:[%s9840_s21 + $0x2] sm:$0x3] }
 0xbf0   :  { %2148 = vrot.lane.b32.xlu0 %v2079_v23, %s7377_s27  ;;  %2182 = vrot.lane.b32.xlu1 %v2096_v63, %s7377_s27  ;;  %v1790_v63 = vrot.slane %v5012_v24, %v7996_v14 }
 0xbf4   :  { %2184 = vrot.lane.b32.xlu0 %v2097_v4, %s7377_s27  ;;  %2150 = vrot.lane.b32.xlu1 %v2080_v61, %s7377_s27 }
 0xbf8   :  { %2152 = vrot.lane.b32.xlu0 %v2081_v32, %s7377_s27  ;;  %2186 = vrot.lane.b32.xlu1 %v2098_v49, %s7377_s27 }
 0xbfc   :  { %2188 = vrot.lane.b32.xlu0 %v2099_v59, %s7377_s27  ;;  %2154 = vrot.lane.b32.xlu1 %v2082_v7, %s7377_s27  ;;  %v1798_v59 = vrot.slane %v5012_v24, %v8001_v22 }
 0xc00   :  { %2156 = vrot.lane.b32.xlu0 %v2083_v50, %s7377_s27  ;;  %2190 = vrot.lane.b32.xlu1 %v2100_v29, %s7377_s27 }
 0xc04   :  { %2192 = vrot.lane.b32.xlu0 %v2101_v57, %s7377_s27  ;;  %2158 = vrot.lane.b32.xlu1 %v2084_v9, %s7377_s27 }
 0xc08   :  { %2160 = vrot.lane.b32.xlu0 %v2085_v12, %s7377_s27  ;;  %2194 = vrot.lane.b32.xlu1 %v2102_v20, %s7377_s27 }
 0xc0c   :  { %2196 = vrot.lane.b32.xlu0 %v2103_v19, %s7377_s27  ;;  %2162 = vrot.lane.b32.xlu1 %v2086_v43, %s7377_s27 }
 0xc10   :  { %2164 = vrot.lane.b32.xlu0 %v2087_v28, %s7377_s27  ;;  %2198 = vrot.lane.b32.xlu1 %v2104_v3, %s7377_s27 }
 0xc14   :  { %2200 = vrot.lane.b32.xlu0 %v2105_v44, %s7377_s27  ;;  %2166 = vrot.lane.b32.xlu1 %v2088_v42, %s7377_s27 }
 0xc18   :  { %2168 = vrot.lane.b32.xlu0 %v2089_v21, %s7377_s27 }
 0xc4b   :  { %v1761_v1 = vpop.xlane.xlu0 %1760 }
 0xc4c   :  { %v1771_v55 = vmul.f32 0.03125, %v1761_v1 }
 0xc4e   :  { %v1775_v45 = vadd.f32 1e-05, %v1771_v55 }
 0xc4f   :  { %v1764_v6 = vpop.xlane.xlu0 %1763 }
 0xc50   :  { %7173 = vrsqrt.f32 %v1775_v45  ;;  %v1772_v53 = vmul.f32 0.03125, %v1764_v6 }
 0xc52   :  { %v1776_v58 = vadd.f32 1e-05, %v1772_v53 }
 0xc53   :  { %v1767_v0 = vpop.xlane.xlu0 %1766 }
 0xc54   :  { %7175 = vrsqrt.f32 %v1776_v58  ;;  %v1773_v10 = vmul.f32 0.03125, %v1767_v0  ;;  %v1770_v18 = vpop.xlane.xlu1 %1769 }
 0xc55   :  { %v1774_v30 = vmul.f32 0.03125, %v1770_v18 }
 0xc56   :  { %v1777_v23 = vadd.f32 1e-05, %v1773_v10 }
 0xc57   :  { %v1778_v4 = vadd.f32 1e-05, %v1774_v30  ;;  %v8487_v1 = vpop.permute.xlu0 %2170 }
 0xc58   :  { %7177 = vrsqrt.f32 %v1777_v23  ;;  %9946 = vst [vmem:[#allocation39_spill] sm:$0xff] %v8487_v1  ;;  %v8489_v55 = vpop.permute.xlu1 %2172 }
 0xc59   :  { %7179 = vrsqrt.f32 %v1778_v4  ;;  %9947 = vst [vmem:[#allocation40_spill] sm:$0xff] %v8489_v55 }
 0xc5a   :  { %v7174_v32 = vpop.eup %7173 }
 0xc5b   :  { %v1783_v61 = vmul.f32 %v7174_v32, %v8268_v17  ;;  %v8491_v45 = vpop.permute.xlu0 %2140 }
 0xc5c   :  { %9948 = vst [vmem:[#allocation41_spill] sm:$0xff] %v8491_v45  ;;  %v8493_v6 = vpop.permute.xlu1 %2138 }
 0xc5d   :  { %v1791_v49 = vmul.f32 %v1790_v63, %v1783_v61  ;;  %9949 = vst [vmem:[#allocation42_spill] sm:$0xff] %v8493_v6 }
 0xc5e   :  { %v7176_v50 = vpop.eup %7175 }
 0xc5f   :  { %v1784_v7 = vmul.f32 %v7176_v50, %v8266_v15  ;;  %v8452_v57 = vadd.f32 %v1798_v59, %v1791_v49  ;;  %v8495_v53 = vpop.permute.xlu0 %2176 }
 0xc60   :  { %v8497_v58 = vpop.permute.xlu1 %2174 }
 0xc61   :  { %9942 = vst [vmem:[#allocation35_spill] sm:$0xff] %v8452_v57  ;;  %5923 = vmatprep.mubr.msk.f32.mxu0 %vm106_vm0, %v8452_v57  ;;  %4909 = vst.msk [vmem:[#allocation2] sm:$0xff] %vm106_vm0, %v8452_v57  ;;  %v1792_v29 = vmul.f32 %v1790_v63, %v1784_v7 }
 0xc62   :  { %v7178_v12 = vpop.eup %7177 }
 0xc63   :  { %v7180_v9 = vpop.eup %7179  ;;  %v8458_v19 = vadd.f32 %v1798_v59, %v1792_v29  ;;  %v1785_v17 = vmul.f32 %v7178_v12, %v8275_v26  ;;  %v5062_v26 = vld [vmem:[%s9837_s18 + $0x2] ss:$0 sm:$0xff]  ;;  %v8499_v0 = vpop.permute.xlu0 %2144 }
 0xc64   :  { %v1786_v20 = vmul.f32 %v7180_v9, %v8280_v52  ;;  %v8501_v10 = vpop.permute.xlu1 %2142 }
 0xc65   :  { %9943 = vst [vmem:[#allocation36_spill] sm:$0xff] %v8458_v19  ;;  %5924 = vmatmul.mubr.msk.f32.vlgmr.msra.gmra.mrb[20].mxu0 %vm106_vm0, %v8458_v19  ;;  %4910 = vst.msk [vmem:[#allocation2 + $0x8] sm:$0xff] %vm106_vm0, %v8458_v19  ;;  %v1793_v15 = vmul.f32 %v1790_v63, %v1785_v17 }
 0xc66   :  { %v1794_v28 = vmul.f32 %v1790_v63, %v1786_v20 }
 0xc67   :  { %v8466_v43 = vadd.f32 %v1798_v59, %v1793_v15  ;;  %v8503_v18 = vpop.permute.xlu0 %2180 }
 0xc68   :  { %v8468_v44 = vadd.f32 %v1798_v59, %v1794_v28  ;;  %9950 = vst [vmem:[#allocation43_spill] sm:$0xff] %v8503_v18  ;;  %v8505_v30 = vpop.permute.xlu1 %2178 }
 0xc69   :  { %9944 = vst [vmem:[#allocation37_spill] sm:$0xff] %v8466_v43  ;;  %5926 = vmatprep.mubr.msk.f32.mxu0 %vm106_vm0, %v8466_v43  ;;  %4911 = vst.msk [vmem:[#allocation2 + $0x10] sm:$0xff] %vm106_vm0, %v8466_v43 }
 0xc6a   :  { %9945 = vst [vmem:[#allocation38_spill] sm:$0xff] %v8468_v44  ;;  %5927 = vmatmul.mubr.msk.f32.gmra.mrb[22].mxu0 %vm106_vm0, %v8468_v44  ;;  %4912 = vst.msk [vmem:[#allocation2 + $0x18] sm:$0xff] %vm106_vm0, %v8468_v44 }
 0xc6b   :  { %9951 = vst [vmem:[#allocation44_spill] sm:$0xff] %v8505_v30  ;;  %v8507_v23 = vpop.permute.xlu0 %2148 }
 0xc6c   :  { %9952 = vst [vmem:[#allocation45_spill] sm:$0xff] %v8507_v23  ;;  %v8509_v24 = vpop.permute.xlu1 %2146 }
 0xc6d   :  { %9953 = vst [vmem:[#allocation46_spill] sm:$0xff] %v8509_v24 }
 0xc6f   :  { %v8511_v4 = vpop.permute.xlu0 %2184 }
 0xc70   :  { %v8513_v63 = vpop.permute.xlu1 %2182 }
 0xc73   :  { %v8515_v32 = vpop.permute.xlu0 %2152 }
 0xc74   :  { %9954 = vst [vmem:[#allocation47_spill] sm:$0xff] %v8515_v32  ;;  %v8517_v61 = vpop.permute.xlu1 %2150 }
 0xc75   :  { %9955 = vst [vmem:[#allocation48_spill] sm:$0xff] %v8517_v61 }
 0xc77   :  { %v8519_v59 = vpop.permute.xlu0 %2188 }
 0xc78   :  { %v8521_v49 = vpop.permute.xlu1 %2186 }
 0xc7b   :  { %v8523_v50 = vpop.permute.xlu0 %2156 }
 0xc7c   :  { %v8525_v7 = vpop.permute.xlu1 %2154 }
 0xc7f   :  { %v8527_v29 = vpop.permute.xlu0 %2192 }
 0xc80   :  { %9956 = vst [vmem:[#allocation49_spill] sm:$0xff] %v8527_v29  ;;  %v8529_v12 = vpop.permute.xlu1 %2190 }
 0xc81   :  { %9957 = vst [vmem:[#allocation50_spill] sm:$0xff] %v8529_v12 }
 0xc83   :  { %v8531_v9 = vpop.permute.xlu0 %2160 }
 0xc84   :  { %9958 = vst [vmem:[#allocation51_spill] sm:$0xff] %v8531_v9  ;;  %v8533_v17 = vpop.permute.xlu1 %2158 }
 0xc85   :  { %9959 = vst [vmem:[#allocation52_spill] sm:$0xff] %v8533_v17 }
 0xc87   :  { %v8535_v20 = vpop.permute.xlu0 %2196 }
 0xc88   :  { %v8537_v15 = vpop.permute.xlu1 %2194 }
 0xc8b   :  { %v8539_v28 = vpop.permute.xlu0 %2164 }
 0xc8c   :  { %9960 = vst [vmem:[#allocation53_spill] sm:$0xff] %v8539_v28 }
 0xc92   :  { %v5914_v52 = vpop.f32.mrb[18].mxu0 }
 0xc93   :  { %v8481_v3 = vadd.f32 %v5914_v52, %v5062_v26  ;;  %v1898_v21 = vpop.f32.mrb[19].mxu0  ;;  %v5065_v52 = vld [vmem:[%s9838_s19 + $0x2] ss:$0 sm:$0xff] }
 0xc94   :  { %v8483_v42 = vadd.f32 %v5062_v26, %v1898_v21  ;;  %v8541_v26 = vpop.permute.xlu1 %2162  ;;  %v8546_v21 = vpop.permute.xlu0 %2200 }
 0xc96   :  { %5424 = vmatprep.mubr.msk.f32.mxu0 %vm106_vm0, %v8483_v42 }
 0xc98   :  { %v8548_v41 = vpop.permute.xlu1 %2198 }
 0xc9c   :  { %v8593_v2 = vpop.permute.xlu1 %2166 }
 0xc9d   :  { %9962 = vst [vmem:[#allocation55_spill] sm:$0xff] %v8593_v2 }
 0xd38   :  { %v5925_v40 = vpop.f32.mrb[20].mxu0 }
 0xd39   :  { %v8556_v35 = vadd.f32 %v5925_v40, %v5065_v52  ;;  %v1991_v34 = vpop.f32.mrb[21].mxu0 }
 0xd3a   :  { %v8564_v44 = vadd.f32 %v5065_v52, %v1991_v34 }
 0xd3b   :  { %v2059_v43 = vmul.f32 %v2027_v38, %v8556_v35  ;;  %v2251_v19 = vmul.f32 %v8489_v55, %v8556_v35  ;;  %v2235_v40 = vmul.f32 %v8491_v45, %v8556_v35  ;;  %v2043_v57 = vmul.f32 %v2011_v39, %v8556_v35  ;;  %v8578_v38 = vpop.permute.xlu0 %2168 }
 0xd3c   :  { %v2058_v27 = vmul.f32 %v2026_v37, %v8564_v44  ;;  %v2250_v46 = vmul.f32 %v8487_v1, %v8564_v44  ;;  %v2234_v11 = vmul.f32 %v8493_v6, %v8564_v44  ;;  %v2042_v34 = vmul.f32 %v2010_v36, %v8564_v44  ;;  %9961 = vst [vmem:[#allocation54_spill] sm:$0xff] %v8578_v38  ;;  %v2029_v6 = vld [vmem:[%s9828_s9 + $0x98] sm:$0xff] }
 0xd3d   :  { %v5928_v13 = vpop.f32.mrb[22].mxu0  ;;  %v2254_v55 = vmul.f32 %v8505_v30, %v8564_v44  ;;  %v2255_v45 = vmul.f32 %v8503_v18, %v8556_v35  ;;  %v2238_v37 = vmul.f32 %v8509_v24, %v8564_v44  ;;  %v2239_v39 = vmul.f32 %v8507_v23, %v8556_v35  ;;  %v2028_v18 = vld [vmem:[%s9828_s9 + $0x90] sm:$0xff] }
 0xd3e   :  { %v8591_v36 = vadd.f32 %v5928_v13, %v5065_v52  ;;  %v2001_v1 = vpop.f32.mrb[23].mxu0  ;;  %v6406_v8 = vpack.c.bf16 %v2059_v43, %v2058_v27  ;;  %v6893_v30 = vpack.i.bf16 %v2251_v19, %v2250_v46  ;;  %v6898_v16 = vpack.i.bf16 %v2235_v40, %v2234_v11  ;;  %v2012_v13 = vld [vmem:[%s9828_s9 + $0x10] sm:$0xff] }
 0xd3f   :  { %v8598_v24 = vadd.f32 %v5065_v52, %v2001_v1  ;;  %v6409_v5 = vpack.c.bf16 %v2043_v57, %v2042_v34  ;;  %v6903_v23 = vpack.i.bf16 %v2255_v45, %v2254_v55  ;;  %v6908_v56 = vpack.i.bf16 %v2239_v39, %v2238_v37  ;;  %v2030_v57 = vld [vmem:[%s9828_s9 + $0xa0] sm:$0xff]  ;;  %v2031_v1 = vld [vmem:[%s9828_s9 + $0xa8] sm:$0xff] }
 0xd40   :  { %v8608_v11 = vmul.f32 %v8578_v38, %v8591_v36  ;;  %6408 = vmatprep.subr.msk.bf16.mxu0 %vm7726_vm1, %v6406_v8  ;;  %6894 = vrot.lane.b32.xlu1 %v6893_v30, %s7378_s6  ;;  %v2061_v27 = vmul.f32 %v2029_v6, %v8591_v36  ;;  %v2258_v46 = vmul.f32 %v8521_v49, %v8564_v44 }
 0xd41   :  { %v8621_v19 = vmul.f32 %v8593_v2, %v8598_v24  ;;  %6899 = vrot.lane.b32.xlu0 %v6898_v16, %s7378_s6  ;;  %6411 = vmatpush3.bf16.xpose.msk.msra.mxu0 %vm7726_vm1, %v6409_v5  ;;  %v2060_v8 = vmul.f32 %v2028_v18, %v8598_v24  ;;  %v2259_v43 = vmul.f32 %v8519_v59, %v8556_v35  ;;  %v2037_v2 = vld [vmem:[%s9828_s9 + $0xd8] sm:$0xff] }
 0xd42   :  { %v2242_v55 = vmul.f32 %v8525_v7, %v8564_v44  ;;  %v2243_v45 = vmul.f32 %v8523_v50, %v8556_v35  ;;  %v2044_v16 = vmul.f32 %v2012_v13, %v8598_v24  ;;  %v2045_v6 = vmul.f32 %v2013_v54, %v8591_v36  ;;  %v2014_v54 = vld [vmem:[%s9828_s9 + $0x20] sm:$0xff] }
 0xd43   :  { %v6412_v18 = vpack.c.bf16 %v2061_v27, %v2060_v8  ;;  %v6913_v30 = vpack.i.bf16 %v2259_v43, %v2258_v46  ;;  %v2062_v52 = vmul.f32 %v2030_v57, %v8564_v44  ;;  %v2063_v37 = vmul.f32 %v2031_v1, %v8556_v35  ;;  %v2015_v46 = vld [vmem:[%s9828_s9 + $0x28] sm:$0xff]  ;;  %v2033_v57 = vld [vmem:[%s9828_s9 + $0xb8] sm:$0xff] }
 0xd44   :  { %6904 = vrot.lane.b32.xlu1 %v6903_v23, %s7378_s6  ;;  %v6918_v40 = vpack.i.bf16 %v2243_v45, %v2242_v55  ;;  %v6415_v34 = vpack.c.bf16 %v2045_v6, %v2044_v16  ;;  %v2262_v39 = vmul.f32 %v8537_v15, %v8564_v44  ;;  %v2263_v13 = vmul.f32 %v8535_v20, %v8556_v35 }
 0xd45   :  { %6909 = vrot.lane.b32.xlu0 %v6908_v56, %s7378_s6  ;;  %6414 = vmatprep.subr.msk.bf16.mxu0 %vm7726_vm1, %v6412_v18  ;;  %v2246_v23 = vmul.f32 %v8541_v26, %v8564_v44  ;;  %v2247_v27 = vmul.f32 %v8539_v28, %v8556_v35  ;;  %v2032_v56 = vld [vmem:[%s9828_s9 + $0xb0] sm:$0xff]  ;;  %v6418_v8 = vpack.c.bf16 %v2063_v37, %v2062_v52 }
 0xd46   :  { %v2256_v43 = vmul.f32 %v8513_v63, %v8598_v24  ;;  %v2257_v1 = vmul.f32 %v8511_v4, %v8591_v36  ;;  %v8672_v55 = vmul.f32 %v8497_v58, %v8598_v24  ;;  %v6923_v45 = vpack.i.bf16 %v2263_v13, %v2262_v39  ;;  %v2016_v13 = vld [vmem:[%s9828_s9 + $0x30] sm:$0xff] }
 0xd47   :  { %v6928_v16 = vpack.i.bf16 %v2247_v27, %v2246_v23  ;;  %v2253_v6 = vmul.f32 %v8495_v53, %v8591_v36  ;;  %v8677_v18 = vmul.f32 %v2014_v54, %v8564_v44  ;;  %v2047_v37 = vmul.f32 %v2015_v46, %v8556_v35 }
 0xd48   :  { %6914 = vrot.lane.b32.xlu1 %v6913_v30, %s7378_s6  ;;  %v6943_v52 = vpack.i.bf16 %v2257_v1, %v2256_v43  ;;  %v8682_v5 = vmul.f32 %v2032_v56, %v8598_v24  ;;  %v2065_v38 = vmul.f32 %v2033_v57, %v8591_v36  ;;  %v8691_v54 = vmul.f32 %v8517_v61, %v8598_v24  ;;  %v2034_v56 = vld [vmem:[%s9828_s9 + $0xc0] sm:$0xff]  ;;  %v2035_v57 = vld [vmem:[%s9828_s9 + $0xc8] sm:$0xff] }
 0xd49   :  { %6919 = vrot.lane.b32.xlu0 %v6918_v40, %s7378_s6  ;;  %6417 = vmatpush3.bf16.xpose.msk.msra.mxu0 %vm7726_vm1, %v6415_v34  ;;  %v6933_v39 = vpack.i.bf16 %v2253_v6, %v8672_v55  ;;  %v8695_v30 = vmul.f32 %v8515_v32, %v8591_v36  ;;  %v2017_v40 = vld [vmem:[%s9828_s9 + $0x38] sm:$0xff]  ;;  %v6421_v34 = vpack.c.bf16 %v2047_v37, %v8677_v18  ;;  %v2019_v55 = vld [vmem:[%s9828_s9 + $0x48] sm:$0xff]  ;;  %v2036_v6 = vld [vmem:[%s9828_s9 + $0xd0] sm:$0xff] }
 0xd4a   :  { %6420 = vmatprep.subr.msk.bf16.mxu0 %vm7726_vm1, %v6418_v8  ;;  %v6424_v23 = vpack.c.bf16 %v2065_v38, %v8682_v5  ;;  %v2236_v27 = vmul.f32 %v8501_v10, %v8598_v24  ;;  %v2237_v46 = vmul.f32 %v8499_v0, %v8591_v36  ;;  %v2018_v8 = vld [vmem:[%s9828_s9 + $0x40] sm:$0xff]  ;;  %v2260_v5 = vmul.f32 %v8529_v12, %v8598_v24 }
 0xd4b   :  { %v6948_v38 = vpack.i.bf16 %v8695_v30, %v8691_v54  ;;  %v2261_v43 = vmul.f32 %v8527_v29, %v8591_v36  ;;  %v2244_v1 = vmul.f32 %v8533_v17, %v8598_v24  ;;  %v2245_v37 = vmul.f32 %v8531_v9, %v8591_v36  ;;  %v2020_v17 = vld [vmem:[%s9828_s9 + $0x50] sm:$0xff]  ;;  %v2038_v9 = vld [vmem:[%s9828_s9 + $0xe0] sm:$0xff]  ;;  %v2039_v29 = vld [vmem:[%s9828_s9 + $0xe8] sm:$0xff] }
 0xd4c   :  { %6924 = vrot.lane.b32.xlu1 %v6923_v45, %s7378_s6  ;;  %v6938_v18 = vpack.i.bf16 %v2237_v46, %v2236_v27  ;;  %v2048_v54 = vmul.f32 %v2016_v13, %v8598_v24  ;;  %v2049_v30 = vmul.f32 %v2017_v40, %v8591_v36  ;;  %v2021_v45 = vld [vmem:[%s9828_s9 + $0x58] sm:$0xff]  ;;  %v2066_v46 = vmul.f32 %v2034_v56, %v8564_v44  ;;  %v2022_v12 = vld [vmem:[%s9828_s9 + $0x60] sm:$0xff] }
 0xd4d   :  { %6929 = vrot.lane.b32.xlu0 %v6928_v16, %s7378_s6  ;;  %v6953_v27 = vpack.i.bf16 %v2261_v43, %v2260_v5  ;;  %v2067_v13 = vmul.f32 %v2035_v57, %v8556_v35  ;;  %v2050_v40 = vmul.f32 %v2018_v8, %v8564_v44  ;;  %v6958_v16 = vpack.i.bf16 %v2245_v37, %v2244_v1  ;;  %v2023_v8 = vld [vmem:[%s9828_s9 + $0x68] sm:$0xff]  ;;  %v2040_v1 = vld [vmem:[%s9828_s9 + $0xf0] sm:$0xff] }
 0xd4e   :  { %v6427_v5 = vpack.c.bf16 %v2049_v30, %v2048_v54  ;;  %v2051_v56 = vmul.f32 %v2019_v55, %v8556_v35  ;;  %v2068_v57 = vmul.f32 %v2036_v6, %v8598_v24  ;;  %v2069_v32 = vmul.f32 %v2037_v2, %v8591_v36  ;;  %v2041_v55 = vld [vmem:[%s9828_s9 + $0xf8] sm:$0xff]  ;;  %v2024_v6 = vld [vmem:[%s9828_s9 + $0x70] sm:$0xff] }
 0xd4f   :  { %v6430_v43 = vpack.c.bf16 %v2067_v13, %v2066_v46  ;;  %v2052_v61 = vmul.f32 %v2020_v17, %v8598_v24  ;;  %v2053_v28 = vmul.f32 %v2021_v45, %v8591_v36  ;;  %v2070_v2 = vmul.f32 %v2038_v9, %v8564_v44  ;;  %v2025_v30 = vld [vmem:[%s9828_s9 + $0x78] sm:$0xff] }
 0xd50   :  { %6944 = vrot.lane.b32.xlu1 %v6943_v52, %s7378_s6  ;;  %v6433_v37 = vpack.c.bf16 %v2051_v56, %v2050_v40  ;;  %v2071_v17 = vmul.f32 %v2039_v29, %v8556_v35  ;;  %v2054_v54 = vmul.f32 %v2022_v12, %v8564_v44  ;;  %v6436_v45 = vpack.c.bf16 %v2069_v32, %v2068_v57 }
 0xd51   :  { %6934 = vrot.lane.b32.xlu0 %v6933_v39, %s7378_s6  ;;  %6423 = vmatpush3.bf16.xpose.msk.msra.mxu0 %vm7726_vm1, %v6421_v34  ;;  %v6439_v46 = vpack.c.bf16 %v2053_v28, %v2052_v61  ;;  %v2055_v52 = vmul.f32 %v2023_v8, %v8556_v35  ;;  %v2072_v29 = vmul.f32 %v2040_v1, %v8598_v24 }
 0xd52   :  { %6426 = vmatprep.subr.msk.bf16.mxu0 %vm7726_vm1, %v6424_v23  ;;  %v6442_v9 = vpack.c.bf16 %v2071_v17, %v2070_v2  ;;  %v2073_v44 = vmul.f32 %v2041_v55, %v8591_v36  ;;  %v2056_v12 = vmul.f32 %v2024_v6, %v8598_v24  ;;  %v2057_v39 = vmul.f32 %v2025_v30, %v8591_v36 }
 0xd53   :  { %v6445_v13 = vpack.c.bf16 %v2055_v52, %v2054_v54  ;;  %v8797_v34 = vmul.f32 %v8548_v41, %v8598_v24  ;;  %v8801_v35 = vmul.f32 %v8546_v21, %v8591_v36 }
 0xd54   :  { %6949 = vrot.lane.b32.xlu1 %v6948_v38, %s7378_s6  ;;  %v6448_v32 = vpack.c.bf16 %v2073_v44, %v2072_v29  ;;  %v6451_v61 = vpack.c.bf16 %v2057_v39, %v2056_v12 }
 0xd55   :  { %6939 = vrot.lane.b32.xlu0 %v6938_v18, %s7378_s6  ;;  %v6963_v28 = vpack.i.bf16 %v8801_v35, %v8797_v34 }
 0xd58   :  { %6954 = vrot.lane.b32.xlu1 %v6953_v27, %s7378_s6 }
 0xd59   :  { %6959 = vrot.lane.b32.xlu0 %v6958_v16, %s7378_s6  ;;  %6429 = vmatpush3.bf16.xpose.msk.msra.mxu0 %vm7726_vm1, %v6427_v5 }
 0xd5a   :  { %6432 = vmatprep.subr.msk.bf16.mxu0 %vm7726_vm1, %v6430_v43 }
 0xd61   :  { %6435 = vmatpush3.bf16.xpose.msk.msra.mxu0 %vm7726_vm1, %v6433_v37 }
 0xd62   :  { %6438 = vmatprep.subr.msk.bf16.mxu0 %vm7726_vm1, %v6436_v45 }
 0xd69   :  { %6441 = vmatpush3.bf16.xpose.msk.msra.mxu0 %vm7726_vm1, %v6439_v46 }
 0xd6a   :  { %6444 = vmatprep.subr.msk.bf16.mxu0 %vm7726_vm1, %v6442_v9 }
 0xd71   :  { %6447 = vmatpush3.bf16.xpose.msk.msra.mxu0 %vm7726_vm1, %v6445_v13 }
 0xd72   :  { %6450 = vmatprep.subr.msk.bf16.mxu0 %vm7726_vm1, %v6448_v32 }
 0xd79   :  { %6453 = vmatpush3.bf16.xpose.msk.msra.mxu0 %vm7726_vm1, %v6451_v61 }
 0xd80   :  { %5425 = vmatmul.mubr.msk.f32.vlgmr.msra.gmra.mrb[24].mxu0 %vm106_vm0, %v8483_v42 }
 0xd81   :  { %5426 = vmatprep.mubr.msk.f32.mxu0 %vm106_vm0, %v8481_v3 }
 0xd84   :  { %5427 = vmatmul.mubr.msk.f32.gmra.mrb[26].mxu0 %vm106_vm0, %v8481_v3 }
 0xdb2   :  { %v6895_v24 = vpop.permute.xlu1 %6894 }
 0xdb3   :  { %v6897_v36 = vunpack.i.h.bf16 %v6895_v24  ;;  %v6896_v23 = vunpack.i.l.bf16 %v6895_v24  ;;  %v6900_v38 = vpop.permute.xlu0 %6899 }
 0xdb4   :  { %v6902_v18 = vunpack.i.h.bf16 %v6900_v38  ;;  %v6901_v27 = vunpack.i.l.bf16 %v6900_v38 }
 0xdb5   :  { %v6454_v40 = vpack.c.bf16 %v6897_v36, %v6896_v23 }
 0xdb6   :  { %v6456_v16 = vpack.c.bf16 %v6902_v18, %v6901_v27  ;;  %v6905_v5 = vpop.permute.xlu1 %6904 }
 0xdb7   :  { %v6910_v56 = vpop.permute.xlu0 %6909  ;;  %6455 = vmatprep.subr.bf16.mxu1 %v6454_v40  ;;  %v6907_v2 = vunpack.i.h.bf16 %v6905_v5  ;;  %v6906_v17 = vunpack.i.l.bf16 %v6905_v5 }
 0xdb8   :  { %6457 = vmatpush3.bf16.msra.mxu1 %v6456_v16  ;;  %v6912_v46 = vunpack.i.h.bf16 %v6910_v56  ;;  %v6911_v52 = vunpack.i.l.bf16 %v6910_v56 }
 0xdb9   :  { %v6462_v44 = vpack.c.bf16 %v6907_v2, %v6906_v17 }
 0xdba   :  { %v6915_v57 = vpop.permute.xlu1 %6914  ;;  %v6464_v39 = vpack.c.bf16 %v6912_v46, %v6911_v52  ;;  %v2266_v46 = vld [vmem:[%s9963_s3] sm:$0xff]  ;;  %v2267_v52 = vld [vmem:[%s9963_s3 + $0x8] sm:$0xff] }
 0xdbb   :  { %v6920_v42 = vpop.permute.xlu0 %6919  ;;  %v6917_v24 = vunpack.i.h.bf16 %v6915_v57  ;;  %v6916_v36 = vunpack.i.l.bf16 %v6915_v57 }
 0xdbc   :  { %v6922_v18 = vunpack.i.h.bf16 %v6920_v42  ;;  %v6921_v27 = vunpack.i.l.bf16 %v6920_v42 }
 0xdbd   :  { %v6470_v16 = vpack.c.bf16 %v6917_v24, %v6916_v36 }
 0xdbe   :  { %v6925_v8 = vpop.permute.xlu1 %6924 }
 0xdbf   :  { %v6930_v43 = vpop.permute.xlu0 %6929  ;;  %v6926_v2 = vunpack.i.l.bf16 %v6925_v8 }
 0xdc0   :  { %v6932_v57 = vunpack.i.h.bf16 %v6930_v43 }
 0xdc2   :  { %v6945_v55 = vpop.permute.xlu1 %6944 }
 0xdc3   :  { %v6935_v1 = vpop.permute.xlu0 %6934  ;;  %v6947_v12 = vunpack.i.h.bf16 %v6945_v55  ;;  %v6946_v13 = vunpack.i.l.bf16 %v6945_v55  ;;  %v6472_v55 = vpack.c.bf16 %v6922_v18, %v6921_v27 }
 0xdc4   :  { %v6937_v6 = vunpack.i.h.bf16 %v6935_v1  ;;  %v6936_v3 = vunpack.i.l.bf16 %v6935_v1 }
 0xdc5   :  { %v6466_v23 = vpack.c.bf16 %v6947_v12, %v6946_v13  ;;  %v2269_v12 = vld [vmem:[%s9963_s3 + $0x18] sm:$0xff] }
 0xdc6   :  { %v6458_v37 = vpack.c.bf16 %v6937_v6, %v6936_v3  ;;  %v6950_v9 = vpop.permute.xlu1 %6949 }
 0xdc7   :  { %v6940_v54 = vpop.permute.xlu0 %6939  ;;  %v6952_v32 = vunpack.i.h.bf16 %v6950_v9  ;;  %v6951_v61 = vunpack.i.l.bf16 %v6950_v9 }
 0xdc8   :  { %v6942_v30 = vunpack.i.h.bf16 %v6940_v54  ;;  %v6941_v45 = vunpack.i.l.bf16 %v6940_v54  ;;  %6459 = vmatprep.subr.bf16.mxu1 %v6458_v37  ;;  %v6927_v37 = vunpack.i.h.bf16 %v6925_v8  ;;  %v6931_v54 = vunpack.i.l.bf16 %v6930_v43  ;;  %v2268_v43 = vld [vmem:[%s9963_s3 + $0x10] sm:$0xff] }
 0xdc9   :  { %v6468_v40 = vpack.c.bf16 %v6952_v32, %v6951_v61 }
 0xdca   :  { %v6460_v29 = vpack.c.bf16 %v6942_v30, %v6941_v45  ;;  %v6955_v38 = vpop.permute.xlu1 %6954  ;;  %v6478_v45 = vpack.c.bf16 %v6927_v37, %v6926_v2  ;;  %v6480_v42 = vpack.c.bf16 %v6932_v57, %v6931_v54 }
 0xdcb   :  { %v6957_v5 = vunpack.i.h.bf16 %v6955_v38  ;;  %v6956_v56 = vunpack.i.l.bf16 %v6955_v38  ;;  %v6960_v1 = vpop.permute.xlu0 %6959 }
 0xdcc   :  { %6461 = vmatpush3.bf16.msra.mxu1 %v6460_v29  ;;  %v6962_v6 = vunpack.i.h.bf16 %v6960_v1  ;;  %v6961_v3 = vunpack.i.l.bf16 %v6960_v1 }
 0xdcd   :  { %6463 = vmatprep.subr.bf16.mxu1 %v6462_v44  ;;  %v6474_v17 = vpack.c.bf16 %v6957_v5, %v6956_v56 }
 0xdce   :  { %v6476_v30 = vpack.c.bf16 %v6962_v6, %v6961_v3 }
 0xdd0   :  { %6465 = vmatpush3.bf16.msra.mxu1 %v6464_v39 }
 0xdd1   :  { %6467 = vmatprep.subr.bf16.mxu1 %v6466_v23  ;;  %v9964_v23 = vpack.i.bf16 %v8608_v11, %v8621_v19 }
 0xdd4   :  { %6469 = vmatpush3.bf16.msra.mxu1 %v6468_v40 }
 0xdd5   :  { %6471 = vmatprep.subr.bf16.mxu1 %v6470_v16 }
 0xdd8   :  { %6473 = vmatpush3.bf16.msra.mxu1 %v6472_v55 }
 0xdd9   :  { %6475 = vmatprep.subr.bf16.mxu1 %v6474_v17 }
 0xddc   :  { %6477 = vmatpush3.bf16.msra.mxu1 %v6476_v30 }
 0xddd   :  { %6479 = vmatprep.subr.bf16.mxu1 %v6478_v45  ;;  %v5054_v45 = vld [vmem:[%s9836_s17 + $0x40] sm:$0xff] }
 0xde0   :  { %6481 = vmatpush3.bf16.msra.mxu1 %v6480_v42  ;;  %v5055_v42 = vld [vmem:[%s9836_s17 + $0x48] sm:$0xff] }
 0xe53   :  { %v2438_v8 = vpop.f32.mrb[24].mxu0 }
 0xe54   :  { %v2439_v9 = vadd.f32 %v2438_v8, %v2266_v46  ;;  %v2440_v29 = vpop.f32.mrb[25].mxu0  ;;  %v6486_v46 = vpack.c.bf16 %v5055_v42, %v5054_v45  ;;  %v5107_v45 = vld [vmem:[%s9834_s15 + $0x60] sm:$0xff]  ;;  %v5108_v42 = vld [vmem:[%s9834_s15 + $0x68] sm:$0xff] }
 0xe55   :  { %v2441_v44 = vadd.f32 %v2440_v29, %v2267_v52 }
 0xe57   :  { %v2449_v13 = vmax.f32 %v2439_v9, %v2441_v44  ;;  %v2444_v39 = vpop.f32.mrb[26].mxu0 }
 0xe58   :  { %v2445_v32 = vadd.f32 %v2444_v39, %v2268_v43  ;;  %v2446_v61 = vpop.f32.mrb[27].mxu0  ;;  %v5056_v43 = vld [vmem:[%s9836_s17 + $0x50] sm:$0xff] }
 0xe59   :  { %v2447_v24 = vadd.f32 %v2446_v61, %v2269_v12  ;;  %2450 = vmax.xlane.f32.xlu1 %v2449_v13  ;;  %v5057_v12 = vld [vmem:[%s9836_s17 + $0x58] sm:$0xff] }
 0xe5a   :  { %v6490_v39 = vpack.c.bf16 %v5057_v12, %v5056_v43 }
 0xe5b   :  { %v2452_v36 = vmax.f32 %v2445_v32, %v2447_v24 }
 0xe5d   :  { %2453 = vmax.xlane.f32.xlu0 %v2452_v36 }
 0xe6a   :  { %6964 = vrot.lane.b32.xlu1 %v6963_v28, %s7378_s6 }
 0xe73   :  { %6969 = vrot.lane.b32.xlu0 %v9964_v23, %s7378_s6 }
 0xee6   :  { %v2451_v38 = vpop.xlane.xlu1 %2450 }
 0xee7   :  { %v2455_v18 = vsub.f32 %v2439_v9, %v2451_v38  ;;  %v2456_v27 = vsub.f32 %v2441_v44, %v2451_v38 }
 0xee9   :  { %v2459_v40 = vmul.f32 1.442695, %v2455_v18  ;;  %v2461_v16 = vmul.f32 1.442695, %v2456_v27 }
 0xeea   :  { %v6965_v5 = vpop.permute.xlu1 %6964  ;;  %v2454_v56 = vpop.xlane.xlu0 %2453 }
 0xeeb   :  { %7181 = vpow2.f32 %v2459_v40  ;;  %v6967_v1 = vunpack.i.h.bf16 %v6965_v5  ;;  %v6966_v55 = vunpack.i.l.bf16 %v6965_v5  ;;  %v2457_v6 = vsub.f32 %v2445_v32, %v2454_v56  ;;  %v5104_v40 = vld [vmem:[%s9839_s20 + $0x2] ss:$0 sm:$0xff] }
 0xeec   :  { %7183 = vpow2.f32 %v2461_v16  ;;  %v2458_v3 = vsub.f32 %v2447_v24, %v2454_v56 }
 0xeed   :  { %v6482_v34 = vpack.c.bf16 %v6967_v1, %v6966_v55  ;;  %v2463_v35 = vmul.f32 1.442695, %v2457_v6  ;;  %v7239_v6 = vld [vmem:[%s9910_s4] sm:$0xff] }
 0xeee   :  { %v2465_v28 = vmul.f32 1.442695, %v2458_v3  ;;  %v6970_v37 = vpop.permute.xlu0 %6969 }
 0xeef   :  { %7185 = vpow2.f32 %v2463_v35  ;;  %v6972_v11 = vunpack.i.h.bf16 %v6970_v37  ;;  %v6971_v19 = vunpack.i.l.bf16 %v6970_v37  ;;  %6483 = vmatprep.subr.bf16.mxu1 %v6482_v34 }
 0xef0   :  { %7187 = vpow2.f32 %v2465_v28 }
 0xef1   :  { %v6484_v2 = vpack.c.bf16 %v6972_v11, %v6971_v19 }
 0xef3   :  { %6485 = vmatpush3.bf16.msra.mxu1 %v6484_v2 }
 0xef4   :  { %6487 = vmatprep.subr.bf16.mxu1 %v6486_v46 }
 0xef5   :  { %v7182_v17 = vpop.eup %7181 }
 0xef6   :  { %v7184_v57 = vpop.eup %7183 }
 0xef7   :  { %2659 = vmatprep.mubr.f32.mxu1 %v7184_v57 }
 0xef8   :  { %2660 = vmatmul.mubr.f32.vlgmr.msra.gmra.mrb[18].mxu1 %v7182_v17 }
 0xef9   :  { %v7186_v54 = vpop.eup %7185  ;;  %6489 = vmatpush3.bf16.msra.mxu1 %v6486_v46  ;;  %v5109_v46 = vld [vmem:[%s9834_s15 + $0x70] sm:$0xff] }
 0xefa   :  { %v7188_v30 = vpop.eup %7187  ;;  %6491 = vmatprep.subr.bf16.mxu1 %v6490_v39 }
 0xefb   :  { %2664 = vmatprep.mubr.f32.mxu1 %v7188_v30 }
 0xefc   :  { %2665 = vmatmul.mubr.f32.gmra.mrb[20].mxu1 %v7186_v54 }
 0xefd   :  { %6493 = vmatpush3.bf16.msra.mxu1 %v6490_v39 }
 0xfcb   :  { %v5460_v52 = vpop.f32.mrb[18].mxu1 }
 0xfcc   :  { %v5461_v8 = vpop.f32.mrb[19].mxu1 }
 0xfcd   :  { %v5462_v9 = vadd.f32 %v5461_v8, %v5460_v52  ;;  %v6494_v52 = vpack.c.bf16 %v5108_v42, %v5107_v45  ;;  %v5110_v8 = vld [vmem:[%s9834_s15 + $0x78] sm:$0xff] }
 0xfcf   :  { %v2670_v29 = vmax.f32 %v5462_v9, 1e-30  ;;  %v5463_v44 = vpop.f32.mrb[20].mxu1  ;;  %6495 = vmatprep.subr.bf16.mxu1 %v6494_v52 }
 0xfd0   :  { %v5464_v13 = vpop.f32.mrb[21].mxu1 }
 0xfd1   :  { %7189 = vrcp.f32 %v2670_v29  ;;  %v5465_v32 = vadd.f32 %v5464_v13, %v5463_v44  ;;  %v5111_v29 = vld [vmem:[%s9835_s16 + $0x60] sm:$0xff]  ;;  %v5112_v44 = vld [vmem:[%s9835_s16 + $0x68] sm:$0xff] }
 0xfd2   :  { %v6502_v43 = vpack.c.bf16 %v5112_v44, %v5111_v29 }
 0xfd3   :  { %v2671_v61 = vmax.f32 %v5465_v32, 1e-30 }
 0xfd5   :  { %7191 = vrcp.f32 %v2671_v61 }
 0xfdb   :  { %v7190_v24 = vpop.eup %7189 }
 0xfdc   :  { %2676 = vrot.lane.b32.xlu1 %v7190_v24, %s7378_s6 }
 0xfdf   :  { %v7192_v36 = vpop.eup %7191 }
 0xfe0   :  { %2678 = vrot.lane.b32.xlu0 %v7192_v36, %s7378_s6  ;;  %v5061_v36 = vld [vmem:[%s9840_s21 + $0x4] sm:$0x3] }
0x104e   :  { %v2677_v23 = vpop.permute.xlu1 %2676 }
0x104f   :  { %v2682_v38 = vmul.f32 %v5462_v9, %v2677_v23  ;;  %v6498_v9 = vpack.c.bf16 %v5110_v8, %v5109_v46  ;;  %v2802_v23 = vrot.slane %v5061_v36, %v7996_v14 }
0x1051   :  { %5937 = vmatprep.mubr.msk.f32.mxu1 %vm106_vm0, %v2682_v38 }
0x1052   :  { %v2679_v18 = vpop.permute.xlu0 %2678 }
0x1053   :  { %v2683_v27 = vmul.f32 %v5465_v32, %v2679_v18 }
0x1055   :  { %5938 = vmatmul.mubr.msk.f32.vlgmr.msra.gmra.mrb[22].mxu1 %vm106_vm0, %v2683_v27 }
0x1056   :  { %6497 = vmatpush3.bf16.msra.mxu1 %v6494_v52  ;;  %v7242_v52 = vld [vmem:[%s9830_s11 + $0x8] sm:$0xff] }
0x1057   :  { %6499 = vmatprep.subr.bf16.mxu1 %v6498_v9 }
0x105a   :  { %6501 = vmatpush3.bf16.msra.mxu1 %v6498_v9  ;;  %v7243_v9 = vld [vmem:[%s9830_s11 + $0x18] sm:$0xff] }
0x105b   :  { %6503 = vmatprep.subr.bf16.mxu1 %v6502_v43 }
0x1128   :  { %v5939_v16 = vpop.f32.mrb[22].mxu1 }
0x1129   :  { %v2768_v5 = vadd.f32 %v5939_v16, %v5104_v40  ;;  %v2762_v56 = vpop.f32.mrb[23].mxu1  ;;  %v2808_v16 = vrot.slane %v5061_v36, %v8001_v22 }
0x112a   :  { %v2763_v1 = vadd.f32 %v5104_v40, %v2762_v56 }
0x112b   :  { %v2772_v55 = vadd.f32 %v8313_v51, %v2768_v5 }
0x112c   :  { %v2771_v3 = vadd.f32 %v7239_v6, %v2763_v1  ;;  %v5113_v1 = vld [vmem:[%s9835_s16 + $0x70] sm:$0xff] }
0x112d   :  { %v2776_v34 = vsel %vm106_vm0, %v2772_v55, 0.0 }
0x112e   :  { %2777 = vadd.xlane.f32.xlu0 %v2776_v34  ;;  %v2773_v35 = vsel %vm106_vm0, %v2771_v3, 0.0 }
0x112f   :  { %2774 = vadd.xlane.f32.xlu1 %v2773_v35  ;;  %v8920_v35 = vld [vmem:[%s9930_s7] sm:$0xff] }
0x11bb   :  { %v2778_v28 = vpop.xlane.xlu0 %2777 }
0x11bc   :  { %v2780_v37 = vmul.f32 0.03125, %v2778_v28  ;;  %v2775_v11 = vpop.xlane.xlu1 %2774  ;;  %v8927_v28 = vld [vmem:[%s9930_s7 + $0x8] sm:$0xff] }
0x11bd   :  { %v2779_v19 = vmul.f32 0.03125, %v2775_v11 }
0x11be   :  { %v2782_v2 = vsub.f32 %v2772_v55, %v2780_v37  ;;  %v5114_v55 = vld [vmem:[%s9835_s16 + $0x78] sm:$0xff]  ;;  %v5123_v37 = vld [vmem:[%s9837_s18 + $0x3] ss:$0 sm:$0xff] }
0x11bf   :  { %v2781_v17 = vsub.f32 %v2771_v3, %v2779_v19  ;;  %v6506_v34 = vpack.c.bf16 %v5114_v55, %v5113_v1  ;;  %v9968_v55 = vld [vmem:[#allocation27_spill] sm:$0xff] }
0x11c0   :  { %v2784_v57 = vmul.f32 %v2782_v2, %v2782_v2 }
0x11c1   :  { %v2783_v54 = vmul.f32 %v2781_v17, %v2781_v17 }
0x11c2   :  { %v2788_v51 = vsel %vm106_vm0, %v2784_v57, 0.0  ;;  %v5126_v57 = vld [vmem:[%s9838_s19 + $0x3] ss:$0 sm:$0xff] }
0x11c3   :  { %2789 = vadd.xlane.f32.xlu1 %v2788_v51  ;;  %v2785_v30 = vsel %vm106_vm0, %v2783_v54, 0.0 }
0x11c4   :  { %2786 = vadd.xlane.f32.xlu0 %v2785_v30 }
0x1250   :  { %v2790_v12 = vpop.xlane.xlu1 %2789 }
0x1251   :  { %v2792_v13 = vmul.f32 0.03125, %v2790_v12  ;;  %v2787_v39 = vpop.xlane.xlu0 %2786  ;;  %v7245_v12 = vld [vmem:[%s9830_s11 + $0x10] sm:$0xff] }
0x1252   :  { %v2791_v32 = vmul.f32 0.03125, %v2787_v39 }
0x1253   :  { %v2794_v61 = vadd.f32 1e-05, %v2792_v13 }
0x1254   :  { %v2793_v24 = vadd.f32 1e-05, %v2791_v32  ;;  %v9965_v32 = vld [vmem:[#allocation26_spill] sm:$0xff] }
0x1255   :  { %7193 = vrsqrt.f32 %v2794_v61  ;;  %v9966_v61 = vld [vmem:[#allocation25_spill] sm:$0xff] }
0x1256   :  { %7195 = vrsqrt.f32 %v2793_v24 }
0x125f   :  { %v7194_v38 = vpop.eup %7193 }
0x1260   :  { %v7196_v18 = vpop.eup %7195  ;;  %v2798_v27 = vmul.f32 %v7194_v38, %v2782_v2 }
0x1261   :  { %v2797_v40 = vmul.f32 %v7196_v18, %v2781_v17 }
0x1262   :  { %v2804_v5 = vmul.f32 %v2802_v23, %v2798_v27 }
0x1263   :  { %v2803_v56 = vmul.f32 %v2802_v23, %v2797_v40 }
0x1264   :  { %v8911_v3 = vadd.f32 %v2808_v16, %v2804_v5 }
0x1265   :  { %v8909_v6 = vadd.f32 %v2808_v16, %v2803_v56  ;;  %v7246_v16 = vld [vmem:[%s9830_s11 + $0x20] sm:$0xff]  ;;  %v9967_v56 = vld [vmem:[#allocation28_spill] sm:$0xff] }
0x1267   :  { %5948 = vmatprep.mubr.msk.f32.mxu1 %vm106_vm0, %v8909_v6 }
0x1268   :  { %5949 = vmatmul.mubr.msk.f32.vlgmr.msra.gmra.mrb[24].mxu1 %vm106_vm0, %v8911_v3 }
0x1269   :  { %6505 = vmatpush3.bf16.msra.mxu1 %v6502_v43  ;;  %5959 = vmatprep.mubr.msk.f32.mxu1 %vm106_vm0, %v8920_v35 }
0x126a   :  { %6507 = vmatprep.subr.bf16.mxu1 %v6506_v34 }
0x126d   :  { %6509 = vmatpush3.bf16.msra.mxu1 %v6506_v34 }
0x1270   :  { %5960 = vmatmul.mubr.msk.f32.vlgmr.msra.gmra.mrb[26].mxu1 %vm106_vm0, %v8927_v28 }
0x133b   :  { %v5950_v11 = vpop.f32.mrb[24].mxu1 }
0x133c   :  { %v8934_v19 = vadd.f32 %v5950_v11, %v5123_v37  ;;  %v2912_v2 = vpop.f32.mrb[25].mxu1 }
0x133d   :  { %v2913_v17 = vadd.f32 %v5123_v37, %v2912_v2  ;;  %v9969_v37 = vld [vmem:[#allocation30_spill] sm:$0xff] }
0x133f   :  { %5994 = vmatprep.mubr.msk.f32.mxu1 %vm106_vm0, %v2913_v17  ;;  %v9970_v17 = vld [vmem:[#allocation29_spill] sm:$0xff] }
0x1343   :  { %v5961_v54 = vpop.f32.mrb[26].mxu1 }
0x1344   :  { %v8940_v51 = vadd.f32 %v5961_v54, %v5126_v57  ;;  %v2993_v30 = vpop.f32.mrb[27].mxu1  ;;  %v7248_v54 = vld [vmem:[%s9830_s11 + $0x30] sm:$0xff] }
0x1345   :  { %v8942_v45 = vadd.f32 %v5126_v57, %v2993_v30 }
0x1346   :  { %v3021_v42 = vmul.f32 %v8940_v51, %v8044_v33  ;;  %v3019_v46 = vmul.f32 %v8940_v51, %v8046_v48  ;;  %v3003_v8 = vmul.f32 %v7242_v52, %v8940_v51  ;;  %v3005_v29 = vmul.f32 %v7243_v9, %v8940_v51  ;;  %v7244_v48 = vld [vmem:[%s9830_s11] sm:$0xff] }
0x1347   :  { %v3020_v44 = vmul.f32 %v8942_v45, %v8042_v31  ;;  %v3018_v33 = vmul.f32 %v8942_v45, %v8040_v47  ;;  %v3002_v43 = vmul.f32 %v7244_v48, %v8942_v45  ;;  %v3004_v13 = vmul.f32 %v7245_v12, %v8942_v45 }
0x1348   :  { %v3022_v39 = vmul.f32 %v8942_v45, %v8050_v62  ;;  %v3023_v31 = vmul.f32 %v8940_v51, %v8048_v60  ;;  %v3024_v47 = vmul.f32 %v8942_v45, %v9965_v32  ;;  %v3025_v24 = vmul.f32 %v8940_v51, %v9966_v61  ;;  %v7247_v60 = vld [vmem:[%s9830_s11 + $0x28] sm:$0xff]  ;;  %v7253_v61 = vld [vmem:[%s9830_s11 + $0x58] sm:$0xff] }
0x1349   :  { %v6978_v36 = vpack.i.bf16 %v3021_v42, %v3020_v44  ;;  %v6973_v23 = vpack.i.bf16 %v3019_v46, %v3018_v33  ;;  %v6510_v38 = vpack.c.bf16 %v3003_v8, %v3002_v43  ;;  %v6516_v18 = vpack.c.bf16 %v3005_v29, %v3004_v13  ;;  %v7249_v42 = vld [vmem:[%s9830_s11 + $0x38] sm:$0xff]  ;;  %v9972_v29 = vld [vmem:[#allocation31_spill] sm:$0xff]  ;;  %v7250_v33 = vld [vmem:[%s9830_s11 + $0x40] sm:$0xff] }
0x134a   :  { %v6983_v27 = vpack.i.bf16 %v3023_v31, %v3022_v39  ;;  %v6988_v40 = vpack.i.bf16 %v3025_v24, %v3024_v47  ;;  %v3006_v62 = vmul.f32 %v7246_v16, %v8942_v45  ;;  %v3007_v5 = vmul.f32 %v7247_v60, %v8940_v51  ;;  %v9971_v8 = vld [vmem:[#allocation32_spill] sm:$0xff]  ;;  %v7251_v13 = vld [vmem:[%s9830_s11 + $0x48] sm:$0xff]  ;;  %v7252_v31 = vld [vmem:[%s9830_s11 + $0x50] sm:$0xff] }
0x134b   :  { %6979 = vrot.lane.b32.xlu1 %v6978_v36, %s7378_s6  ;;  %6974 = vrot.lane.b32.xlu0 %v6973_v23, %s7378_s6  ;;  %v3026_v1 = vmul.f32 %v8942_v45, %v9967_v56  ;;  %v3027_v34 = vmul.f32 %v8940_v51, %v9968_v55  ;;  %v3028_v11 = vmul.f32 %v8942_v45, %v9969_v37  ;;  %v7254_v36 = vld [vmem:[%s9830_s11 + $0x60] sm:$0xff] }
0x134c   :  { %6512 = vmatprep.subr.msk.bf16.mxu1 %vm7726_vm1, %v6510_v38  ;;  %v6522_v2 = vpack.c.bf16 %v3007_v5, %v3006_v62  ;;  %v3029_v57 = vmul.f32 %v8940_v51, %v9970_v17  ;;  %v3008_v30 = vmul.f32 %v7248_v54, %v8942_v45  ;;  %v3009_v46 = vmul.f32 %v7249_v42, %v8940_v51  ;;  %v7256_v62 = vld [vmem:[%s9830_s11 + $0x70] sm:$0xff]  ;;  %v7257_v5 = vld [vmem:[%s9830_s11 + $0x78] sm:$0xff] }
0x134d   :  { %6515 = vmatpush3.bf16.xpose.msk.msra.mxu1 %vm7726_vm1, %v6510_v38  ;;  %v6993_v52 = vpack.i.bf16 %v3027_v34, %v3026_v1  ;;  %v3030_v9 = vmul.f32 %v8942_v45, %v9971_v8  ;;  %v3031_v44 = vmul.f32 %v8940_v51, %v9972_v29  ;;  %v3010_v48 = vmul.f32 %v7250_v33, %v8942_v45  ;;  %v7255_v38 = vld [vmem:[%s9830_s11 + $0x68] sm:$0xff] }
0x134e   :  { %6518 = vmatprep.subr.msk.bf16.mxu1 %vm7726_vm1, %v6516_v18  ;;  %v6998_v43 = vpack.i.bf16 %v3029_v57, %v3028_v11  ;;  %v6528_v12 = vpack.c.bf16 %v3009_v46, %v3008_v30  ;;  %v3011_v39 = vmul.f32 %v7251_v13, %v8940_v51  ;;  %v3012_v32 = vmul.f32 %v7252_v31, %v8942_v45  ;;  %v9973_v1 = vld [vmem:[#allocation34_spill] sm:$0xff]  ;;  %v9974_v11 = vld [vmem:[#allocation33_spill] sm:$0xff] }
0x134f   :  { %6984 = vrot.lane.b32.xlu1 %v6983_v27, %s7378_s6  ;;  %v7003_v47 = vpack.i.bf16 %v3031_v44, %v3030_v9  ;;  %v3013_v24 = vmul.f32 %v7253_v61, %v8940_v51  ;;  %v3014_v23 = vmul.f32 %v7254_v36, %v8942_v45  ;;  %v3015_v16 = vmul.f32 %v7255_v38, %v8940_v51 }
0x1350   :  { %v6534_v27 = vpack.c.bf16 %v3011_v39, %v3010_v48  ;;  %v3016_v60 = vmul.f32 %v7256_v62, %v8942_v45  ;;  %v3017_v56 = vmul.f32 %v7257_v5, %v8940_v51  ;;  %v9047_v55 = vmul.f32 %v8942_v45, %v9973_v1 }
0x1351   :  { %v6540_v34 = vpack.c.bf16 %v3013_v24, %v3012_v32  ;;  %v6546_v37 = vpack.c.bf16 %v3015_v16, %v3014_v23  ;;  %v9051_v17 = vmul.f32 %v8940_v51, %v9974_v11  ;;  %v3035_v16 = vld [vmem:[%s9975_s28 + $0x8] sm:$0xff] }
0x1352   :  { %v6552_v57 = vpack.c.bf16 %v3017_v56, %v3016_v60 }
0x1353   :  { %6989 = vrot.lane.b32.xlu1 %v6988_v40, %s7378_s6  ;;  %v7008_v54 = vpack.i.bf16 %v9051_v17, %v9047_v55  ;;  %v5115_v55 = vld [vmem:[%s9836_s17 + $0x60] sm:$0xff]  ;;  %v5116_v17 = vld [vmem:[%s9836_s17 + $0x68] sm:$0xff] }
0x1355   :  { %6521 = vmatpush3.bf16.xpose.msk.msra.mxu1 %vm7726_vm1, %v6516_v18 }
0x1356   :  { %6524 = vmatprep.subr.msk.bf16.mxu1 %vm7726_vm1, %v6522_v2 }
0x1357   :  { %6994 = vrot.lane.b32.xlu1 %v6993_v52, %s7378_s6 }
0x135b   :  { %6999 = vrot.lane.b32.xlu1 %v6998_v43, %s7378_s6 }
0x135d   :  { %6527 = vmatpush3.bf16.xpose.msk.msra.mxu1 %vm7726_vm1, %v6522_v2 }
0x135e   :  { %6530 = vmatprep.subr.msk.bf16.mxu1 %vm7726_vm1, %v6528_v12 }
0x135f   :  { %7004 = vrot.lane.b32.xlu1 %v7003_v47, %s7378_s6 }
0x1365   :  { %6533 = vmatpush3.bf16.xpose.msk.msra.mxu1 %vm7726_vm1, %v6528_v12 }
0x1366   :  { %6536 = vmatprep.subr.msk.bf16.mxu1 %vm7726_vm1, %v6534_v27 }
0x136d   :  { %6539 = vmatpush3.bf16.xpose.msk.msra.mxu1 %vm7726_vm1, %v6534_v27  ;;  %v3034_v27 = vld [vmem:[%s9975_s28] sm:$0xff] }
0x136e   :  { %6542 = vmatprep.subr.msk.bf16.mxu1 %vm7726_vm1, %v6540_v34 }
0x1375   :  { %6545 = vmatpush3.bf16.xpose.msk.msra.mxu1 %vm7726_vm1, %v6540_v34 }
0x1376   :  { %6548 = vmatprep.subr.msk.bf16.mxu1 %vm7726_vm1, %v6546_v37 }
0x137d   :  { %6551 = vmatpush3.bf16.xpose.msk.msra.mxu1 %vm7726_vm1, %v6546_v37 }
0x137e   :  { %6554 = vmatprep.subr.msk.bf16.mxu1 %vm7726_vm1, %v6552_v57 }
0x1385   :  { %6557 = vmatpush3.bf16.xpose.msk.msra.mxu1 %vm7726_vm1, %v6552_v57 }
0x138c   :  { %5995 = vmatmul.mubr.msk.f32.vlgmr.msra.gmra.mrb[28].mxu1 %vm106_vm0, %v8934_v19 }
0x13bd   :  { %v6980_v51 = vpop.permute.xlu1 %6979  ;;  %v6975_v45 = vpop.permute.xlu0 %6974 }
0x13be   :  { %v6982_v18 = vunpack.i.h.bf16 %v6980_v51  ;;  %v6981_v40 = vunpack.i.l.bf16 %v6980_v51  ;;  %v6977_v2 = vunpack.i.h.bf16 %v6975_v45  ;;  %v6976_v30 = vunpack.i.l.bf16 %v6975_v45 }
0x13c0   :  { %v6558_v42 = vpack.c.bf16 %v6977_v2, %v6976_v30  ;;  %v6562_v52 = vpack.c.bf16 %v6982_v18, %v6981_v40 }
0x13c1   :  { %v6985_v46 = vpop.permute.xlu1 %6984 }
0x13c2   :  { %v6987_v8 = vunpack.i.h.bf16 %v6985_v46  ;;  %v6986_v9 = vunpack.i.l.bf16 %v6985_v46  ;;  %6559 = vmatprep.subr.bf16.mxu0 %v6558_v42 }
0x13c3   :  { %6561 = vmatpush3.bf16.msra.mxu0 %v6558_v42 }
0x13c4   :  { %6563 = vmatprep.subr.bf16.mxu0 %v6562_v52  ;;  %v6566_v44 = vpack.c.bf16 %v6987_v8, %v6986_v9  ;;  %v5117_v9 = vld [vmem:[%s9836_s17 + $0x70] sm:$0xff] }
0x13c5   :  { %v6990_v29 = vpop.permute.xlu1 %6989 }
0x13c6   :  { %v6992_v33 = vunpack.i.h.bf16 %v6990_v29  ;;  %v6991_v48 = vunpack.i.l.bf16 %v6990_v29  ;;  %v5118_v29 = vld [vmem:[%s9836_s17 + $0x78] sm:$0xff] }
0x13c7   :  { %6565 = vmatpush3.bf16.msra.mxu0 %v6562_v52 }
0x13c8   :  { %6567 = vmatprep.subr.bf16.mxu0 %v6566_v44  ;;  %v6570_v43 = vpack.c.bf16 %v6992_v33, %v6991_v48  ;;  %v5150_v48 = vld [vmem:[%s9834_s15 + $0x80] sm:$0xff] }
0x13c9   :  { %v6995_v19 = vpop.permute.xlu1 %6994 }
0x13ca   :  { %v6997_v12 = vunpack.i.h.bf16 %v6995_v19  ;;  %v6996_v13 = vunpack.i.l.bf16 %v6995_v19  ;;  %v5151_v19 = vld [vmem:[%s9834_s15 + $0x88] sm:$0xff] }
0x13cb   :  { %6569 = vmatpush3.bf16.msra.mxu0 %v6566_v44  ;;  %v6594_v44 = vpack.c.bf16 %v5118_v29, %v5117_v9  ;;  %v7259_v29 = vld [vmem:[%s9828_s9 + $0x8] sm:$0xff] }
0x13cc   :  { %6571 = vmatprep.subr.bf16.mxu0 %v6570_v43  ;;  %v6574_v31 = vpack.c.bf16 %v6997_v12, %v6996_v13 }
0x13cd   :  { %v7000_v39 = vpop.permute.xlu1 %6999 }
0x13ce   :  { %v7002_v32 = vunpack.i.h.bf16 %v7000_v39  ;;  %v7001_v47 = vunpack.i.l.bf16 %v7000_v39 }
0x13cf   :  { %6573 = vmatpush3.bf16.msra.mxu0 %v6570_v43  ;;  %v6598_v43 = vpack.c.bf16 %v5151_v19, %v5150_v48  ;;  %v9982_v48 = vld [vmem:[#allocation39_spill] sm:$0xff] }
0x13d0   :  { %6575 = vmatprep.subr.bf16.mxu0 %v6574_v31  ;;  %v6578_v24 = vpack.c.bf16 %v7002_v32, %v7001_v47  ;;  %v5152_v32 = vld [vmem:[%s9834_s15 + $0x90] sm:$0xff]  ;;  %v5153_v47 = vld [vmem:[%s9834_s15 + $0x98] sm:$0xff] }
0x13d1   :  { %v7005_v61 = vpop.permute.xlu1 %7004 }
0x13d2   :  { %v7007_v36 = vunpack.i.h.bf16 %v7005_v61  ;;  %v7006_v23 = vunpack.i.l.bf16 %v7005_v61 }
0x13d3   :  { %6577 = vmatpush3.bf16.msra.mxu0 %v6574_v31 }
0x13d4   :  { %6579 = vmatprep.subr.bf16.mxu0 %v6578_v24  ;;  %v6582_v38 = vpack.c.bf16 %v7007_v36, %v7006_v23  ;;  %v6602_v36 = vpack.c.bf16 %v5153_v47, %v5152_v32  ;;  %v5154_v23 = vld [vmem:[%s9835_s16 + $0x80] sm:$0xff] }
0x13d7   :  { %6581 = vmatpush3.bf16.msra.mxu0 %v6578_v24 }
0x13d8   :  { %6583 = vmatprep.subr.bf16.mxu0 %v6582_v38 }
0x13db   :  { %6585 = vmatpush3.bf16.msra.mxu0 %v6582_v38  ;;  %v5155_v38 = vld [vmem:[%s9835_s16 + $0x88] sm:$0xff] }
0x145f   :  { %v5996_v62 = vpop.f32.mrb[28].mxu1 }
0x1460   :  { %v3162_v60 = vadd.f32 %v5996_v62, %v3035_v16  ;;  %v3156_v5 = vpop.f32.mrb[29].mxu1  ;;  %v6606_v16 = vpack.c.bf16 %v5155_v38, %v5154_v23  ;;  %v5157_v62 = vld [vmem:[%s9835_s16 + $0x98] sm:$0xff] }
0x1461   :  { %v3157_v56 = vadd.f32 %v3156_v5, %v3034_v27  ;;  %v5156_v27 = vld [vmem:[%s9835_s16 + $0x90] sm:$0xff]  ;;  %v9984_v23 = vld [vmem:[#allocation44_spill] sm:$0xff] }
0x1462   :  { %3167 = vmax.xlane.f32.xlu0 %v3162_v60  ;;  %v9976_v5 = vld [vmem:[#allocation35_spill] sm:$0xff] }
0x1463   :  { %3165 = vmax.xlane.f32.xlu1 %v3157_v56 }
0x1474   :  { %7009 = vrot.lane.b32.xlu1 %v7008_v54, %s7378_s6  ;;  %v6590_v54 = vpack.c.bf16 %v5116_v17, %v5115_v55  ;;  %v9980_v17 = vld [vmem:[#allocation40_spill] sm:$0xff] }
0x14ef   :  { %v3168_v1 = vpop.xlane.xlu0 %3167 }
0x14f0   :  { %v3170_v34 = vsub.f32 %v3162_v60, %v3168_v1  ;;  %v3166_v37 = vpop.xlane.xlu1 %3165  ;;  %v6610_v60 = vpack.c.bf16 %v5157_v62, %v5156_v27  ;;  %v9979_v1 = vld [vmem:[#allocation38_spill] sm:$0xff] }
0x14f1   :  { %v3169_v11 = vsub.f32 %v3157_v56, %v3166_v37  ;;  %v9978_v56 = vld [vmem:[#allocation37_spill] sm:$0xff] }
0x14f2   :  { %v3173_v57 = vmul.f32 1.442695, %v3170_v34 }
0x14f3   :  { %v3171_v51 = vmul.f32 1.442695, %v3169_v11  ;;  %v5166_v11 = vld [vmem:[%s9837_s18 + $0x4] ss:$0 sm:$0xff] }
0x14f4   :  { %v7010_v45 = vpop.permute.xlu1 %7009 }
0x14f5   :  { %7197 = vpow2.f32 %v3171_v51  ;;  %v7012_v18 = vunpack.i.h.bf16 %v7010_v45  ;;  %v7011_v40 = vunpack.i.l.bf16 %v7010_v45 }
0x14f6   :  { %7199 = vpow2.f32 %v3173_v57 }
0x14f7   :  { %v6586_v2 = vpack.c.bf16 %v7012_v18, %v7011_v40  ;;  %v5169_v40 = vld [vmem:[%s9838_s19 + $0x4] ss:$0 sm:$0xff] }
0x14f9   :  { %6587 = vmatprep.subr.bf16.mxu0 %v6586_v2 }
0x14fa   :  { %6589 = vmatpush3.bf16.msra.mxu0 %v6586_v2 }
0x14fb   :  { %6591 = vmatprep.subr.bf16.mxu0 %v6590_v54 }
0x14ff   :  { %v7198_v30 = vpop.eup %7197 }
0x1500   :  { %v7200_v42 = vpop.eup %7199  ;;  %6029 = vmatprep.mubr.f32.mxu0 %v7198_v30 }
0x1501   :  { %6030 = vmatmul.mubr.f32.vlgmr.msra.gmra.mrb[28].mxu0 %v7200_v42 }
0x1502   :  { %6593 = vmatpush3.bf16.msra.mxu0 %v6590_v54 }
0x1503   :  { %6595 = vmatprep.subr.bf16.mxu0 %v6594_v44 }
0x1506   :  { %6597 = vmatpush3.bf16.msra.mxu0 %v6594_v44 }
0x1507   :  { %6599 = vmatprep.subr.bf16.mxu0 %v6598_v43 }
0x15d4   :  { %v6031_v46 = vpop.f32.mrb[28].mxu0 }
0x15d5   :  { %v3305_v52 = vpop.f32.mrb[29].mxu0  ;;  %v3315_v33 = vmax.f32 %v6031_v46, 1e-30 }
0x15d6   :  { %v3314_v8 = vmax.f32 %v3305_v52, 1e-30 }
0x15d8   :  { %7201 = vrcp.f32 %v3314_v8  ;;  %v7258_v8 = vld [vmem:[%s9828_s9 + $0x88] sm:$0xff] }
0x15d9   :  { %7203 = vrcp.f32 %v3315_v33 }
0x15e2   :  { %v7202_v12 = vpop.eup %7201 }
0x15e3   :  { %3320 = vrot.lane.b32.xlu1 %v7202_v12, %s7378_s6  ;;  %v7204_v13 = vpop.eup %7203 }
0x15e7   :  { %3322 = vrot.lane.b32.xlu1 %v7204_v13, %s7378_s6  ;;  %v7260_v13 = vld [vmem:[%s9828_s9 + $0x80] sm:$0xff] }
0x1655   :  { %v3321_v39 = vpop.permute.xlu1 %3320 }
0x1656   :  { %v3326_v31 = vmul.f32 %v3321_v39, %v3305_v52 }
0x1658   :  { %6040 = vmatprep.mubr.msk.f32.mxu0 %vm106_vm0, %v3326_v31  ;;  %v7261_v31 = vld [vmem:[%s9828_s9] sm:$0xff] }
0x1659   :  { %v3323_v61 = vpop.permute.xlu1 %3322 }
0x165a   :  { %v3327_v24 = vmul.f32 %v6031_v46, %v3323_v61  ;;  %v9981_v46 = vld [vmem:[#allocation41_spill] sm:$0xff] }
0x165c   :  { %6041 = vmatmul.mubr.msk.f32.vlgmr.msra.gmra.mrb[30].mxu0 %vm106_vm0, %v3327_v24 }
0x165d   :  { %6601 = vmatpush3.bf16.msra.mxu0 %v6598_v43  ;;  %6051 = vmatprep.mubr.msk.f32.mxu0 %vm106_vm0, %v8920_v35  ;;  %v9977_v35 = vld [vmem:[#allocation36_spill] sm:$0xff]  ;;  %v9983_v43 = vld [vmem:[#allocation42_spill] sm:$0xff] }
0x165e   :  { %6603 = vmatprep.subr.bf16.mxu0 %v6602_v36 }
0x1661   :  { %6605 = vmatpush3.bf16.msra.mxu0 %v6602_v36 }
0x1662   :  { %6607 = vmatprep.subr.bf16.mxu0 %v6606_v16 }
0x1664   :  { %6052 = vmatmul.mubr.msk.f32.vlgmr.msra.gmra.mrb[32].mxu0 %vm106_vm0, %v8927_v28 }
0x1665   :  { %6609 = vmatpush3.bf16.msra.mxu0 %v6606_v16  ;;  %6062 = vmatprep.mubr.msk.f32.mxu0 %vm106_vm0, %v9976_v5 }
0x1666   :  { %6611 = vmatprep.subr.bf16.mxu0 %v6610_v60 }
0x1669   :  { %6613 = vmatpush3.bf16.msra.mxu0 %v6610_v60 }
0x166c   :  { %6063 = vmatmul.mubr.msk.f32.vlgmr.msra.gmra.mrb[34].mxu0 %vm106_vm0, %v9977_v35 }
0x166d   :  { %6065 = vmatprep.mubr.msk.f32.mxu0 %vm106_vm0, %v9978_v56  ;;  %v9985_v56 = vld [vmem:[#allocation43_spill] sm:$0xff] }
0x1670   :  { %6066 = vmatmul.mubr.msk.f32.gmra.mrb[36].mxu0 %vm106_vm0, %v9979_v1 }
0x172f   :  { %v9149_v34 = vpop.f32.mrb[30].mxu0 }
0x1730   :  { %v9151_v37 = vpop.f32.mrb[31].mxu0 }
0x1737   :  { %v6053_v57 = vpop.f32.mrb[32].mxu0 }
0x1738   :  { %v9156_v51 = vadd.f32 %v6053_v57, %v5166_v11  ;;  %v3550_v45 = vpop.f32.mrb[33].mxu0 }
0x1739   :  { %v9158_v18 = vadd.f32 %v5166_v11, %v3550_v45 }
0x173b   :  { %5572 = vmatprep.mubr.msk.f32.mxu0 %vm106_vm0, %v9158_v18 }
0x173f   :  { %v6064_v2 = vpop.f32.mrb[34].mxu0 }
0x1740   :  { %v9165_v30 = vadd.f32 %v6064_v2, %v5169_v40  ;;  %v3631_v42 = vpop.f32.mrb[35].mxu0 }
0x1741   :  { %v9167_v55 = vadd.f32 %v5169_v40, %v3631_v42  ;;  %v9986_v42 = vld [vmem:[#allocation46_spill] sm:$0xff] }
0x1742   :  { %v3699_v54 = vmul.f32 %v9165_v30, %v9980_v17  ;;  %v3683_v52 = vmul.f32 %v9165_v30, %v9981_v46  ;;  %v3667_v9 = vmul.f32 %v7258_v8, %v9165_v30  ;;  %v3651_v44 = vmul.f32 %v7259_v29, %v9165_v30 }
0x1743   :  { %v6067_v33 = vpop.f32.mrb[36].mxu0  ;;  %v3698_v19 = vmul.f32 %v9167_v55, %v9982_v48  ;;  %v3682_v12 = vmul.f32 %v9167_v55, %v9983_v43  ;;  %v3666_v39 = vmul.f32 %v7260_v13, %v9167_v55  ;;  %v3650_v32 = vmul.f32 %v7261_v31, %v9167_v55 }
0x1744   :  { %v9193_v47 = vadd.f32 %v6067_v33, %v5169_v40  ;;  %v3641_v61 = vpop.f32.mrb[37].mxu0  ;;  %v3710_v24 = vmul.f32 %v9167_v55, %v8537_v15  ;;  %v3711_v36 = vmul.f32 %v9165_v30, %v8535_v20  ;;  %v3702_v38 = vmul.f32 %v9167_v55, %v9984_v23  ;;  %v7262_v15 = vld [vmem:[%s9828_s9 + $0x98] sm:$0xff]  ;;  %v7263_v20 = vld [vmem:[%s9828_s9 + $0x90] sm:$0xff] }
0x1745   :  { %v9201_v16 = vadd.f32 %v5169_v40, %v3641_v61  ;;  %v7013_v27 = vpack.i.bf16 %v3699_v54, %v3698_v19  ;;  %v7018_v62 = vpack.i.bf16 %v3683_v52, %v3682_v12  ;;  %v6614_v60 = vpack.c.bf16 %v3667_v9, %v3666_v39  ;;  %v9987_v54 = vld [vmem:[#allocation45_spill] sm:$0xff]  ;;  %v7264_v52 = vld [vmem:[%s9828_s9 + $0x10] sm:$0xff]  ;;  %v7265_v9 = vld [vmem:[%s9828_s9 + $0x18] sm:$0xff] }
0x1746   :  { %v6617_v5 = vpack.c.bf16 %v3651_v44, %v3650_v32  ;;  %v7043_v35 = vpack.i.bf16 %v3711_v36, %v3710_v24  ;;  %v3703_v1 = vmul.f32 %v9165_v30, %v9985_v56  ;;  %v3669_v11 = vmul.f32 %v7262_v15, %v9193_v47  ;;  %v7266_v44 = vld [vmem:[%s9828_s9 + $0xa0] sm:$0xff]  ;;  %v7267_v19 = vld [vmem:[%s9828_s9 + $0xa8] sm:$0xff] }
0x1747   :  { %7014 = vrot.lane.b32.xlu0 %v7013_v27, %s7378_s6  ;;  %7019 = vrot.lane.b32.xlu1 %v7018_v62, %s7378_s6  ;;  %v3668_v57 = vmul.f32 %v7263_v20, %v9201_v16  ;;  %v3700_v45 = vmul.f32 %v9201_v16, %v8497_v58  ;;  %v3701_v40 = vmul.f32 %v9193_v47, %v8495_v53  ;;  %v7271_v62 = vld [vmem:[%s9828_s9 + $0xb8] sm:$0xff]  ;;  %v9988_v56 = vld [vmem:[#allocation53_spill] sm:$0xff] }
0x1748   :  { %6616 = vmatprep.subr.msk.bf16.mxu0 %vm7726_vm1, %v6614_v60  ;;  %v7023_v2 = vpack.i.bf16 %v3703_v1, %v3702_v38  ;;  %v3686_v17 = vmul.f32 %v9167_v55, %v9986_v42  ;;  %v3687_v46 = vmul.f32 %v9165_v30, %v9987_v54  ;;  %v3652_v8 = vmul.f32 %v7264_v52, %v9201_v16  ;;  %v9989_v20 = vld [vmem:[#allocation48_spill] sm:$0xff] }
0x1749   :  { %6619 = vmatpush3.bf16.xpose.msk.msra.mxu0 %vm7726_vm1, %v6617_v5  ;;  %v6620_v53 = vpack.c.bf16 %v3669_v11, %v3668_v57  ;;  %v7053_v58 = vpack.i.bf16 %v3701_v40, %v3700_v45  ;;  %v3653_v29 = vmul.f32 %v7265_v9, %v9193_v47  ;;  %v3670_v33 = vmul.f32 %v7266_v44, %v9167_v55  ;;  %v9990_v45 = vld [vmem:[#allocation47_spill] sm:$0xff]  ;;  %v9991_v9 = vld [vmem:[#allocation50_spill] sm:$0xff]  ;;  %v9992_v44 = vld [vmem:[#allocation49_spill] sm:$0xff] }
0x174a   :  { %v7028_v48 = vpack.i.bf16 %v3687_v46, %v3686_v17  ;;  %v3671_v43 = vmul.f32 %v7267_v19, %v9165_v30  ;;  %v3684_v12 = vmul.f32 %v9201_v16, %v8501_v10  ;;  %v3685_v13 = vmul.f32 %v9193_v47, %v8499_v0  ;;  %v7273_v17 = vld [vmem:[%s9828_s9 + $0x38] sm:$0xff]  ;;  %v7274_v46 = vld [vmem:[%s9828_s9 + $0xc0] sm:$0xff] }
0x174b   :  { %7044 = vrot.lane.b32.xlu0 %v7043_v35, %s7378_s6  ;;  %7024 = vrot.lane.b32.xlu1 %v7023_v2, %s7378_s6  ;;  %v6623_v39 = vpack.c.bf16 %v3653_v29, %v3652_v8  ;;  %v3706_v31 = vmul.f32 %v9167_v55, %v8521_v49  ;;  %v3707_v32 = vmul.f32 %v9165_v30, %v8519_v59  ;;  %v7268_v59 = vld [vmem:[%s9828_s9 + $0x20] sm:$0xff]  ;;  %v7272_v2 = vld [vmem:[%s9828_s9 + $0x30] sm:$0xff]  ;;  %v9993_v19 = vld [vmem:[#allocation52_spill] sm:$0xff] }
0x174c   :  { %6622 = vmatprep.subr.msk.bf16.mxu0 %vm7726_vm1, %v6620_v53  ;;  %v6626_v61 = vpack.c.bf16 %v3671_v43, %v3670_v33  ;;  %v7058_v24 = vpack.i.bf16 %v3685_v13, %v3684_v12  ;;  %v3704_v10 = vmul.f32 %v9201_v16, %v8513_v63  ;;  %v3705_v0 = vmul.f32 %v9193_v47, %v8511_v4  ;;  %v7269_v63 = vld [vmem:[%s9828_s9 + $0x28] sm:$0xff]  ;;  %v9994_v12 = vld [vmem:[#allocation51_spill] sm:$0xff] }
0x174d   :  { %v7033_v36 = vpack.i.bf16 %v3707_v32, %v3706_v31  ;;  %v3690_v23 = vmul.f32 %v9167_v55, %v8525_v7  ;;  %v3691_v49 = vmul.f32 %v9165_v30, %v8523_v50  ;;  %v9267_v38 = vmul.f32 %v7268_v59, %v9167_v55  ;;  %v7270_v7 = vld [vmem:[%s9828_s9 + $0xb0] sm:$0xff]  ;;  %v7275_v53 = vld [vmem:[%s9828_s9 + $0xc8] sm:$0xff]  ;;  %v7276_v32 = vld [vmem:[%s9828_s9 + $0x40] sm:$0xff] }
0x174e   :  { %v7063_v27 = vpack.i.bf16 %v3705_v0, %v3704_v10  ;;  %v9273_v4 = vmul.f32 %v7269_v63, %v9165_v30  ;;  %v9279_v50 = vmul.f32 %v7270_v7, %v9201_v16  ;;  %v9285_v60 = vmul.f32 %v7271_v62, %v9193_v47  ;;  %v7281_v7 = vld [vmem:[%s9828_s9 + $0x58] sm:$0xff]  ;;  %v7282_v62 = vld [vmem:[%s9828_s9 + $0xe0] sm:$0xff] }
0x174f   :  { %7054 = vrot.lane.b32.xlu0 %v7053_v58, %s7378_s6  ;;  %7029 = vrot.lane.b32.xlu1 %v7028_v48, %s7378_s6  ;;  %v7038_v5 = vpack.i.bf16 %v3691_v49, %v3690_v23  ;;  %v9291_v35 = vmul.f32 %v9167_v55, %v8541_v26  ;;  %v9295_v1 = vmul.f32 %v9165_v30, %v9988_v56  ;;  %v7279_v49 = vld [vmem:[%s9828_s9 + $0xd8] sm:$0xff]  ;;  %v7283_v56 = vld [vmem:[%s9828_s9 + $0xe8] sm:$0xff] }
0x1750   :  { %v6629_v15 = vpack.c.bf16 %v9273_v4, %v9267_v38  ;;  %v6632_v11 = vpack.c.bf16 %v9285_v60, %v9279_v50  ;;  %v9303_v57 = vmul.f32 %v9201_v16, %v9989_v20  ;;  %v9307_v40 = vmul.f32 %v9193_v47, %v9990_v45  ;;  %v7280_v38 = vld [vmem:[%s9828_s9 + $0x50] sm:$0xff]  ;;  %v7284_v45 = vld [vmem:[%s9828_s9 + $0x60] sm:$0xff] }
0x1751   :  { %6625 = vmatpush3.bf16.xpose.msk.msra.mxu0 %vm7726_vm1, %v6623_v39  ;;  %v7048_v26 = vpack.i.bf16 %v9295_v1, %v9291_v35  ;;  %v9317_v42 = vmul.f32 %v7272_v2, %v9201_v16  ;;  %v9323_v54 = vmul.f32 %v7273_v17, %v9193_v47  ;;  %v9329_v52 = vmul.f32 %v7274_v46, %v9167_v55  ;;  %v7285_v2 = vld [vmem:[%s9828_s9 + $0x68] sm:$0xff]  ;;  %v7287_v46 = vld [vmem:[%s9828_s9 + $0xf8] sm:$0xff] }
0x1752   :  { %6628 = vmatprep.subr.msk.bf16.mxu0 %vm7726_vm1, %v6626_v61  ;;  %v7068_v8 = vpack.i.bf16 %v9307_v40, %v9303_v57  ;;  %v3675_v58 = vmul.f32 %v7275_v53, %v9165_v30  ;;  %v3708_v29 = vmul.f32 %v9201_v16, %v9991_v9  ;;  %v3709_v33 = vmul.f32 %v9193_v47, %v9992_v44 }
0x1753   :  { %7059 = vrot.lane.b32.xlu0 %v7058_v24, %s7378_s6  ;;  %7034 = vrot.lane.b32.xlu1 %v7033_v36, %s7378_s6  ;;  %v6635_v48 = vpack.c.bf16 %v9323_v54, %v9317_v42  ;;  %v3692_v43 = vmul.f32 %v9201_v16, %v9993_v19  ;;  %v3693_v13 = vmul.f32 %v9193_v47, %v9994_v12  ;;  %v7277_v24 = vld [vmem:[%s9828_s9 + $0x48] sm:$0xff]  ;;  %v7278_v36 = vld [vmem:[%s9828_s9 + $0xd0] sm:$0xff] }
0x1754   :  { %v6638_v39 = vpack.c.bf16 %v3675_v58, %v9329_v52  ;;  %v7073_v31 = vpack.i.bf16 %v3709_v33, %v3708_v29  ;;  %v3658_v61 = vmul.f32 %v7276_v32, %v9167_v55  ;;  %v3659_v10 = vmul.f32 %v7277_v24, %v9165_v30  ;;  %v7289_v58 = vld [vmem:[%s9828_s9 + $0x78] sm:$0xff]  ;;  %v9995_v29 = vld [vmem:[#allocation55_spill] sm:$0xff]  ;;  %v9996_v33 = vld [vmem:[#allocation54_spill] sm:$0xff] }
0x1755   :  { %v7078_v0 = vpack.i.bf16 %v3693_v13, %v3692_v43  ;;  %v3676_v23 = vmul.f32 %v7278_v36, %v9201_v16  ;;  %v3677_v59 = vmul.f32 %v7279_v49, %v9193_v47  ;;  %v3660_v63 = vmul.f32 %v7280_v38, %v9201_v16 }
0x1756   :  { %v6641_v4 = vpack.c.bf16 %v3659_v10, %v3658_v61  ;;  %v3661_v50 = vmul.f32 %v7281_v7, %v9193_v47  ;;  %v3678_v60 = vmul.f32 %v7282_v62, %v9167_v55  ;;  %v3679_v20 = vmul.f32 %v7283_v56, %v9165_v30 }
0x1757   :  { %7064 = vrot.lane.b32.xlu0 %v7063_v27, %s7378_s6  ;;  %7039 = vrot.lane.b32.xlu1 %v7038_v5, %s7378_s6  ;;  %v6644_v57 = vpack.c.bf16 %v3677_v59, %v3676_v23  ;;  %v3662_v40 = vmul.f32 %v7284_v45, %v9167_v55  ;;  %v3663_v42 = vmul.f32 %v7285_v2, %v9165_v30  ;;  %v7286_v27 = vld [vmem:[%s9828_s9 + $0xf0] sm:$0xff] }
0x1758   :  { %v6647_v17 = vpack.c.bf16 %v3661_v50, %v3660_v63  ;;  %v6650_v54 = vpack.c.bf16 %v3679_v20, %v3678_v60  ;;  %v3680_v5 = vmul.f32 %v7286_v27, %v9201_v16  ;;  %v3681_v55 = vmul.f32 %v7287_v46, %v9193_v47  ;;  %v7288_v30 = vld [vmem:[%s9828_s9 + $0x70] sm:$0xff] }
0x1759   :  { %6631 = vmatpush3.bf16.xpose.msk.msra.mxu0 %vm7726_vm1, %v6629_v15  ;;  %v6653_v52 = vpack.c.bf16 %v3663_v42, %v3662_v40  ;;  %v3664_v53 = vmul.f32 %v7288_v30, %v9201_v16  ;;  %v3665_v9 = vmul.f32 %v7289_v58, %v9193_v47  ;;  %v9414_v44 = vmul.f32 %v9201_v16, %v9995_v29 }
0x175a   :  { %6634 = vmatprep.subr.msk.bf16.mxu0 %vm7726_vm1, %v6632_v11  ;;  %v6656_v15 = vpack.c.bf16 %v3681_v55, %v3680_v5  ;;  %v9420_v19 = vmul.f32 %v9193_v47, %v9996_v33  ;;  %v9424_v43 = vmul.f32 %v9201_v16, %v8548_v41  ;;  %v9428_v12 = vmul.f32 %v9193_v47, %v8546_v21 }
0x175b   :  { %7049 = vrot.lane.b32.xlu1 %v7048_v26, %s7378_s6  ;;  %v6659_v13 = vpack.c.bf16 %v3665_v9, %v3664_v53 }
0x175c   :  { %v7088_v11 = vpack.i.bf16 %v9420_v19, %v9414_v44  ;;  %v7083_v32 = vpack.i.bf16 %v9428_v12, %v9424_v43 }
0x175f   :  { %7069 = vrot.lane.b32.xlu1 %v7068_v8, %s7378_s6 }
0x1761   :  { %6637 = vmatpush3.bf16.xpose.msk.msra.mxu0 %vm7726_vm1, %v6635_v48 }
0x1762   :  { %6640 = vmatprep.subr.msk.bf16.mxu0 %vm7726_vm1, %v6638_v39 }
0x1763   :  { %7074 = vrot.lane.b32.xlu1 %v7073_v31, %s7378_s6 }
0x1767   :  { %7079 = vrot.lane.b32.xlu1 %v7078_v0, %s7378_s6 }
0x1769   :  { %6643 = vmatpush3.bf16.xpose.msk.msra.mxu0 %vm7726_vm1, %v6641_v4 }
0x176a   :  { %6646 = vmatprep.subr.msk.bf16.mxu0 %vm7726_vm1, %v6644_v57 }
0x1771   :  { %6649 = vmatpush3.bf16.xpose.msk.msra.mxu0 %vm7726_vm1, %v6647_v17 }
0x1772   :  { %6652 = vmatprep.subr.msk.bf16.mxu0 %vm7726_vm1, %v6650_v54 }
0x1779   :  { %6655 = vmatpush3.bf16.xpose.msk.msra.mxu0 %vm7726_vm1, %v6653_v52 }
0x177a   :  { %6658 = vmatprep.subr.msk.bf16.mxu0 %vm7726_vm1, %v6656_v15 }
0x1781   :  { %6661 = vmatpush3.bf16.xpose.msk.msra.mxu0 %vm7726_vm1, %v6659_v13 }
0x1788   :  { %5573 = vmatmul.mubr.msk.f32.vlgmr.msra.gmra.mrb[38].mxu0 %vm106_vm0, %v9158_v18 }
0x1789   :  { %5574 = vmatprep.mubr.msk.f32.mxu0 %vm106_vm0, %v9156_v51 }
0x178c   :  { %5575 = vmatmul.mubr.msk.f32.gmra.mrb[40].mxu0 %vm106_vm0, %v9156_v51 }
0x17b9   :  { %v7015_v41 = vpop.permute.xlu0 %7014  ;;  %v7020_v21 = vpop.permute.xlu1 %7019 }
0x17ba   :  { %v7017_v47 = vunpack.i.h.bf16 %v7015_v41  ;;  %v7016_v16 = vunpack.i.l.bf16 %v7015_v41  ;;  %v7022_v35 = vunpack.i.h.bf16 %v7020_v21  ;;  %v7021_v1 = vunpack.i.l.bf16 %v7020_v21 }
0x17bc   :  { %v6662_v26 = vpack.c.bf16 %v7017_v47, %v7016_v16  ;;  %v6664_v8 = vpack.c.bf16 %v7022_v35, %v7021_v1 }
0x17bd   :  { %v7045_v48 = vpop.permute.xlu0 %7044  ;;  %v7025_v39 = vpop.permute.xlu1 %7024 }
0x17be   :  { %6663 = vmatprep.subr.bf16.mxu1 %v6662_v26  ;;  %v7027_v0 = vunpack.i.h.bf16 %v7025_v39  ;;  %v7026_v36 = vunpack.i.l.bf16 %v7025_v39  ;;  %v7047_v29 = vunpack.i.h.bf16 %v7045_v48  ;;  %v7046_v15 = vunpack.i.l.bf16 %v7045_v48  ;;  %v3714_v26 = vld [vmem:[%s9997_s8] sm:$0xff] }
0x17bf   :  { %6665 = vmatpush3.bf16.msra.mxu1 %v6664_v8  ;;  %v3715_v8 = vld [vmem:[%s9997_s8 + $0x8] sm:$0xff] }
0x17c0   :  { %v6670_v7 = vpack.c.bf16 %v7027_v0, %v7026_v36  ;;  %v6686_v35 = vpack.c.bf16 %v7047_v29, %v7046_v15 }
0x17c1   :  { %v7055_v31 = vpop.permute.xlu0 %7054  ;;  %v7030_v18 = vpop.permute.xlu1 %7029 }
0x17c2   :  { %v7057_v61 = vunpack.i.h.bf16 %v7055_v31  ;;  %v7056_v24 = vunpack.i.l.bf16 %v7055_v31  ;;  %v7032_v38 = vunpack.i.h.bf16 %v7030_v18  ;;  %v7031_v63 = vunpack.i.l.bf16 %v7030_v18 }
0x17c4   :  { %v6666_v10 = vpack.c.bf16 %v7057_v61, %v7056_v24  ;;  %v6672_v20 = vpack.c.bf16 %v7032_v38, %v7031_v63  ;;  %v3716_v61 = vld [vmem:[%s9997_s8 + $0x10] sm:$0xff]  ;;  %v3717_v24 = vld [vmem:[%s9997_s8 + $0x18] sm:$0xff] }
0x17c5   :  { %v7060_v51 = vpop.permute.xlu0 %7059  ;;  %v7035_v23 = vpop.permute.xlu1 %7034 }
0x17c6   :  { %v7062_v49 = vunpack.i.h.bf16 %v7060_v51  ;;  %v7061_v59 = vunpack.i.l.bf16 %v7060_v51  ;;  %6667 = vmatprep.subr.bf16.mxu1 %v6666_v10  ;;  %v7037_v40 = vunpack.i.h.bf16 %v7035_v23  ;;  %v7036_v2 = vunpack.i.l.bf16 %v7035_v23 }
0x17c8   :  { %v6668_v4 = vpack.c.bf16 %v7062_v49, %v7061_v59  ;;  %v6678_v55 = vpack.c.bf16 %v7037_v40, %v7036_v2 }
0x17c9   :  { %v7065_v50 = vpop.permute.xlu0 %7064  ;;  %v7040_v62 = vpop.permute.xlu1 %7039 }
0x17ca   :  { %v7067_v60 = vunpack.i.h.bf16 %v7065_v50  ;;  %v7066_v56 = vunpack.i.l.bf16 %v7065_v50  ;;  %6669 = vmatpush3.bf16.msra.mxu1 %v6668_v4  ;;  %v7042_v27 = vunpack.i.h.bf16 %v7040_v62  ;;  %v7041_v5 = vunpack.i.l.bf16 %v7040_v62 }
0x17cb   :  { %6671 = vmatprep.subr.bf16.mxu1 %v6670_v7 }
0x17cc   :  { %v6674_v57 = vpack.c.bf16 %v7067_v60, %v7066_v56  ;;  %v6680_v58 = vpack.c.bf16 %v7042_v27, %v7041_v5  ;;  %v5159_v27 = vld [vmem:[%s9836_s17 + $0x88] sm:$0xff] }
0x17cd   :  { %v7050_v45 = vpop.permute.xlu1 %7049 }
0x17ce   :  { %6673 = vmatpush3.bf16.msra.mxu1 %v6672_v20  ;;  %v7052_v21 = vunpack.i.h.bf16 %v7050_v45  ;;  %v7051_v47 = vunpack.i.l.bf16 %v7050_v45 }
0x17cf   :  { %6675 = vmatprep.subr.bf16.mxu1 %v6674_v57 }
0x17d0   :  { %v6688_v1 = vpack.c.bf16 %v7052_v21, %v7051_v47 }
0x17d1   :  { %v7070_v42 = vpop.permute.xlu1 %7069 }
0x17d2   :  { %v7072_v17 = vunpack.i.h.bf16 %v7070_v42  ;;  %v7071_v54 = vunpack.i.l.bf16 %v7070_v42 }
0x17d4   :  { %v6676_v46 = vpack.c.bf16 %v7072_v17, %v7071_v54  ;;  %v5158_v54 = vld [vmem:[%s9836_s17 + $0x80] sm:$0xff] }
0x17d5   :  { %v7075_v52 = vpop.permute.xlu1 %7074  ;;  %v6694_v5 = vpack.c.bf16 %v5159_v27, %v5158_v54  ;;  %v5214_v54 = vld [vmem:[%s9834_s15 + $0xb8] sm:$0xff] }
0x17d6   :  { %v7077_v30 = vunpack.i.h.bf16 %v7075_v52  ;;  %v7076_v53 = vunpack.i.l.bf16 %v7075_v52  ;;  %6677 = vmatpush3.bf16.msra.mxu1 %v6676_v46 }
0x17d7   :  { %6679 = vmatprep.subr.bf16.mxu1 %v6678_v55 }
0x17d8   :  { %v6682_v9 = vpack.c.bf16 %v7077_v30, %v7076_v53 }
0x17d9   :  { %v7080_v33 = vpop.permute.xlu1 %7079 }
0x17da   :  { %v7082_v13 = vunpack.i.h.bf16 %v7080_v33  ;;  %v7081_v41 = vunpack.i.l.bf16 %v7080_v33  ;;  %6681 = vmatpush3.bf16.msra.mxu1 %v6680_v58  ;;  %v5160_v58 = vld [vmem:[%s9836_s17 + $0x90] sm:$0xff] }
0x17db   :  { %6683 = vmatprep.subr.bf16.mxu1 %v6682_v9  ;;  %v5161_v9 = vld [vmem:[%s9836_s17 + $0x98] sm:$0xff] }
0x17dc   :  { %v6684_v16 = vpack.c.bf16 %v7082_v13, %v7081_v41  ;;  %v6698_v15 = vpack.c.bf16 %v5161_v9, %v5160_v58 }
0x17de   :  { %6685 = vmatpush3.bf16.msra.mxu1 %v6684_v16 }
0x17df   :  { %6687 = vmatprep.subr.bf16.mxu1 %v6686_v35 }
0x17e2   :  { %6689 = vmatpush3.bf16.msra.mxu1 %v6688_v1 }
0x185b   :  { %v3886_v48 = vpop.f32.mrb[38].mxu0 }
0x185c   :  { %v3887_v39 = vadd.f32 %v3886_v48, %v3714_v26  ;;  %v3888_v31 = vpop.f32.mrb[39].mxu0  ;;  %v5208_v26 = vld [vmem:[%s9839_s20 + $0x4] ss:$0 sm:$0xff] }
0x185d   :  { %v3889_v18 = vadd.f32 %v3888_v31, %v3715_v8  ;;  %v5147_v8 = vld [vmem:[%s9839_s20 + $0x3] ss:$0 sm:$0xff] }
0x185f   :  { %v3897_v10 = vmax.f32 %v3887_v39, %v3889_v18  ;;  %v3892_v0 = vpop.f32.mrb[40].mxu0 }
0x1860   :  { %v3893_v36 = vadd.f32 %v3892_v0, %v3716_v61  ;;  %v3894_v51 = vpop.f32.mrb[41].mxu0 }
0x1861   :  { %v3895_v23 = vadd.f32 %v3894_v51, %v3717_v24  ;;  %3898 = vmax.xlane.f32.xlu1 %v3897_v10  ;;  %v7290_v10 = vld [vmem:[%s9930_s7] sm:$0xff]  ;;  %v3412_v51 = vadd.f32 %v9149_v34, %v5147_v8 }
0x1863   :  { %v3900_v49 = vmax.f32 %v3893_v36, %v3895_v23 }
0x1865   :  { %3901 = vmax.xlane.f32.xlu0 %v3900_v49 }
0x1872   :  { %7089 = vrot.lane.b32.xlu1 %v7088_v11, %s7378_s6 }
0x187b   :  { %7084 = vrot.lane.b32.xlu0 %v7083_v32, %s7378_s6 }
0x18ee   :  { %v3899_v59 = vpop.xlane.xlu1 %3898 }
0x18ef   :  { %v3903_v38 = vsub.f32 %v3887_v39, %v3899_v59  ;;  %v3904_v63 = vsub.f32 %v3889_v18, %v3899_v59  ;;  %v3407_v18 = vadd.f32 %v5147_v8, %v9151_v37  ;;  %v3416_v37 = vadd.f32 %v3412_v51, %v8911_v3 }
0x18f1   :  { %v3907_v4 = vmul.f32 1.442695, %v3903_v38  ;;  %v3909_v7 = vmul.f32 1.442695, %v3904_v63 }
0x18f2   :  { %v3902_v50 = vpop.xlane.xlu0 %3901  ;;  %v7090_v56 = vpop.permute.xlu1 %7089 }
0x18f3   :  { %7205 = vpow2.f32 %v3907_v4  ;;  %v3905_v62 = vsub.f32 %v3893_v36, %v3902_v50  ;;  %v3906_v60 = vsub.f32 %v3895_v23, %v3902_v50  ;;  %v7092_v44 = vunpack.i.h.bf16 %v7090_v56 }
0x18f4   :  { %7207 = vpow2.f32 %v3909_v7  ;;  %v7091_v19 = vunpack.i.l.bf16 %v7090_v56  ;;  %v3415_v23 = vadd.f32 %v3407_v18, %v8909_v6 }
0x18f5   :  { %v3911_v20 = vmul.f32 1.442695, %v3905_v62  ;;  %v3913_v57 = vmul.f32 1.442695, %v3906_v60 }
0x18f6   :  { %v7085_v11 = vpop.permute.xlu0 %7084  ;;  %v6692_v32 = vpack.c.bf16 %v7092_v44, %v7091_v19  ;;  %v3417_v59 = vsel %vm106_vm0, %v3415_v23, 0.0 }
0x18f7   :  { %7209 = vpow2.f32 %v3911_v20  ;;  %v7087_v45 = vunpack.i.h.bf16 %v7085_v11  ;;  %v7086_v43 = vunpack.i.l.bf16 %v7085_v11 }
0x18f8   :  { %7211 = vpow2.f32 %v3913_v57 }
0x18f9   :  { %v6690_v12 = vpack.c.bf16 %v7087_v45, %v7086_v43 }
0x18fb   :  { %6691 = vmatprep.subr.bf16.mxu1 %v6690_v12 }
0x18fc   :  { %6693 = vmatpush3.bf16.msra.mxu1 %v6692_v32 }
0x18fd   :  { %v7206_v40 = vpop.eup %7205  ;;  %6695 = vmatprep.subr.bf16.mxu1 %v6694_v5 }
0x18fe   :  { %v7208_v2 = vpop.eup %7207 }
0x18ff   :  { %4107 = vmatprep.mubr.f32.mxu1 %v7208_v2  ;;  %v5212_v2 = vld [vmem:[%s9834_s15 + $0xa8] sm:$0xff] }
0x1900   :  { %4108 = vmatmul.mubr.f32.vlgmr.msra.gmra.mrb[30].mxu1 %v7206_v40  ;;  %v5211_v40 = vld [vmem:[%s9834_s15 + $0xa0] sm:$0xff] }
0x1901   :  { %v7210_v42 = vpop.eup %7209  ;;  %6697 = vmatpush3.bf16.msra.mxu1 %v6694_v5  ;;  %v5215_v5 = vld [vmem:[%s9835_s16 + $0xa0] sm:$0xff] }
0x1902   :  { %v7212_v17 = vpop.eup %7211  ;;  %6699 = vmatprep.subr.bf16.mxu1 %v6698_v15 }
0x1903   :  { %4112 = vmatprep.mubr.f32.mxu1 %v7212_v17  ;;  %v6702_v17 = vpack.c.bf16 %v5212_v2, %v5211_v40  ;;  %v7292_v2 = vld [vmem:[%s9832_s13 + $0x18] sm:$0xff] }
0x1904   :  { %4113 = vmatmul.mubr.f32.gmra.mrb[32].mxu1 %v7210_v42  ;;  %v5213_v42 = vld [vmem:[%s9834_s15 + $0xb0] sm:$0xff] }
0x1905   :  { %6701 = vmatpush3.bf16.msra.mxu1 %v6698_v15  ;;  %v6706_v27 = vpack.c.bf16 %v5214_v54, %v5213_v42 }
0x1906   :  { %6703 = vmatprep.subr.bf16.mxu1 %v6702_v17 }
0x19d3   :  { %v5608_v46 = vpop.f32.mrb[30].mxu1 }
0x19d4   :  { %v5609_v55 = vpop.f32.mrb[31].mxu1 }
0x19d5   :  { %v5610_v52 = vadd.f32 %v5609_v55, %v5608_v46  ;;  %v5216_v46 = vld [vmem:[%s9835_s16 + $0xa8] sm:$0xff] }
0x19d6   :  { %v6710_v55 = vpack.c.bf16 %v5216_v46, %v5215_v5  ;;  %v7293_v46 = vld [vmem:[%s9832_s13] sm:$0xff] }
0x19d7   :  { %v4118_v30 = vmax.f32 %v5610_v52, 1e-30  ;;  %v5611_v53 = vpop.f32.mrb[32].mxu1 }
0x19d8   :  { %v5612_v29 = vpop.f32.mrb[33].mxu1 }
0x19d9   :  { %7213 = vrcp.f32 %v4118_v30  ;;  %v5613_v33 = vadd.f32 %v5612_v29, %v5611_v53 }
0x19db   :  { %v4119_v13 = vmax.f32 %v5613_v33, 1e-30 }
0x19dd   :  { %7215 = vrcp.f32 %v4119_v13 }
0x19e3   :  { %v7214_v41 = vpop.eup %7213 }
0x19e4   :  { %4124 = vrot.lane.b32.xlu0 %v7214_v41, %s7378_s6 }
0x19e7   :  { %v7216_v21 = vpop.eup %7215 }
0x19e8   :  { %4126 = vrot.lane.b32.xlu1 %v7216_v21, %s7378_s6 }
0x1a56   :  { %v4125_v47 = vpop.permute.xlu0 %4124 }
0x1a57   :  { %v4130_v16 = vmul.f32 %v5610_v52, %v4125_v47  ;;  %v5165_v47 = vld [vmem:[%s9840_s21 + $0x8] sm:$0x3] }
0x1a59   :  { %6076 = vmatprep.mubr.msk.f32.mxu1 %vm106_vm0, %v4130_v16 }
0x1a5a   :  { %v4127_v35 = vpop.permute.xlu1 %4126 }
0x1a5b   :  { %v4131_v1 = vmul.f32 %v5613_v33, %v4127_v35  ;;  %v4250_v35 = vrot.slane %v5165_v47, %v7996_v14 }
0x1a5d   :  { %6077 = vmatmul.mubr.msk.f32.vlgmr.msra.gmra.mrb[34].mxu1 %vm106_vm0, %v4131_v1 }
0x1a5e   :  { %6705 = vmatpush3.bf16.msra.mxu1 %v6702_v17  ;;  %v10000_v17 = vld [vmem:[#allocation9_spill] sm:$0xff] }
0x1a5f   :  { %6707 = vmatprep.subr.bf16.mxu1 %v6706_v27 }
0x1a62   :  { %6709 = vmatpush3.bf16.msra.mxu1 %v6706_v27  ;;  %v10001_v27 = vld [vmem:[#allocation10_spill] sm:$0xff] }
0x1a63   :  { %6711 = vmatprep.subr.bf16.mxu1 %v6710_v55 }
0x1b30   :  { %v6078_v48 = vpop.f32.mrb[34].mxu1 }
0x1b31   :  { %v4216_v39 = vadd.f32 %v6078_v48, %v5208_v26  ;;  %v4210_v31 = vpop.f32.mrb[35].mxu1  ;;  %v5122_v48 = vld [vmem:[%s9840_s21 + $0x6] sm:$0x3] }
0x1b32   :  { %v4211_v61 = vadd.f32 %v5208_v26, %v4210_v31  ;;  %v4256_v31 = vrot.slane %v5165_v47, %v8001_v22 }
0x1b33   :  { %v4220_v24 = vadd.f32 %v8927_v28, %v4216_v39  ;;  %v3420_v28 = vsel %vm106_vm0, %v3416_v37, 0.0 }
0x1b34   :  { %v4219_v0 = vadd.f32 %v7290_v10, %v4211_v61  ;;  %v5218_v10 = vld [vmem:[%s9835_s16 + $0xb8] sm:$0xff] }
0x1b35   :  { %v4224_v36 = vsel %vm106_vm0, %v4220_v24, 0.0 }
0x1b36   :  { %4225 = vadd.xlane.f32.xlu1 %v4224_v36  ;;  %v4221_v49 = vsel %vm106_vm0, %v4219_v0, 0.0 }
0x1b37   :  { %4222 = vadd.xlane.f32.xlu0 %v4221_v49  ;;  %v3452_v49 = vrot.slane %v5122_v48, %v8001_v22 }
0x1b3b   :  { %3418 = vadd.xlane.f32.xlu0 %v3417_v59 }
0x1b3f   :  { %3421 = vadd.xlane.f32.xlu0 %v3420_v28 }
0x1bc3   :  { %v4226_v38 = vpop.xlane.xlu1 %4225 }
0x1bc4   :  { %v4228_v63 = vmul.f32 0.03125, %v4226_v38  ;;  %v4223_v4 = vpop.xlane.xlu0 %4222 }
0x1bc5   :  { %v4227_v7 = vmul.f32 0.03125, %v4223_v4 }
0x1bc6   :  { %v4230_v50 = vsub.f32 %v4220_v24, %v4228_v63  ;;  %v5217_v24 = vld [vmem:[%s9835_s16 + $0xb0] sm:$0xff] }
0x1bc7   :  { %v4229_v34 = vsub.f32 %v4219_v0, %v4227_v7  ;;  %v3446_v0 = vrot.slane %v5122_v48, %v7996_v14  ;;  %v6714_v59 = vpack.c.bf16 %v5218_v10, %v5217_v24  ;;  %v10007_v24 = vld [vmem:[#allocation17_spill] sm:$0xff] }
0x1bc8   :  { %v3419_v62 = vpop.xlane.xlu0 %3418  ;;  %v4232_v6 = vmul.f32 %v4230_v50, %v4230_v50 }
0x1bc9   :  { %v3423_v60 = vmul.f32 0.03125, %v3419_v62  ;;  %v4231_v56 = vmul.f32 %v4229_v34, %v4229_v34 }
0x1bca   :  { %v4236_v20 = vsel %vm106_vm0, %v4232_v6, 0.0 }
0x1bcb   :  { %v3425_v57 = vsub.f32 %v3415_v23, %v3423_v60  ;;  %4237 = vadd.xlane.f32.xlu0 %v4236_v20  ;;  %v4233_v3 = vsel %vm106_vm0, %v4231_v56, 0.0  ;;  %v5230_v20 = vld [vmem:[%s9838_s19 + $0x5] ss:$0 sm:$0xff] }
0x1bcc   :  { %4234 = vadd.xlane.f32.xlu1 %v4233_v3  ;;  %v3422_v44 = vpop.xlane.xlu0 %3421 }
0x1bcd   :  { %v3424_v19 = vmul.f32 0.03125, %v3422_v44  ;;  %v3427_v11 = vmul.f32 %v3425_v57, %v3425_v57 }
0x1bcf   :  { %v3426_v45 = vsub.f32 %v3416_v37, %v3424_v19  ;;  %v3429_v43 = vsel %vm106_vm0, %v3427_v11, 0.0  ;;  %v9998_v11 = vld [vmem:[#allocation11_spill] sm:$0xff] }
0x1bd0   :  { %3430 = vadd.xlane.f32.xlu1 %v3429_v43  ;;  %v9999_v43 = vld [vmem:[#allocation12_spill] sm:$0xff] }
0x1bd1   :  { %v3428_v12 = vmul.f32 %v3426_v45, %v3426_v45 }
0x1bd3   :  { %v3432_v32 = vsel %vm106_vm0, %v3428_v12, 0.0 }
0x1bd4   :  { %3433 = vadd.xlane.f32.xlu0 %v3432_v32  ;;  %v7291_v32 = vld [vmem:[%s9832_s13 + $0x8] sm:$0xff] }
0x1c58   :  { %v4238_v52 = vpop.xlane.xlu0 %4237 }
0x1c59   :  { %v4240_v30 = vmul.f32 0.03125, %v4238_v52  ;;  %v4235_v53 = vpop.xlane.xlu1 %4234  ;;  %v7294_v52 = vld [vmem:[%s9832_s13 + $0x10] sm:$0xff] }
0x1c5a   :  { %v4239_v58 = vmul.f32 0.03125, %v4235_v53  ;;  %v10002_v53 = vld [vmem:[#allocation14_spill] sm:$0xff] }
0x1c5b   :  { %v4242_v9 = vadd.f32 1e-05, %v4240_v30 }
0x1c5c   :  { %v4241_v29 = vadd.f32 1e-05, %v4239_v58 }
0x1c5d   :  { %7217 = vrsqrt.f32 %v4242_v9  ;;  %v3431_v15 = vpop.xlane.xlu1 %3430  ;;  %v10003_v9 = vld [vmem:[#allocation13_spill] sm:$0xff] }
0x1c5e   :  { %7219 = vrsqrt.f32 %v4241_v29  ;;  %v3435_v33 = vmul.f32 0.03125, %v3431_v15  ;;  %v10004_v15 = vld [vmem:[#allocation16_spill] sm:$0xff] }
0x1c60   :  { %v3437_v13 = vadd.f32 1e-05, %v3435_v33 }
0x1c61   :  { %v3434_v41 = vpop.xlane.xlu0 %3433 }
0x1c62   :  { %7221 = vrsqrt.f32 %v3437_v13  ;;  %v3436_v21 = vmul.f32 0.03125, %v3434_v41  ;;  %v10005_v13 = vld [vmem:[#allocation15_spill] sm:$0xff] }
0x1c64   :  { %v3438_v16 = vadd.f32 1e-05, %v3436_v21 }
0x1c66   :  { %7223 = vrsqrt.f32 %v3438_v16 }
0x1c67   :  { %v7218_v1 = vpop.eup %7217 }
0x1c68   :  { %v7220_v26 = vpop.eup %7219  ;;  %v4246_v8 = vmul.f32 %v7218_v1, %v4230_v50 }
0x1c69   :  { %v4245_v39 = vmul.f32 %v7220_v26, %v4229_v34  ;;  %v5227_v34 = vld [vmem:[%s9837_s18 + $0x5] ss:$0 sm:$0xff] }
0x1c6a   :  { %v4252_v18 = vmul.f32 %v4250_v35, %v4246_v8  ;;  %v7295_v8 = vld [vmem:[%s9832_s13 + $0x20] sm:$0xff] }
0x1c6b   :  { %v4251_v61 = vmul.f32 %v4250_v35, %v4245_v39  ;;  %v7296_v39 = vld [vmem:[%s9832_s13 + $0x28] sm:$0xff] }
0x1c6c   :  { %v7222_v36 = vpop.eup %7221  ;;  %v9559_v37 = vadd.f32 %v4256_v31, %v4252_v18  ;;  %v10006_v18 = vld [vmem:[#allocation18_spill] sm:$0xff] }
0x1c6d   :  { %v9556_v51 = vadd.f32 %v4256_v31, %v4251_v61  ;;  %v3441_v23 = vmul.f32 %v7222_v36, %v3425_v57 }
0x1c6f   :  { %6087 = vmatprep.mubr.msk.f32.mxu1 %vm106_vm0, %v9556_v51  ;;  %v3447_v28 = vmul.f32 %v3446_v0, %v3441_v23 }
0x1c70   :  { %v7224_v38 = vpop.eup %7223  ;;  %6088 = vmatmul.mubr.msk.f32.vlgmr.msra.gmra.mrb[36].mxu1 %vm106_vm0, %v9559_v37 }
0x1c71   :  { %v3442_v63 = vmul.f32 %v7224_v38, %v3426_v45  ;;  %6713 = vmatpush3.bf16.msra.mxu1 %v6710_v55  ;;  %v3453_v4 = vadd.f32 %v3452_v49, %v3447_v28  ;;  %v7297_v28 = vld [vmem:[%s9832_s13 + $0x30] sm:$0xff] }
0x1c72   :  { %6715 = vmatprep.subr.bf16.mxu1 %v6714_v59 }
0x1c73   :  { %v3448_v7 = vmul.f32 %v3446_v0, %v3442_v63  ;;  %6098 = vmatprep.mubr.msk.f32.mxu1 %vm106_vm0, %v3453_v4  ;;  %4915 = vst.msk [vmem:[#allocation6] sm:$0xff] %vm106_vm0, %v3453_v4  ;;  %v10008_v0 = vld [vmem:[#allocation20_spill] sm:$0xff] }
0x1c74   :  { %v7298_v63 = vld [vmem:[%s9832_s13 + $0x38] sm:$0xff] }
0x1c75   :  { %v3454_v50 = vadd.f32 %v3452_v49, %v3448_v7  ;;  %6717 = vmatpush3.bf16.msra.mxu1 %v6714_v59  ;;  %v10009_v49 = vld [vmem:[#allocation19_spill] sm:$0xff] }
0x1c77   :  { %4916 = vst.msk [vmem:[#allocation6 + $0x8] sm:$0xff] %vm106_vm0, %v3454_v50 }
0x1c78   :  { %6099 = vmatmul.mubr.msk.f32.vlgmr.msra.gmra.mrb[38].mxu1 %vm106_vm0, %v3454_v50  ;;  %v10010_v50 = vld [vmem:[#allocation22_spill] sm:$0xff] }
0x1d43   :  { %v6089_v62 = vpop.f32.mrb[36].mxu1 }
0x1d44   :  { %v9572_v6 = vadd.f32 %v6089_v62, %v5227_v34  ;;  %v4360_v60 = vpop.f32.mrb[37].mxu1  ;;  %v10011_v62 = vld [vmem:[#allocation21_spill] sm:$0xff] }
0x1d45   :  { %v4361_v56 = vadd.f32 %v5227_v34, %v4360_v60 }
0x1d47   :  { %6133 = vmatprep.mubr.msk.f32.mxu1 %vm106_vm0, %v4361_v56  ;;  %v7299_v56 = vld [vmem:[%s9832_s13 + $0x40] sm:$0xff] }
0x1d4b   :  { %v6100_v57 = vpop.f32.mrb[38].mxu1 }
0x1d4c   :  { %v9578_v3 = vadd.f32 %v6100_v57, %v5230_v20  ;;  %v4447_v44 = vpop.f32.mrb[39].mxu1 }
0x1d4d   :  { %v9580_v19 = vadd.f32 %v5230_v20, %v4447_v44 }
0x1d4e   :  { %v4475_v45 = vmul.f32 %v9578_v3, %v9998_v11  ;;  %v4473_v12 = vmul.f32 %v9578_v3, %v9999_v43  ;;  %v4457_v40 = vmul.f32 %v7291_v32, %v9578_v3  ;;  %v4459_v42 = vmul.f32 %v7292_v2, %v9578_v3  ;;  %v7300_v11 = vld [vmem:[%s9832_s13 + $0x48] sm:$0xff]  ;;  %v7301_v43 = vld [vmem:[%s9832_s13 + $0x50] sm:$0xff] }
0x1d4f   :  { %v4474_v54 = vmul.f32 %v9580_v19, %v10000_v17  ;;  %v4472_v5 = vmul.f32 %v9580_v19, %v10001_v27  ;;  %v4456_v55 = vmul.f32 %v7293_v46, %v9580_v19  ;;  %v4458_v30 = vmul.f32 %v7294_v52, %v9580_v19  ;;  %v7305_v46 = vld [vmem:[%s9832_s13 + $0x70] sm:$0xff]  ;;  %v7306_v52 = vld [vmem:[%s9832_s13 + $0x78] sm:$0xff] }
0x1d50   :  { %v4476_v58 = vmul.f32 %v9580_v19, %v10002_v53  ;;  %v4477_v29 = vmul.f32 %v9578_v3, %v10003_v9  ;;  %v4478_v33 = vmul.f32 %v9580_v19, %v10004_v15  ;;  %v4479_v41 = vmul.f32 %v9578_v3, %v10005_v13  ;;  %v10012_v53 = vld [vmem:[#allocation24_spill] sm:$0xff]  ;;  %v10013_v15 = vld [vmem:[#allocation23_spill] sm:$0xff] }
0x1d51   :  { %v7098_v21 = vpack.i.bf16 %v4475_v45, %v4474_v54  ;;  %v7093_v47 = vpack.i.bf16 %v4473_v12, %v4472_v5  ;;  %v6718_v16 = vpack.c.bf16 %v4457_v40, %v4456_v55  ;;  %v6724_v35 = vpack.c.bf16 %v4459_v42, %v4458_v30  ;;  %v7302_v40 = vld [vmem:[%s9832_s13 + $0x58] sm:$0xff]  ;;  %v7303_v42 = vld [vmem:[%s9832_s13 + $0x60] sm:$0xff]  ;;  %v7304_v54 = vld [vmem:[%s9832_s13 + $0x68] sm:$0xff] }
0x1d52   :  { %v7103_v1 = vpack.i.bf16 %v4477_v29, %v4476_v58  ;;  %v7108_v26 = vpack.i.bf16 %v4479_v41, %v4478_v33  ;;  %v4460_v48 = vmul.f32 %v7295_v8, %v9580_v19  ;;  %v4461_v31 = vmul.f32 %v7296_v39, %v9578_v3 }
0x1d53   :  { %7099 = vrot.lane.b32.xlu0 %v7098_v21, %s7378_s6  ;;  %7094 = vrot.lane.b32.xlu1 %v7093_v47, %s7378_s6  ;;  %v4480_v61 = vmul.f32 %v9580_v19, %v10006_v18  ;;  %v4481_v10 = vmul.f32 %v9578_v3, %v10007_v24  ;;  %v4482_v36 = vmul.f32 %v9580_v19, %v10008_v0 }
0x1d54   :  { %6720 = vmatprep.subr.msk.bf16.mxu1 %vm7726_vm1, %v6718_v16  ;;  %v6730_v23 = vpack.c.bf16 %v4461_v31, %v4460_v48  ;;  %v4483_v59 = vmul.f32 %v9578_v3, %v10009_v49  ;;  %v4462_v38 = vmul.f32 %v7297_v28, %v9580_v19  ;;  %v4463_v4 = vmul.f32 %v7298_v63, %v9578_v3 }
0x1d55   :  { %6723 = vmatpush3.bf16.xpose.msk.msra.mxu1 %vm7726_vm1, %v6718_v16  ;;  %v7113_v7 = vpack.i.bf16 %v4481_v10, %v4480_v61  ;;  %v4484_v34 = vmul.f32 %v9580_v19, %v10010_v50  ;;  %v4485_v60 = vmul.f32 %v9578_v3, %v10011_v62  ;;  %v4464_v20 = vmul.f32 %v7299_v56, %v9580_v19  ;;  %v4489_v50 = vld [vmem:[%s10014_s10 + $0x8] sm:$0xff] }
0x1d56   :  { %6726 = vmatprep.subr.msk.bf16.mxu1 %vm7726_vm1, %v6724_v35  ;;  %v7118_v57 = vpack.i.bf16 %v4483_v59, %v4482_v36  ;;  %v6736_v44 = vpack.c.bf16 %v4463_v4, %v4462_v38  ;;  %v4465_v45 = vmul.f32 %v7300_v11, %v9578_v3  ;;  %v4466_v12 = vmul.f32 %v7301_v43, %v9580_v19 }
0x1d57   :  { %7104 = vrot.lane.b32.xlu0 %v7103_v1, %s7378_s6  ;;  %v7123_v32 = vpack.i.bf16 %v4485_v60, %v4484_v34  ;;  %v4467_v2 = vmul.f32 %v7302_v40, %v9578_v3  ;;  %v4468_v17 = vmul.f32 %v7303_v42, %v9580_v19  ;;  %v4469_v27 = vmul.f32 %v7304_v54, %v9578_v3  ;;  %v4488_v34 = vld [vmem:[%s10014_s10] sm:$0xff] }
0x1d58   :  { %v6742_v5 = vpack.c.bf16 %v4465_v45, %v4464_v20  ;;  %v4470_v55 = vmul.f32 %v7305_v46, %v9580_v19  ;;  %v4471_v30 = vmul.f32 %v7306_v52, %v9578_v3  ;;  %v9685_v58 = vmul.f32 %v9580_v19, %v10012_v53  ;;  %v5221_v53 = vld [vmem:[%s9836_s17 + $0xb0] sm:$0xff] }
0x1d59   :  { %v6748_v9 = vpack.c.bf16 %v4467_v2, %v4466_v12  ;;  %v6754_v29 = vpack.c.bf16 %v4469_v27, %v4468_v17  ;;  %v9689_v33 = vmul.f32 %v9578_v3, %v10013_v15  ;;  %v5219_v27 = vld [vmem:[%s9836_s17 + $0xa0] sm:$0xff] }
0x1d5a   :  { %v6760_v13 = vpack.c.bf16 %v4471_v30, %v4470_v55 }
0x1d5b   :  { %7109 = vrot.lane.b32.xlu0 %v7108_v26, %s7378_s6  ;;  %v7128_v41 = vpack.i.bf16 %v9689_v33, %v9685_v58  ;;  %v5222_v58 = vld [vmem:[%s9836_s17 + $0xb8] sm:$0xff] }
0x1d5d   :  { %6729 = vmatpush3.bf16.xpose.msk.msra.mxu1 %vm7726_vm1, %v6724_v35 }
0x1d5e   :  { %6732 = vmatprep.subr.msk.bf16.mxu1 %vm7726_vm1, %v6730_v23 }
0x1d5f   :  { %7114 = vrot.lane.b32.xlu0 %v7113_v7, %s7378_s6 }
0x1d63   :  { %7119 = vrot.lane.b32.xlu0 %v7118_v57, %s7378_s6 }
0x1d65   :  { %6735 = vmatpush3.bf16.xpose.msk.msra.mxu1 %vm7726_vm1, %v6730_v23 }
0x1d66   :  { %6738 = vmatprep.subr.msk.bf16.mxu1 %vm7726_vm1, %v6736_v44 }
0x1d67   :  { %7124 = vrot.lane.b32.xlu0 %v7123_v32, %s7378_s6 }
0x1d6d   :  { %6741 = vmatpush3.bf16.xpose.msk.msra.mxu1 %vm7726_vm1, %v6736_v44 }
0x1d6e   :  { %6744 = vmatprep.subr.msk.bf16.mxu1 %vm7726_vm1, %v6742_v5 }
0x1d75   :  { %6747 = vmatpush3.bf16.xpose.msk.msra.mxu1 %vm7726_vm1, %v6742_v5  ;;  %v5220_v5 = vld [vmem:[%s9836_s17 + $0xa8] sm:$0xff] }
0x1d76   :  { %6750 = vmatprep.subr.msk.bf16.mxu1 %vm7726_vm1, %v6748_v9  ;;  %v6798_v46 = vpack.c.bf16 %v5220_v5, %v5219_v27 }
0x1d7d   :  { %6753 = vmatpush3.bf16.xpose.msk.msra.mxu1 %vm7726_vm1, %v6748_v9 }
0x1d7e   :  { %6756 = vmatprep.subr.msk.bf16.mxu1 %vm7726_vm1, %v6754_v29 }
0x1d85   :  { %6759 = vmatpush3.bf16.xpose.msk.msra.mxu1 %vm7726_vm1, %v6754_v29  ;;  %v6802_v29 = vpack.c.bf16 %v5222_v58, %v5221_v53 }
0x1d86   :  { %6762 = vmatprep.subr.msk.bf16.mxu1 %vm7726_vm1, %v6760_v13 }
0x1d8d   :  { %6765 = vmatpush3.bf16.xpose.msk.msra.mxu1 %vm7726_vm1, %v6760_v13 }
0x1d94   :  { %6134 = vmatmul.mubr.msk.f32.vlgmr.msra.gmra.mrb[40].mxu1 %vm106_vm0, %v9572_v6 }
0x1dc5   :  { %v7100_v3 = vpop.permute.xlu0 %7099  ;;  %v7095_v19 = vpop.permute.xlu1 %7094 }
0x1dc6   :  { %v7102_v21 = vunpack.i.h.bf16 %v7100_v3  ;;  %v7101_v47 = vunpack.i.l.bf16 %v7100_v3  ;;  %v7097_v16 = vunpack.i.h.bf16 %v7095_v19  ;;  %v7096_v35 = vunpack.i.l.bf16 %v7095_v19 }
0x1dc8   :  { %v6766_v1 = vpack.c.bf16 %v7097_v16, %v7096_v35  ;;  %v6770_v8 = vpack.c.bf16 %v7102_v21, %v7101_v47  ;;  %v5251_v21 = vld [vmem:[%s9839_s20 + $0x5] ss:$0 sm:$0xff]  ;;  %s7379_s20 = smov [#allocation2]  }
0x1dc9   :  { %v7105_v26 = vpop.permute.xlu0 %7104 }
0x1dca   :  { %v7107_v48 = vunpack.i.h.bf16 %v7105_v26  ;;  %v7106_v39 = vunpack.i.l.bf16 %v7105_v26  ;;  %6767 = vmatprep.subr.bf16.mxu0 %v6766_v1 }
0x1dcb   :  { %6769 = vmatpush3.bf16.msra.mxu0 %v6766_v1 }
0x1dcc   :  { %6771 = vmatprep.subr.bf16.mxu0 %v6770_v8  ;;  %v6774_v25 = vpack.c.bf16 %v7107_v48, %v7106_v39 }
0x1dcd   :  { %v7110_v31 = vpop.permute.xlu0 %7109 }
0x1dce   :  { %v7112_v18 = vunpack.i.h.bf16 %v7110_v31  ;;  %v7111_v61 = vunpack.i.l.bf16 %v7110_v31 }
0x1dcf   :  { %6773 = vmatpush3.bf16.msra.mxu0 %v6770_v8 }
0x1dd0   :  { %6775 = vmatprep.subr.bf16.mxu0 %v6774_v25  ;;  %v6778_v24 = vpack.c.bf16 %v7112_v18, %v7111_v61 }
0x1dd1   :  { %v7115_v6 = vpop.permute.xlu0 %7114 }
0x1dd2   :  { %v7117_v10 = vunpack.i.h.bf16 %v7115_v6  ;;  %v7116_v0 = vunpack.i.l.bf16 %v7115_v6 }
0x1dd3   :  { %6777 = vmatpush3.bf16.msra.mxu0 %v6774_v25 }
0x1dd4   :  { %6779 = vmatprep.subr.bf16.mxu0 %v6778_v24  ;;  %v6782_v23 = vpack.c.bf16 %v7117_v10, %v7116_v0 }
0x1dd5   :  { %v7120_v36 = vpop.permute.xlu0 %7119 }
0x1dd6   :  { %v7122_v49 = vunpack.i.h.bf16 %v7120_v36  ;;  %v7121_v59 = vunpack.i.l.bf16 %v7120_v36 }
0x1dd7   :  { %6781 = vmatpush3.bf16.msra.mxu0 %v6778_v24 }
0x1dd8   :  { %6783 = vmatprep.subr.bf16.mxu0 %v6782_v23  ;;  %v6786_v38 = vpack.c.bf16 %v7122_v49, %v7121_v59 }
0x1dd9   :  { %v7125_v28 = vpop.permute.xlu0 %7124 }
0x1dda   :  { %v7127_v63 = vunpack.i.h.bf16 %v7125_v28  ;;  %v7126_v4 = vunpack.i.l.bf16 %v7125_v28 }
0x1ddb   :  { %6785 = vmatpush3.bf16.msra.mxu0 %v6782_v23 }
0x1ddc   :  { %6787 = vmatprep.subr.bf16.mxu0 %v6786_v38  ;;  %v6790_v7 = vpack.c.bf16 %v7127_v63, %v7126_v4 }
0x1ddf   :  { %6789 = vmatpush3.bf16.msra.mxu0 %v6786_v38 }
0x1de0   :  { %6791 = vmatprep.subr.bf16.mxu0 %v6790_v7 }
0x1de3   :  { %6793 = vmatpush3.bf16.msra.mxu0 %v6790_v7 }
0x1e67   :  { %v6135_v62 = vpop.f32.mrb[40].mxu1 }
0x1e68   :  { %v4616_v60 = vadd.f32 %v6135_v62, %v4489_v50  ;;  %v4610_v56 = vpop.f32.mrb[41].mxu1 }
0x1e69   :  { %v4611_v20 = vadd.f32 %v4610_v56, %v4488_v34 }
0x1e6a   :  { %4621 = vmax.xlane.f32.xlu1 %v4616_v60 }
0x1e6b   :  { %4619 = vmax.xlane.f32.xlu0 %v4611_v20 }
0x1e81   :  { %7129 = vrot.lane.b32.xlu0 %v7128_v41, %s7378_s6 }
0x1ef7   :  { %v4622_v57 = vpop.xlane.xlu1 %4621 }
0x1ef8   :  { %v4624_v44 = vsub.f32 %v4616_v60, %v4622_v57  ;;  %v4620_v11 = vpop.xlane.xlu0 %4619 }
0x1ef9   :  { %v4623_v45 = vsub.f32 %v4611_v20, %v4620_v11 }
0x1efa   :  { %v4627_v43 = vmul.f32 1.442695, %v4624_v44 }
0x1efb   :  { %v4625_v12 = vmul.f32 1.442695, %v4623_v45 }
0x1efc   :  { %v7130_v32 = vpop.permute.xlu0 %7129 }
0x1efd   :  { %7225 = vpow2.f32 %v4625_v12  ;;  %v7132_v40 = vunpack.i.h.bf16 %v7130_v32  ;;  %v7131_v2 = vunpack.i.l.bf16 %v7130_v32 }
0x1efe   :  { %7227 = vpow2.f32 %v4627_v43 }
0x1eff   :  { %v6794_v42 = vpack.c.bf16 %v7132_v40, %v7131_v2 }
0x1f01   :  { %6795 = vmatprep.subr.bf16.mxu0 %v6794_v42 }
0x1f02   :  { %6797 = vmatpush3.bf16.msra.mxu0 %v6794_v42 }
0x1f03   :  { %6799 = vmatprep.subr.bf16.mxu0 %v6798_v46 }
0x1f07   :  { %v7226_v17 = vpop.eup %7225 }
0x1f08   :  { %v7228_v54 = vpop.eup %7227  ;;  %6168 = vmatprep.mubr.f32.mxu0 %v7226_v17 }
0x1f09   :  { %6169 = vmatmul.mubr.f32.vlgmr.msra.gmra.mrb[42].mxu0 %v7228_v54 }
0x1f0a   :  { %6801 = vmatpush3.bf16.msra.mxu0 %v6798_v46 }
0x1f0b   :  { %6803 = vmatprep.subr.bf16.mxu0 %v6802_v29 }
0x1f0e   :  { %6805 = vmatpush3.bf16.msra.mxu0 %v6802_v29 }
0x1fdc   :  { %v6170_v55 = vpop.f32.mrb[42].mxu0 }
0x1fdd   :  { %v4769_v52 = vmax.f32 %v6170_v55, 1e-30  ;;  %v4759_v30 = vpop.f32.mrb[43].mxu0 }
0x1fde   :  { %v4768_v9 = vmax.f32 %v4759_v30, 1e-30 }
0x1fdf   :  { %7229 = vrcp.f32 %v4769_v52 }
0x1fe0   :  { %7231 = vrcp.f32 %v4768_v9 }
0x1fe9   :  { %v7230_v15 = vpop.eup %7229 }
0x1fea   :  { %v7232_v33 = vpop.eup %7231  ;;  %4776 = vrot.lane.b32.xlu1 %v7230_v15, %s7378_s6 }
0x1feb   :  { %4774 = vrot.lane.b32.xlu0 %v7232_v33, %s7378_s6  ;;  %s4922_s6 = sshll.u32 %s7379_s20, 4  ;;  %s4923_s6 = int_to_ptr.vmem [resolvable:$true] %s4922_s6 }
0x1fec   :  { %s7307_s11 = scalar_lea.vmem %s4923_s6, 512  ;;  %p7312_p1 = scmp.lt.s32.totalorder %s4923_s6, %s4923_s6 }
0x1fed   :  { %p7308_p0 = scmp.ne.s32.totalorder %s4923_s6, %s7307_s11  ;;  %p7313_p2 = scmp.lt.s32.totalorder %s7307_s11, %s7307_s11 }
0x1fef   :  { %p7314_p3 = por %p7313_p2, %p7312_p1 }
0x1ff1   :  { %p7315_p4 = pnand %p7314_p3, %p7308_p0 }
0x205c   :  { %v4777_v13 = vpop.permute.xlu1 %4776 }
0x205d   :  { %v4775_v41 = vpop.permute.xlu0 %4774  ;;  %v4781_v19 = vmul.f32 %v6170_v55, %v4777_v13 }
0x205e   :  { %v4780_v3 = vmul.f32 %v4775_v41, %v4759_v30 }
0x2060   :  { %6179 = vmatprep.mubr.msk.f32.mxu0 %vm106_vm0, %v4780_v3 }
0x2061   :  { %6180 = vmatmul.mubr.msk.f32.vlgmr.msra.gmra.mrb[44].mxu0 %vm106_vm0, %v4781_v19 }
0x2134   :  { %v6181_v47 = vpop.f32.mrb[44].mxu0 }
0x2135   :  { %v4866_v16 = vadd.f32 %v6181_v47, %v5251_v21  ;;  %v4860_v35 = vpop.f32.mrb[45].mxu0 }
0x2136   :  { %v4861_v1 = vadd.f32 %v5251_v21, %v4860_v35 }
0x2137   :  { %v4870_v26 = vadd.f32 %v4866_v16, %v9559_v37 }
0x2138   :  { %v4869_v8 = vadd.f32 %v4861_v1, %v9556_v51 }
0x2139   :  { %v4874_v48 = vsel %vm106_vm0, %v4870_v26, 0.0 }
0x213a   :  { %4875 = vadd.xlane.f32.xlu1 %v4874_v48  ;;  %v4871_v39 = vsel %vm106_vm0, %v4869_v8, 0.0 }
0x213b   :  { %4872 = vadd.xlane.f32.xlu0 %v4871_v39 }
0x21c7   :  { %v4876_v31 = vpop.xlane.xlu1 %4875 }
0x21c8   :  { %v4878_v25 = vmul.f32 0.03125, %v4876_v31  ;;  %v4873_v18 = vpop.xlane.xlu0 %4872 }
0x21c9   :  { %v4877_v61 = vmul.f32 0.03125, %v4873_v18 }
0x21ca   :  { %v4880_v6 = vsub.f32 %v4870_v26, %v4878_v25 }
0x21cb   :  { %v4879_v24 = vsub.f32 %v4869_v8, %v4877_v61 }
0x21cc   :  { %v4882_v36 = vmul.f32 %v4880_v6, %v4880_v6 }
0x21cd   :  { %v4881_v10 = vmul.f32 %v4879_v24, %v4879_v24 }
0x21ce   :  { %v4886_v37 = vsel %vm106_vm0, %v4882_v36, 0.0 }
0x21cf   :  { %v4883_v0 = vsel %vm106_vm0, %v4881_v10, 0.0 }
0x21d0   :  { %4884 = vadd.xlane.f32.xlu0 %v4883_v0 }
0x21d4   :  { %4887 = vadd.xlane.f32.xlu0 %v4886_v37 }
0x21d5   :  { %7318 = shalt.err (!%p7315_p4)
}
0x21d6   :  { %s7319_s28 = scalar_lea.hbm %s9841_s22, 512 }
0x21d7   :  { %p7320_p5 = scmp.ne.s32.totalorder %s9841_s22, %s7319_s28  ;;  %p7323_p6 = scmp.lt.u32.totalorder %s7319_s28, %s9841_s22 }
0x21d9   :  { %p7325_p7 = pnand %p7323_p6, %p7320_p5 }
0x21db   :  { %7328 = shalt.err (!%p7325_p7)
}
0x21dc   :  { %s7380_s0 = smov 128   ;;  %s7381_s4 = smov 8   ;;  %v5226_v63 = vld [vmem:[%s9840_s21 + $0xa] sm:$0x3] }
0x21dd   :  { %4928 = dma.vmem_to_hbm [thread:$0]  %s4923_s6, 512, %s9841_s22, [#allocation3], %s7380_s0, %s7380_s0, %s7381_s4   ;;  %v4900_v4 = vrot.slane %v5226_v63, %v7996_v14  ;;  %v4906_v34 = vrot.slane %v5226_v63, %v8001_v22 }
0x21de   :  { %s7382_s22 = smov [#allocation4]   ;;  %s7383_s30 = smov [#allocation6]  }
0x21df   :  { %s4934_s27 = sshll.u32 %s7382_s22, 4  ;;  %s4946_s9 = sshll.u32 %s7383_s30, 4  ;;  %s4935_s27 = int_to_ptr.vmem [resolvable:$true] %s4934_s27  ;;  %s9781_s9 = int_to_ptr.vmem [resolvable:$true] %s4946_s9 }
0x21e0   :  { %s7329_s21 = scalar_lea.vmem %s4935_s27, 256  ;;  %p7334_p9 = scmp.lt.s32.totalorder %s4935_s27, %s4935_s27 }
0x21e1   :  { %p7330_p8 = scmp.ne.s32.totalorder %s4935_s27, %s7329_s21  ;;  %p7335_p10 = scmp.lt.s32.totalorder %s7329_s21, %s7329_s21 }
0x21e3   :  { %p7336_p11 = por %p7335_p10, %p7334_p9 }
0x21e5   :  { %p7337_p12 = pnand %p7336_p11, %p7330_p8 }
0x225d   :  { %v4885_v51 = vpop.xlane.xlu0 %4884 }
0x225e   :  { %v4889_v23 = vmul.f32 0.03125, %v4885_v51 }
0x2260   :  { %v4891_v49 = vadd.f32 1e-05, %v4889_v23 }
0x2261   :  { %v4888_v59 = vpop.xlane.xlu0 %4887 }
0x2262   :  { %7233 = vrsqrt.f32 %v4891_v49  ;;  %v4890_v28 = vmul.f32 0.03125, %v4888_v59 }
0x2264   :  { %v4892_v38 = vadd.f32 1e-05, %v4890_v28 }
0x2266   :  { %7235 = vrsqrt.f32 %v4892_v38 }
0x226c   :  { %v7234_v7 = vpop.eup %7233 }
0x226d   :  { %v4895_v50 = vmul.f32 %v7234_v7, %v4879_v24 }
0x226f   :  { %v4901_v62 = vmul.f32 %v4900_v4, %v4895_v50 }
0x2270   :  { %v7236_v60 = vpop.eup %7235 }
0x2271   :  { %v4896_v56 = vmul.f32 %v7236_v60, %v4880_v6  ;;  %v4907_v20 = vadd.f32 %v4906_v34, %v4901_v62 }
0x2273   :  { %v4902_v57 = vmul.f32 %v4900_v4, %v4896_v56  ;;  %4913 = vst.msk [vmem:[#allocation4] sm:$0xff] %vm106_vm0, %v4907_v20 }
0x2275   :  { %v4908_v44 = vadd.f32 %v4906_v34, %v4902_v57 }
0x2277   :  { %4914 = vst.msk [vmem:[#allocation4 + $0x8] sm:$0xff] %vm106_vm0, %v4908_v44 }
0x2278   :  { %7340 = shalt.err (!%p7337_p12)
}
0x2279   :  { %s7341_s1 = scalar_lea.hbm %s9842_s23, 256 }
0x227a   :  { %p7342_p13 = scmp.ne.s32.totalorder %s9842_s23, %s7341_s1  ;;  %p7345_p0 = scmp.lt.u32.totalorder %s7341_s1, %s9842_s23 }
0x227c   :  { %p7347_p1 = pnand %p7345_p0, %p7342_p13 }
0x227e   :  { %7350 = shalt.err (!%p7347_p1)
}
0x227f   :  { %4940 = dma.vmem_to_hbm [thread:$0]  %s4935_s27, 256, %s9842_s23, [#allocation5], %s7380_s0, %s7380_s0, %s7381_s4  }
0x2280   :  { %s7351_s6 = scalar_lea.vmem %s9781_s9, 256  ;;  %p7356_p3 = scmp.lt.s32.totalorder %s9781_s9, %s9781_s9 }
0x2281   :  { %p7352_p2 = scmp.ne.s32.totalorder %s9781_s9, %s7351_s6  ;;  %p7357_p4 = scmp.lt.s32.totalorder %s7351_s6, %s7351_s6 }
0x2283   :  { %p7358_p5 = por %p7357_p4, %p7356_p3 }
0x2285   :  { %p7359_p6 = pnand %p7358_p5, %p7352_p2 }
0x2287   :  { %7362 = shalt.err (!%p7359_p6)
}
0x2288   :  { %s7363_s26 = scalar_lea.hbm %s9843_s24, 256 }
0x2289   :  { %p7364_p7 = scmp.ne.s32.totalorder %s9843_s24, %s7363_s26  ;;  %p7367_p8 = scmp.lt.u32.totalorder %s7363_s26, %s9843_s24 }
0x228b   :  { %p7369_p9 = pnand %p7367_p8, %p7364_p7 }
0x228d   :  { %7372 = shalt.err (!%p7369_p9)
}
0x228e   :  { %4952 = dma.vmem_to_hbm [thread:$0]  %s9781_s9, 256, %s9843_s24, [#allocation5], %s7380_s0, %s7380_s0, %s7381_s4  }
0x228f   :  { %7373 = dma.done.wait [#allocation3], 512  }
0x2290   :  { %7374 = vsyncadd [#allocation3], 4294966784 }
0x2291   :  { %7375 = dma.done.wait [#allocation5], 512  }
0x2292   :  { %7376 = vsyncadd [#allocation5], 4294966784 }
0x2293   :  { %4962 = vsyncpa [#allocation3], 1 }
0x2294   :  { %4963 = vsyncpa [#allocation5], 1 }

</bundles_post_ra>
